<compile_context>
chip_gen: v5e
topology: v5e:2x2
jax: 0.10.0
libtpu: 0.0.40
codegen_flags: <defaults>
</compile_context>

<pallas_src>
import functools

import jax
import jax.numpy as jnp
import numpy as np
from jax import lax
from jax.experimental import pallas as pl
from jax.experimental.pallas import tpu as pltpu


def _round_up(x, m):
    return (x + m - 1) // m * m


# --------------------------------------------------------------------------
# Pallas kernels
# --------------------------------------------------------------------------
def _conv_mm_kernel(x_ref, w_ref, b_ref, o_ref):
    # One image per grid step: (S, K) @ (K, N) + b, then ReLU.
    # Whole K is VMEM-resident -> single MXU pass, no accumulator scratch.
    acc = jnp.dot(x_ref[0], w_ref[...], preferred_element_type=jnp.float32)
    o_ref[0] = jnp.maximum(acc + b_ref[...], 0.0)


def _head_kernel(feat_ref, eps_ref, wcat_ref, bcat_ref, wc1_ref, bc1_ref,
                 wc2_ref, bc2_ref, mu_ref, lv_ref, pred_ref, *, lp):
    # Fused: [fc_mu | fc_logvar] matmul + bias, reparameterize, clf1+ReLU, clf2.
    # z and the clf hidden activation never leave VMEM.
    feat = feat_ref[0]                                               # (1, K)
    acc = jnp.dot(feat, wcat_ref[...], preferred_element_type=jnp.float32)
    acc = acc + bcat_ref[...]                                        # (1, 2*lp)
    mu = acc[:, :lp]
    lv = acc[:, lp:]
    z = mu + eps_ref[0] * jnp.exp(0.5 * lv)
    h = jnp.dot(z, wc1_ref[...], preferred_element_type=jnp.float32) + bc1_ref[...]
    h = jnp.maximum(h, 0.0)
    pred = jnp.dot(h, wc2_ref[...], preferred_element_type=jnp.float32) + bc2_ref[...]
    mu_ref[0] = mu
    lv_ref[0] = lv
    pred_ref[0] = pred


# --------------------------------------------------------------------------
# Pallas wrappers
# --------------------------------------------------------------------------
def _conv_matmul(patches, wmat, bias):
    """patches: (B, S, K) f32; wmat: (K, N); bias: (1, N) -> ReLU(patches @ wmat + b)."""
    B, S, K = patches.shape
    N = wmat.shape[1]
    return pl.pallas_call(
        _conv_mm_kernel,
        out_shape=jax.ShapeDtypeStruct((B, S, N), jnp.float32),
        grid_spec=pltpu.PrefetchScalarGridSpec(
            num_scalar_prefetch=0,
            grid=(B,),
            in_specs=[
                pl.BlockSpec((1, S, K), lambda b: (b, 0, 0)),
                pl.BlockSpec((K, N), lambda b: (0, 0)),
                pl.BlockSpec((1, N), lambda b: (0, 0)),
            ],
            out_specs=pl.BlockSpec((1, S, N), lambda b: (b, 0, 0)),
        ),
        compiler_params=pltpu.CompilerParams(
            dimension_semantics=("parallel",)),
    )(patches, wmat, bias)


def _head_call(feat3, eps3, wcat, bcat, wc1, bc1, wc2, bc2):
    """feat3: (B,1,K); eps3: (B,1,Lp); fused heads -> (mu, logvar, pred) padded."""
    B, _, K = feat3.shape
    Kf, L2 = wcat.shape
    Lp = L2 // 2
    Hc = wc1.shape[1]
    Np = wc2.shape[1]
    return pl.pallas_call(
        functools.partial(_head_kernel, lp=Lp),
        out_shape=(jax.ShapeDtypeStruct((B, 1, Lp), jnp.float32),
                   jax.ShapeDtypeStruct((B, 1, Lp), jnp.float32),
                   jax.ShapeDtypeStruct((B, 1, Np), jnp.float32)),
        grid_spec=pltpu.PrefetchScalarGridSpec(
            num_scalar_prefetch=0,
            grid=(B,),
            in_specs=[
                pl.BlockSpec((1, 1, K), lambda b: (b, 0, 0)),
                pl.BlockSpec((1, 1, Lp), lambda b: (b, 0, 0)),
                pl.BlockSpec((Kf, L2), lambda b: (0, 0)),
                pl.BlockSpec((1, L2), lambda b: (0, 0)),
                pl.BlockSpec((Lp, Hc), lambda b: (0, 0)),
                pl.BlockSpec((1, Hc), lambda b: (0, 0)),
                pl.BlockSpec((Hc, Np), lambda b: (0, 0)),
                pl.BlockSpec((1, Np), lambda b: (0, 0)),
            ],
            out_specs=[
                pl.BlockSpec((1, 1, Lp), lambda b: (b, 0, 0)),
                pl.BlockSpec((1, 1, Lp), lambda b: (b, 0, 0)),
                pl.BlockSpec((1, 1, Np), lambda b: (b, 0, 0)),
            ],
        ),
        compiler_params=pltpu.CompilerParams(
            dimension_semantics=("parallel",)),
    )(feat3, eps3, wcat, bcat, wc1, bc1, wc2, bc2)


# --------------------------------------------------------------------------
# Plain-JAX glue: k=4, stride=2 patch extraction (XLA fuses the slice+concat)
# --------------------------------------------------------------------------
def _im2col_k4s2(x):
    """x: (B, H, W, C), already zero-padded.  Returns (B, Ho, Wo, 16*C)
    with feature order (kh, kw, c) — matches the weight matrices below."""
    B, H, W, C = x.shape
    Ho = (H - 4) // 2 + 1
    Wo = (W - 4) // 2 + 1
    cols = []
    for kh in range(4):
        for kw in range(4):
            cols.append(x[:, kh:kh + 2 * Ho - 1:2, kw:kw + 2 * Wo - 1:2, :])
    return jnp.concatenate(cols, axis=-1)


# --------------------------------------------------------------------------
# One-time weight preparation (OUTSIDE the jitted forward)
# --------------------------------------------------------------------------
def prepare_params(params, latent_dim=20, num_classes=10):
    Lp = _round_up(latent_dim, 128)
    Hc = params["clf1_w"].shape[1]                 # 128
    Hp = _round_up(Hc, 128)
    Np = _round_up(num_classes, 128)
    feat_dim = params["fc_mu_w"].shape[0]          # 64*7*7
    cout2 = params["conv2_w"].shape[0]             # 64
    hw = feat_dim // cout2                         # 49

    # conv weights as im2col matrices, rows ordered (kh, kw, cin)
    c1 = params["conv1_w"]                         # (32, 1, 4, 4)
    w1 = jnp.transpose(c1, (2, 3, 1, 0)).reshape(-1, c1.shape[0])      # (16, 32)
    c2 = params["conv2_w"]                         # (64, 32, 4, 4)
    w2 = jnp.transpose(c2, (2, 3, 1, 0)).reshape(-1, c2.shape[0])      # (512, 64)
    b1 = params["conv1_b"].reshape(1, -1)
    b2 = params["conv2_b"].reshape(1, -1)

    # Fold PyTorch's (C,H,W) flatten into the FC weights: our feat is in
    # (H,W,C) order, so permute the FC weight rows once here.
    k = jnp.arange(feat_dim)
    perm = (k % cout2) * hw + (k // cout2)         # hwc index -> chw row of W
    wmu = params["fc_mu_w"][perm]
    wlv = params["fc_logvar_w"][perm]
    pad_l = Lp - latent_dim
    wcat = jnp.concatenate([jnp.pad(wmu, ((0, 0), (0, pad_l))),
                            jnp.pad(wlv, ((0, 0), (0, pad_l)))], axis=1)   # (feat, 2*Lp)
    bcat = jnp.concatenate([jnp.pad(params["fc_mu_b"], (0, pad_l)),
                            jnp.pad(params["fc_logvar_b"], (0, pad_l))]).reshape(1, -1)

    wc1 = jnp.pad(params["clf1_w"], ((0, Lp - latent_dim), (0, Hp - Hc)))   # (Lp, Hp)
    bc1 = jnp.pad(params["clf1_b"], (0, Hp - Hc)).reshape(1, -1)
    wc2 = jnp.pad(params["clf2_w"], ((0, Hp - Hc), (0, Np - num_classes)))  # (Hp, Np)
    bc2 = jnp.pad(params["clf2_b"], (0, Np - num_classes)).reshape(1, -1)

    prep = dict(w1=w1, b1=b1, w2=w2, b2=b2, wcat=wcat, bcat=bcat,
                wc1=wc1, bc1=bc1, wc2=wc2, bc2=bc2)
    return jax.tree.map(lambda a: jnp.asarray(a, jnp.float32), prep)


# --------------------------------------------------------------------------
# Enclassifier forward (jitted; takes pre-prepared weights)
# --------------------------------------------------------------------------
def enclassifier_forward(prep, x_nchw, eps, *, latent_dim=20, num_classes=10):
    B, _, H, W = x_nchw.shape
    Lp = prep["wc1"].shape[0]

    # encoder conv1: 1 -> 32, k4, s2, p1, ReLU
    x = x_nchw.reshape(B, H, W, 1)                     # C == 1: NCHW == NHWC
    xpad = jnp.pad(x, ((0, 0), (1, 1), (1, 1), (0, 0)))
    p1 = _im2col_k4s2(xpad)                            # (B, 14, 14, 16)
    _, H1, W1, K1 = p1.shape
    a1 = _conv_matmul(p1.reshape(B, H1 * W1, K1), prep["w1"], prep["b1"])
    C1 = prep["w1"].shape[1]

    # encoder conv2: 32 -> 64, k4, s2, p1, ReLU
    a1 = a1.reshape(B, H1, W1, C1)
    a1p = jnp.pad(a1, ((0, 0), (1, 1), (1, 1), (0, 0)))
    p2 = _im2col_k4s2(a1p)                             # (B, 7, 7, 512)
    _, H2, W2, K2 = p2.shape
    a2 = _conv_matmul(p2.reshape(B, H2 * W2, K2), prep["w2"], prep["b2"])
    C2 = prep["w2"].shape[1]

    # fused heads: [fc_mu|fc_logvar] + reparameterize + clf1 + ReLU + clf2
    feat3 = a2.reshape(B, 1, H2 * W2 * C2)             # (h,w,c) flatten; FC rows pre-permuted
    eps3 = jnp.pad(eps, ((0, 0), (0, Lp - latent_dim)))[:, None, :]
    mu3, lv3, pred3 = _head_call(feat3, eps3, prep["wcat"], prep["bcat"],
                                 prep["wc1"], prep["bc1"], prep["wc2"], prep["bc2"])

    pred = pred3[:, 0, :num_classes]
    mu = mu3[:, 0, :latent_dim]
    logvar = lv3[:, 0, :latent_dim]
    return pred, mu, logvar


# --------------------------------------------------------------------------
# Pure-JAX reference of the PyTorch module (validation only, not the fast path)
# --------------------------------------------------------------------------
def reference_forward(params, x_nchw, eps):
    hp = lax.Precision.HIGHEST
    y = lax.conv_general_dilated(x_nchw, params["conv1_w"], (2, 2), [(1, 1), (1, 1)],
                                 dimension_numbers=("NCHW", "OIHW", "NCHW"), precision=hp)
    y = jax.nn.relu(y + params["conv1_b"][None, :, None, None])
    y = lax.conv_general_dilated(y, params["conv2_w"], (2, 2), [(1, 1), (1, 1)],
                                 dimension_numbers=("NCHW", "OIHW", "NCHW"), precision=hp)
    y = jax.nn.relu(y + params["conv2_b"][None, :, None, None])
    feat = y.reshape(y.shape[0], -1)                   # (C,H,W) flatten, like PyTorch .view
    mu = jnp.dot(feat, params["fc_mu_w"], precision=hp) + params["fc_mu_b"]
    logvar = jnp.dot(feat, params["fc_logvar_w"], precision=hp) + params["fc_logvar_b"]
    z = mu + eps * jnp.exp(0.5 * logvar)
    h = jax.nn.relu(jnp.dot(z, params["clf1_w"], precision=hp) + params["clf1_b"])
    pred = jnp.dot(h, params["clf2_w"], precision=hp) + params["clf2_b"]
    return pred, mu, logvar


# --------------------------------------------------------------------------
# Deterministic synthetic parameters (shapes from Enclassifier.__init__ defaults)
# --------------------------------------------------------------------------
def init_params(key, latent_dim=20, num_classes=10):
    feat_dim = 64 * 7 * 7
    shapes = {
        "conv1_w": (32, 1, 4, 4), "conv1_b": (32,),
        "conv2_w": (64, 32, 4, 4), "conv2_b": (64,),
        # Linear weights stored as (in, out) == PyTorch W.T
        "fc_mu_w": (feat_dim, latent_dim), "fc_mu_b": (latent_dim,),
        "fc_logvar_w": (feat_dim, latent_dim), "fc_logvar_b": (latent_dim,),
        "clf1_w": (latent_dim, 128), "clf1_b": (128,),
        "clf2_w": (128, num_classes), "clf2_b": (num_classes,),
    }
    names = sorted(shapes)
    keys = jax.random.split(key, len(names))
    params = {}
    for name, k in zip(names, keys):
        shp = shapes[name]
        scale = 0.05 if name.endswith("_w") else 0.01
        params[name] = scale * jax.random.normal(k, shp, jnp.float32)
    return params


if __name__ == "__main__":
    key = jax.random.PRNGKey(0)
    k_x, k_p, k_eps = jax.random.split(key, 3)

    LATENT_DIM, NUM_CLASSES, BATCH = 20, 10, 2
    x = jax.random.normal(k_x, (BATCH, 1, 28, 28), jnp.float32)
    params = init_params(k_p, LATENT_DIM, NUM_CLASSES)
    # torch.randn_like(std) equivalent, generated outside the kernel:
    eps = jax.random.normal(k_eps, (BATCH, LATENT_DIM), jnp.float32)

    prep = prepare_params(params, LATENT_DIM, NUM_CLASSES)     # one-time, outside jit
    fwd = jax.jit(functools.partial(enclassifier_forward,
                                    latent_dim=LATENT_DIM, num_classes=NUM_CLASSES))
    pred, mu, logvar = fwd(prep, x, eps)
    jax.block_until_ready((pred, mu, logvar))

    assert pred.shape == (BATCH, NUM_CLASSES)
    assert mu.shape == (BATCH, LATENT_DIM)
    assert logvar.shape == (BATCH, LATENT_DIM)
    assert bool(jnp.all(jnp.isfinite(pred)))

    # Validate against a pure-JAX reference of the PyTorch forward.
    pred_r, mu_r, lv_r = jax.jit(reference_forward)(params, x, eps)
    np.testing.assert_allclose(np.asarray(mu), np.asarray(mu_r), rtol=5e-2, atol=5e-3)
    np.testing.assert_allclose(np.asarray(logvar), np.asarray(lv_r), rtol=5e-2, atol=5e-3)
    np.testing.assert_allclose(np.asarray(pred), np.asarray(pred_r), rtol=5e-2, atol=5e-3)

    print("KERNEL_OK")
</pallas_src>

<mosaic_0001>
module attributes {stable_mosaic.version = 11 : i64} {
  func.func @_conv_mm_kernel(%arg0: i32, %arg1: memref<1x196x16xf32, #tpu.memory_space<vmem>>, %arg2: memref<16x32xf32, #tpu.memory_space<vmem>>, %arg3: memref<1x32xf32, #tpu.memory_space<vmem>>, %arg4: memref<1x196x32xf32, #tpu.memory_space<vmem>>) attributes {dimension_semantics = [#tpu.dimension_semantics<parallel>], iteration_bounds = array<i64: 2>, scalar_prefetch = 0 : i64, scratch_operands = 0 : i64, tpu.core_type = #tpu.core_type<tc>, window_params = [{transform_indices = @transform_0, window_bounds = array<i64: 1, 196, 16>}, {pipeline_mode = #tpu.pipeline_mode<synchronous>, transform_indices = @transform_1, window_bounds = array<i64: 16, 32>}, {pipeline_mode = #tpu.pipeline_mode<synchronous>, transform_indices = @transform_2, window_bounds = array<i64: 1, 32>}, {transform_indices = @transform_3, window_bounds = array<i64: 1, 196, 32>}]} {
    %c0 = arith.constant 0 : index
    %c0_0 = arith.constant 0 : index
    %c0_1 = arith.constant 0 : index
    %0 = vector.load %arg1[%c0, %c0_0, %c0_1] : memref<1x196x16xf32, #tpu.memory_space<vmem>>, vector<1x196x16xf32>
    %1 = vector.shape_cast %0 : vector<1x196x16xf32> to vector<196x16xf32>
    %c0_2 = arith.constant 0 : index
    %c0_3 = arith.constant 0 : index
    %2 = vector.load %arg2[%c0_2, %c0_3] : memref<16x32xf32, #tpu.memory_space<vmem>>, vector<16x32xf32>
    %cst = arith.constant dense<0.000000e+00> : vector<196x32xf32>
    %3 = tpu.matmul %1, %2, %cst {dimension_numbers = #tpu.dot_dimension_numbers<[1], [0], [0], [1], [0, 0, 1, 1], [], []>} : vector<196x16xf32>, vector<16x32xf32>, vector<196x32xf32> -> vector<196x32xf32>
    %c0_4 = arith.constant 0 : index
    %c0_5 = arith.constant 0 : index
    %4 = vector.load %arg3[%c0_4, %c0_5] : memref<1x32xf32, #tpu.memory_space<vmem>>, vector<1x32xf32>
    %5 = vector.broadcast %4 : vector<1x32xf32> to vector<196x32xf32>
    %6 = arith.addf %3, %5 : vector<196x32xf32>
    %cst_6 = arith.constant 0.000000e+00 : f32
    %7 = vector.broadcast %cst_6 : f32 to vector<196x32xf32>
    %8 = arith.maximumf %6, %7 : vector<196x32xf32>
    %c0_7 = arith.constant 0 : index
    %c0_8 = arith.constant 0 : index
    %c0_9 = arith.constant 0 : index
    %9 = vector.load %arg4[%c0_7, %c0_8, %c0_9] : memref<1x196x32xf32, #tpu.memory_space<vmem>>, vector<1x196x32xf32>
    %10 = vector.shape_cast %9 : vector<1x196x32xf32> to vector<196x32xf32>
    %11 = vector.shape_cast %8 : vector<196x32xf32> to vector<1x196x32xf32>
    tpu.vector_store %arg4[%c0_7, %c0_8, %c0_9], %11 {strides = array<i32>} : memref<1x196x32xf32, #tpu.memory_space<vmem>>, vector<1x196x32xf32>,
    return
  }
  func.func @transform_0(%arg0: i32) -> (i32, i32, i32) {
    %c0_i32 = arith.constant 0 : i32
    %c0_i32_0 = arith.constant 0 : i32
    %c0_i32_1 = arith.constant 0 : i32
    return %arg0, %c0_i32, %c0_i32_0 : i32, i32, i32
  }
  func.func @transform_1(%arg0: i32) -> (i32, i32) {
    %c0_i32 = arith.constant 0 : i32
    %c0_i32_0 = arith.constant 0 : i32
    %c0_i32_1 = arith.constant 0 : i32
    return %c0_i32, %c0_i32_0 : i32, i32
  }
  func.func @transform_2(%arg0: i32) -> (i32, i32) {
    %c0_i32 = arith.constant 0 : i32
    %c0_i32_0 = arith.constant 0 : i32
    %c0_i32_1 = arith.constant 0 : i32
    return %c0_i32, %c0_i32_0 : i32, i32
  }
  func.func @transform_3(%arg0: i32) -> (i32, i32, i32) {
    %c0_i32 = arith.constant 0 : i32
    %c0_i32_0 = arith.constant 0 : i32
    %c0_i32_1 = arith.constant 0 : i32
    return %arg0, %c0_i32, %c0_i32_0 : i32, i32, i32
  }
}

module attributes {stable_mosaic.version = 11 : i64} {
  func.func @_conv_mm_kernel(%arg0: i32, %arg1: memref<1x49x512xf32, #tpu.memory_space<vmem>>, %arg2: memref<512x64xf32, #tpu.memory_space<vmem>>, %arg3: memref<1x64xf32, #tpu.memory_space<vmem>>, %arg4: memref<1x49x64xf32, #tpu.memory_space<vmem>>) attributes {dimension_semantics = [#tpu.dimension_semantics<parallel>], iteration_bounds = array<i64: 2>, scalar_prefetch = 0 : i64, scratch_operands = 0 : i64, tpu.core_type = #tpu.core_type<tc>, window_params = [{transform_indices = @transform_0, window_bounds = array<i64: 1, 49, 512>}, {pipeline_mode = #tpu.pipeline_mode<synchronous>, transform_indices = @transform_1, window_bounds = array<i64: 512, 64>}, {pipeline_mode = #tpu.pipeline_mode<synchronous>, transform_indices = @transform_2, window_bounds = array<i64: 1, 64>}, {transform_indices = @transform_3, window_bounds = array<i64: 1, 49, 64>}]} {
    %c0 = arith.constant 0 : index
    %c0_0 = arith.constant 0 : index
    %c0_1 = arith.constant 0 : index
    %0 = vector.load %arg1[%c0, %c0_0, %c0_1] : memref<1x49x512xf32, #tpu.memory_space<vmem>>, vector<1x49x512xf32>
    %1 = vector.shape_cast %0 : vector<1x49x512xf32> to vector<49x512xf32>
    %c0_2 = arith.constant 0 : index
    %c0_3 = arith.constant 0 : index
    %2 = vector.load %arg2[%c0_2, %c0_3] : memref<512x64xf32, #tpu.memory_space<vmem>>, vector<512x64xf32>
    %cst = arith.constant dense<0.000000e+00> : vector<49x64xf32>
    %3 = tpu.matmul %1, %2, %cst {dimension_numbers = #tpu.dot_dimension_numbers<[1], [0], [0], [1], [0, 0, 1, 1], [], []>} : vector<49x512xf32>, vector<512x64xf32>, vector<49x64xf32> -> vector<49x64xf32>
    %c0_4 = arith.constant 0 : index
    %c0_5 = arith.constant 0 : index
    %4 = vector.load %arg3[%c0_4, %c0_5] : memref<1x64xf32, #tpu.memory_space<vmem>>, vector<1x64xf32>
    %5 = vector.broadcast %4 : vector<1x64xf32> to vector<49x64xf32>
    %6 = arith.addf %3, %5 : vector<49x64xf32>
    %cst_6 = arith.constant 0.000000e+00 : f32
    %7 = vector.broadcast %cst_6 : f32 to vector<49x64xf32>
    %8 = arith.maximumf %6, %7 : vector<49x64xf32>
    %c0_7 = arith.constant 0 : index
    %c0_8 = arith.constant 0 : index
    %c0_9 = arith.constant 0 : index
    %9 = vector.load %arg4[%c0_7, %c0_8, %c0_9] : memref<1x49x64xf32, #tpu.memory_space<vmem>>, vector<1x49x64xf32>
    %10 = vector.shape_cast %9 : vector<1x49x64xf32> to vector<49x64xf32>
    %11 = vector.shape_cast %8 : vector<49x64xf32> to vector<1x49x64xf32>
    tpu.vector_store %arg4[%c0_7, %c0_8, %c0_9], %11 {strides = array<i32>} : memref<1x49x64xf32, #tpu.memory_space<vmem>>, vector<1x49x64xf32>,
    return
  }
  func.func @transform_0(%arg0: i32) -> (i32, i32, i32) {
    %c0_i32 = arith.constant 0 : i32
    %c0_i32_0 = arith.constant 0 : i32
    %c0_i32_1 = arith.constant 0 : i32
    return %arg0, %c0_i32, %c0_i32_0 : i32, i32, i32
  }
  func.func @transform_1(%arg0: i32) -> (i32, i32) {
    %c0_i32 = arith.constant 0 : i32
    %c0_i32_0 = arith.constant 0 : i32
    %c0_i32_1 = arith.constant 0 : i32
    return %c0_i32, %c0_i32_0 : i32, i32
  }
  func.func @transform_2(%arg0: i32) -> (i32, i32) {
    %c0_i32 = arith.constant 0 : i32
    %c0_i32_0 = arith.constant 0 : i32
    %c0_i32_1 = arith.constant 0 : i32
    return %c0_i32, %c0_i32_0 : i32, i32
  }
  func.func @transform_3(%arg0: i32) -> (i32, i32, i32) {
    %c0_i32 = arith.constant 0 : i32
    %c0_i32_0 = arith.constant 0 : i32
    %c0_i32_1 = arith.constant 0 : i32
    return %arg0, %c0_i32, %c0_i32_0 : i32, i32, i32
  }
}

module attributes {stable_mosaic.version = 11 : i64} {
  func.func @_head_kernel(%arg0: i32, %arg1: memref<1x1x3136xf32, #tpu.memory_space<vmem>>, %arg2: memref<1x1x128xf32, #tpu.memory_space<vmem>>, %arg3: memref<3136x256xf32, #tpu.memory_space<vmem>>, %arg4: memref<1x256xf32, #tpu.memory_space<vmem>>, %arg5: memref<128x128xf32, #tpu.memory_space<vmem>>, %arg6: memref<1x128xf32, #tpu.memory_space<vmem>>, %arg7: memref<128x128xf32, #tpu.memory_space<vmem>>, %arg8: memref<1x128xf32, #tpu.memory_space<vmem>>, %arg9: memref<1x1x128xf32, #tpu.memory_space<vmem>>, %arg10: memref<1x1x128xf32, #tpu.memory_space<vmem>>, %arg11: memref<1x1x128xf32, #tpu.memory_space<vmem>>) attributes {dimension_semantics = [#tpu.dimension_semantics<parallel>], iteration_bounds = array<i64: 2>, scalar_prefetch = 0 : i64, scratch_operands = 0 : i64, tpu.core_type = #tpu.core_type<tc>, window_params = [{transform_indices = @transform_0, window_bounds = array<i64: 1, 1, 3136>}, {transform_indices = @transform_1, window_bounds = array<i64: 1, 1, 128>}, {pipeline_mode = #tpu.pipeline_mode<synchronous>, transform_indices = @transform_2, window_bounds = array<i64: 3136, 256>}, {pipeline_mode = #tpu.pipeline_mode<synchronous>, transform_indices = @transform_3, window_bounds = array<i64: 1, 256>}, {pipeline_mode = #tpu.pipeline_mode<synchronous>, transform_indices = @transform_4, window_bounds = array<i64: 128, 128>}, {pipeline_mode = #tpu.pipeline_mode<synchronous>, transform_indices = @transform_5, window_bounds = array<i64: 1, 128>}, {pipeline_mode = #tpu.pipeline_mode<synchronous>, transform_indices = @transform_6, window_bounds = array<i64: 128, 128>}, {pipeline_mode = #tpu.pipeline_mode<synchronous>, transform_indices = @transform_7, window_bounds = array<i64: 1, 128>}, {transform_indices = @transform_8, window_bounds = array<i64: 1, 1, 128>}, {transform_indices = @transform_9, window_bounds = array<i64: 1, 1, 128>}, {transform_indices = @transform_10, window_bounds = array<i64: 1, 1, 128>}]} {
    %c0 = arith.constant 0 : index
    %c0_0 = arith.constant 0 : index
    %c0_1 = arith.constant 0 : index
    %0 = vector.load %arg1[%c0, %c0_0, %c0_1] : memref<1x1x3136xf32, #tpu.memory_space<vmem>>, vector<1x1x3136xf32>
    %1 = vector.shape_cast %0 : vector<1x1x3136xf32> to vector<1x3136xf32>
    %c0_2 = arith.constant 0 : index
    %c0_3 = arith.constant 0 : index
    %2 = vector.load %arg3[%c0_2, %c0_3] : memref<3136x256xf32, #tpu.memory_space<vmem>>, vector<3136x256xf32>
    %cst = arith.constant dense<0.000000e+00> : vector<1x256xf32>
    %3 = tpu.matmul %1, %2, %cst {dimension_numbers = #tpu.dot_dimension_numbers<[1], [0], [0], [1], [0, 0, 1, 1], [], []>} : vector<1x3136xf32>, vector<3136x256xf32>, vector<1x256xf32> -> vector<1x256xf32>
    %c0_4 = arith.constant 0 : index
    %c0_5 = arith.constant 0 : index
    %4 = vector.load %arg4[%c0_4, %c0_5] : memref<1x256xf32, #tpu.memory_space<vmem>>, vector<1x256xf32>
    %5 = arith.addf %3, %4 : vector<1x256xf32>
    %6 = vector.extract_strided_slice %5 {offsets = [0, 0], sizes = [1, 128], strides = [1, 1]} : vector<1x256xf32> to vector<1x128xf32>
    %7 = vector.extract_strided_slice %5 {offsets = [0, 128], sizes = [1, 128], strides = [1, 1]} : vector<1x256xf32> to vector<1x128xf32>
    %c0_6 = arith.constant 0 : index
    %c0_7 = arith.constant 0 : index
    %c0_8 = arith.constant 0 : index
    %8 = vector.load %arg2[%c0_6, %c0_7, %c0_8] : memref<1x1x128xf32, #tpu.memory_space<vmem>>, vector<1x1x128xf32>
    %9 = vector.shape_cast %8 : vector<1x1x128xf32> to vector<1x128xf32>
    %cst_9 = arith.constant 5.000000e-01 : f32
    %10 = vector.broadcast %cst_9 : f32 to vector<1x128xf32>
    %11 = arith.mulf %10, %7 : vector<1x128xf32>
    %12 = math.exp %11 : vector<1x128xf32>
    %13 = arith.mulf %9, %12 : vector<1x128xf32>
    %14 = arith.addf %6, %13 : vector<1x128xf32>
    %c0_10 = arith.constant 0 : index
    %c0_11 = arith.constant 0 : index
    %15 = vector.load %arg5[%c0_10, %c0_11] : memref<128x128xf32, #tpu.memory_space<vmem>>, vector<128x128xf32>
    %cst_12 = arith.constant dense<0.000000e+00> : vector<1x128xf32>
    %16 = tpu.matmul %14, %15, %cst_12 {dimension_numbers = #tpu.dot_dimension_numbers<[1], [0], [0], [1], [0, 0, 1, 1], [], []>} : vector<1x128xf32>, vector<128x128xf32>, vector<1x128xf32> -> vector<1x128xf32>
    %c0_13 = arith.constant 0 : index
    %c0_14 = arith.constant 0 : index
    %17 = vector.load %arg6[%c0_13, %c0_14] : memref<1x128xf32, #tpu.memory_space<vmem>>, vector<1x128xf32>
    %18 = arith.addf %16, %17 : vector<1x128xf32>
    %cst_15 = arith.constant 0.000000e+00 : f32
    %19 = vector.broadcast %cst_15 : f32 to vector<1x128xf32>
    %20 = arith.maximumf %18, %19 : vector<1x128xf32>
    %c0_16 = arith.constant 0 : index
    %c0_17 = arith.constant 0 : index
    %21 = vector.load %arg7[%c0_16, %c0_17] : memref<128x128xf32, #tpu.memory_space<vmem>>, vector<128x128xf32>
    %cst_18 = arith.constant dense<0.000000e+00> : vector<1x128xf32>
    %22 = tpu.matmul %20, %21, %cst_18 {dimension_numbers = #tpu.dot_dimension_numbers<[1], [0], [0], [1], [0, 0, 1, 1], [], []>} : vector<1x128xf32>, vector<128x128xf32>, vector<1x128xf32> -> vector<1x128xf32>
    %c0_19 = arith.constant 0 : index
    %c0_20 = arith.constant 0 : index
    %23 = vector.load %arg8[%c0_19, %c0_20] : memref<1x128xf32, #tpu.memory_space<vmem>>, vector<1x128xf32>
    %24 = arith.addf %22, %23 : vector<1x128xf32>
    %c0_21 = arith.constant 0 : index
    %c0_22 = arith.constant 0 : index
    %c0_23 = arith.constant 0 : index
    %25 = vector.load %arg9[%c0_21, %c0_22, %c0_23] : memref<1x1x128xf32, #tpu.memory_space<vmem>>, vector<1x1x128xf32>
    %26 = vector.shape_cast %25 : vector<1x1x128xf32> to vector<1x128xf32>
    %27 = vector.shape_cast %6 : vector<1x128xf32> to vector<1x1x128xf32>
    tpu.vector_store %arg9[%c0_21, %c0_22, %c0_23], %27 {strides = array<i32>} : memref<1x1x128xf32, #tpu.memory_space<vmem>>, vector<1x1x128xf32>,
    %c0_24 = arith.constant 0 : index
    %c0_25 = arith.constant 0 : index
    %c0_26 = arith.constant 0 : index
    %28 = vector.load %arg10[%c0_24, %c0_25, %c0_26] : memref<1x1x128xf32, #tpu.memory_space<vmem>>, vector<1x1x128xf32>
    %29 = vector.shape_cast %28 : vector<1x1x128xf32> to vector<1x128xf32>
    %30 = vector.shape_cast %7 : vector<1x128xf32> to vector<1x1x128xf32>
    tpu.vector_store %arg10[%c0_24, %c0_25, %c0_26], %30 {strides = array<i32>} : memref<1x1x128xf32, #tpu.memory_space<vmem>>, vector<1x1x128xf32>,
    %c0_27 = arith.constant 0 : index
    %c0_28 = arith.constant 0 : index
    %c0_29 = arith.constant 0 : index
    %31 = vector.load %arg11[%c0_27, %c0_28, %c0_29] : memref<1x1x128xf32, #tpu.memory_space<vmem>>, vector<1x1x128xf32>
    %32 = vector.shape_cast %31 : vector<1x1x128xf32> to vector<1x128xf32>
    %33 = vector.shape_cast %24 : vector<1x128xf32> to vector<1x1x128xf32>
    tpu.vector_store %arg11[%c0_27, %c0_28, %c0_29], %33 {strides = array<i32>} : memref<1x1x128xf32, #tpu.memory_space<vmem>>, vector<1x1x128xf32>,
    return
  }
  func.func @transform_0(%arg0: i32) -> (i32, i32, i32) {
    %c0_i32 = arith.constant 0 : i32
    %c0_i32_0 = arith.constant 0 : i32
    %c0_i32_1 = arith.constant 0 : i32
    return %arg0, %c0_i32, %c0_i32_0 : i32, i32, i32
  }
  func.func @transform_1(%arg0: i32) -> (i32, i32, i32) {
    %c0_i32 = arith.constant 0 : i32
    %c0_i32_0 = arith.constant 0 : i32
    %c0_i32_1 = arith.constant 0 : i32
    return %arg0, %c0_i32, %c0_i32_0 : i32, i32, i32
  }
  func.func @transform_2(%arg0: i32) -> (i32, i32) {
    %c0_i32 = arith.constant 0 : i32
    %c0_i32_0 = arith.constant 0 : i32
    %c0_i32_1 = arith.constant 0 : i32
    return %c0_i32, %c0_i32_0 : i32, i32
  }
  func.func @transform_3(%arg0: i32) -> (i32, i32) {
    %c0_i32 = arith.constant 0 : i32
    %c0_i32_0 = arith.constant 0 : i32
    %c0_i32_1 = arith.constant 0 : i32
    return %c0_i32, %c0_i32_0 : i32, i32
  }
  func.func @transform_4(%arg0: i32) -> (i32, i32) {
    %c0_i32 = arith.constant 0 : i32
    %c0_i32_0 = arith.constant 0 : i32
    %c0_i32_1 = arith.constant 0 : i32
    return %c0_i32, %c0_i32_0 : i32, i32
  }
  func.func @transform_5(%arg0: i32) -> (i32, i32) {
    %c0_i32 = arith.constant 0 : i32
    %c0_i32_0 = arith.constant 0 : i32
    %c0_i32_1 = arith.constant 0 : i32
    return %c0_i32, %c0_i32_0 : i32, i32
  }
  func.func @transform_6(%arg0: i32) -> (i32, i32) {
    %c0_i32 = arith.constant 0 : i32
    %c0_i32_0 = arith.constant 0 : i32
    %c0_i32_1 = arith.constant 0 : i32
    return %c0_i32, %c0_i32_0 : i32, i32
  }
  func.func @transform_7(%arg0: i32) -> (i32, i32) {
    %c0_i32 = arith.constant 0 : i32
    %c0_i32_0 = arith.constant 0 : i32
    %c0_i32_1 = arith.constant 0 : i32
    return %c0_i32, %c0_i32_0 : i32, i32
  }
  func.func @transform_8(%arg0: i32) -> (i32, i32, i32) {
    %c0_i32 = arith.constant 0 : i32
    %c0_i32_0 = arith.constant 0 : i32
    %c0_i32_1 = arith.constant 0 : i32
    return %arg0, %c0_i32, %c0_i32_0 : i32, i32, i32
  }
  func.func @transform_9(%arg0: i32) -> (i32, i32, i32) {
    %c0_i32 = arith.constant 0 : i32
    %c0_i32_0 = arith.constant 0 : i32
    %c0_i32_1 = arith.constant 0 : i32
    return %arg0, %c0_i32, %c0_i32_0 : i32, i32, i32
  }
  func.func @transform_10(%arg0: i32) -> (i32, i32, i32) {
    %c0_i32 = arith.constant 0 : i32
    %c0_i32_0 = arith.constant 0 : i32
    %c0_i32_1 = arith.constant 0 : i32
    return %arg0, %c0_i32, %c0_i32_0 : i32, i32, i32
  }
}

</mosaic_0001>

<bundles_post_ra>
// kernel: enclassifier_forward.3
= control target key start
LH: loop header
LB: loop body
LE: loop exit
PB: predicated region body
PF: predicated region fallthrough
CT: control target
= control target key end

     0   :  { %8 = vsyncpa [#allocation3], 0  ;;  %s881_s0 = inlined_call_operand.vmem [shape: f32[2,196,16], index: 0, kind: input, shape index: {}]   ;;  %s882_s1 = inlined_call_operand.hbm [shape: f32[16,32], index: 1, kind: input, shape index: {}]   ;;  %s883_s2 = inlined_call_operand.hbm [shape: f32[1,32], index: 2, kind: input, shape index: {}]   ;;  %s884_s3 = inlined_call_operand.vmem [shape: f32[2,196,32], index: 3, kind: output, shape index: {}]  }
   0x1   :  { %9 = vsyncpa [#allocation5], 0  ;;  %s708_s12 = smov 0  }
   0x2 LB: > { %s125_s15 = sshll.u32 %s882_s1, 4  ;;  %s531_s16 = sadd.s32 4294967295, %s682_s12   ;;  %s682_s12 = sphi %s708_s12, %s15_s12   ;;  %s126_s15 = int_to_ptr.hbm [resolvable:$true] %s125_s15 }
   0x3   : > { %p533_p0 = scmp.ge.s32.totalorder %s682_s12, 1  ;;  %p114_p1 = scmp.lt.s32.totalorder %s682_s12, 3 }
   0x4   : > { %p591_p2 = scmp.eq.s32.totalorder %s531_s16, 0  ;;  %s684_s18 = smov [#allocation2]  }
   0x5   : > { %p719_p3 = pnand %p533_p0, %p114_p1  ;;  %s127_s19 = sshll.u32 %s684_s18, 4  ;;  %s128_s19 = int_to_ptr.vmem [resolvable:$true] %s127_s19 }
   0x6   : > { %s140_s22 = sshll.u32 %s883_s2, 4  ;;  %s685_s23 = smov [#allocation4]   ;;  %s141_s22 = int_to_ptr.hbm [resolvable:$true] %s140_s22 }
   0x7   : > { %p584_p4 = pneg %p719_p3  ;;  %s142_s24 = sshll.u32 %s685_s23, 4  ;;  %s143_s24 = int_to_ptr.vmem [resolvable:$true] %s142_s24 }
   0x8   : > { %s686_s25 = smov 128   ;;  %s687_s26 = smov 8  }
   0x9   : > { %p585_p5 = pnand %p591_p2, %p584_p4  ;;  %163 = sbr.rel (%p719_p3) target bundleno = 209 (0xd1), region = 32 }
   0xb   : > { %587 = dma.hbm_to_vmem [thread:$0]  (!%p585_p5), %s126_s15, 256, %s128_s19, [#allocation3], %s686_s25, %s686_s25, %s687_s26  }
   0xc   : > { %590 = dma.hbm_to_vmem [thread:$0]  (!%p585_p5), %s141_s22, 16, %s143_s24, [#allocation5]  }
   0xe   : > { %673 = dma.done.wait (%p591_p2), [#allocation3], 256  }
   0xf   : > { %675 = vsyncadd (%p591_p2), [#allocation3], 4294967040 }
  0x10   : > { %677 = dma.done.wait (%p591_p2), [#allocation5], 16  }
  0x11   : > { %679 = vsyncadd (%p591_p2), [#allocation5], 4294967280  ;;  %p193_p6 = scmp.lt.s32.totalorder %s531_s16, 1  ;;  %v229_v0 = vld [vmem:[#allocation2 + $0x8] sm:$0xff]  ;;  %v228_v1 = vld [vmem:[#allocation2] sm:$0xff]  ;;  %vm234_vm0 = vcmask 130048  }
  0x12   : > { %570 = vmatpush.msra.mxu2 %v229_v0  ;;  %569 = vmatpush.msra.mxu1 %v229_v0  ;;  %v795_v27 = vld [vmem:[#allocation4] ss:$0 sm:$0xff]  ;;  %vm427_vm1 = vcmask 261120   ;;  %vm452_vm2 = vcmask 257024  }
  0x13   : > { %s887_s16 = smov (!%p193_p6, %s531_s16), 1  ;;  %324 = vmatpush.msra.mxu0 %v229_v0  ;;  %571 = vmatpush.msra.mxu3 %v229_v0 }
  0x14   : > { %s575_s27 = smul.u32 200, %s887_s16  ;;  %573 = vmatpush.msra.mxu2 %v228_v1  ;;  %572 = vmatpush.msra.mxu1 %v228_v1 }
  0x15   : > { %325 = vmatpush.msra.mxu0 %v228_v1  ;;  %574 = vmatpush.msra.mxu3 %v228_v1 }
  0x16   : > { %s743_s30 = scalar_lea.vmem %s881_s0, %s575_s27  ;;  %s803_s6 = scalar_lea.vmem %s884_s3, %s575_s27 }
  0x17   : > { %v216_v2 = vld [vmem:[%s743_s30 + $0x68] sm:$0xff]  ;;  %v209_v3 = vld [vmem:[%s743_s30 + $0x30] sm:$0xff]  ;;  %v203_v4 = vld [vmem:[%s743_s30] sm:$0xff] }
  0x18   : > { %v223_v5 = vld [vmem:[%s743_s30 + $0xa0] sm:$0xff]  ;;  %555 = vmatmul.msk.f32.vlgmr.msra.gmra.mxu2 %vm234_vm0, %v216_v2  ;;  %548 = vmatmul.msk.f32.vlgmr.msra.gmra.mxu1 %vm234_vm0, %v209_v3  ;;  %v217_v6 = vld [vmem:[%s743_s30 + $0x70] sm:$0xff]  ;;  %v210_v7 = vld [vmem:[%s743_s30 + $0x38] sm:$0xff] }
  0x19   : > { %542 = vmatmul.msk.f32.vlgmr.msra.gmra.mxu0 %vm234_vm0, %v203_v4  ;;  %562 = vmatmul.msk.f32.vlgmr.msra.gmra.mxu3 %vm234_vm0, %v223_v5  ;;  %v204_v8 = vld [vmem:[%s743_s30 + $0x8] sm:$0xff]  ;;  %v218_v10 = vld [vmem:[%s743_s30 + $0x78] sm:$0xff]  ;;  %v211_v11 = vld [vmem:[%s743_s30 + $0x40] sm:$0xff] }
  0x1a   : > { %v224_v9 = vld [vmem:[%s743_s30 + $0xa8] sm:$0xff]  ;;  %v205_v12 = vld [vmem:[%s743_s30 + $0x10] sm:$0xff]  ;;  %v219_v14 = vld [vmem:[%s743_s30 + $0x80] sm:$0xff] }
  0x1b   : > { %v225_v13 = vld [vmem:[%s743_s30 + $0xb0] sm:$0xff]  ;;  %v212_v15 = vld [vmem:[%s743_s30 + $0x48] sm:$0xff]  ;;  %v206_v16 = vld [vmem:[%s743_s30 + $0x18] sm:$0xff] }
  0x1c   : > { %v226_v17 = vld [vmem:[%s743_s30 + $0xb8] sm:$0xff]  ;;  %v220_v18 = vld [vmem:[%s743_s30 + $0x88] sm:$0xff]  ;;  %v213_v19 = vld [vmem:[%s743_s30 + $0x50] sm:$0xff] }
  0x1d   : > { %v207_v20 = vld [vmem:[%s743_s30 + $0x20] sm:$0xff]  ;;  %v221_v22 = vld [vmem:[%s743_s30 + $0x90] sm:$0xff]  ;;  %v214_v23 = vld [vmem:[%s743_s30 + $0x58] sm:$0xff] }
  0x1e   : > { %v227_v21 = vld [vmem:[%s743_s30 + $0xc0] sm:$0xf]  ;;  %v208_v24 = vld [vmem:[%s743_s30 + $0x28] sm:$0xff]  ;;  %v222_v25 = vld [vmem:[%s743_s30 + $0x98] sm:$0xff] }
  0x1f   : > { %v215_v26 = vld [vmem:[%s743_s30 + $0x60] sm:$0xff] }
  0x20   : > { %556 = vmatmul.msk.f32.gmra.mxu2 %vm234_vm0, %v217_v6  ;;  %549 = vmatmul.msk.f32.gmra.mxu1 %vm234_vm0, %v210_v7 }
  0x21   : > { %543 = vmatmul.msk.f32.gmra.mxu0 %vm234_vm0, %v204_v8  ;;  %563 = vmatmul.msk.f32.gmra.mxu3 %vm234_vm0, %v224_v9 }
  0x28   : > { %557 = vmatmul.msk.f32.gmra.mxu2 %vm234_vm0, %v218_v10  ;;  %550 = vmatmul.msk.f32.gmra.mxu1 %vm234_vm0, %v211_v11 }
  0x29   : > { %544 = vmatmul.msk.f32.gmra.mxu0 %vm234_vm0, %v205_v12  ;;  %564 = vmatmul.msk.f32.gmra.mxu3 %vm234_vm0, %v225_v13 }
  0x30   : > { %558 = vmatmul.msk.f32.gmra.mxu2 %vm234_vm0, %v219_v14  ;;  %551 = vmatmul.msk.f32.gmra.mxu1 %vm234_vm0, %v212_v15 }
  0x31   : > { %545 = vmatmul.msk.f32.gmra.mxu0 %vm234_vm0, %v206_v16  ;;  %565 = vmatmul.msk.f32.gmra.mxu3 %vm234_vm0, %v226_v17 }
  0x38   : > { %559 = vmatmul.msk.f32.gmra.mxu2 %vm234_vm0, %v220_v18  ;;  %552 = vmatmul.msk.f32.gmra.mxu1 %vm234_vm0, %v213_v19 }
  0x39   : > { %546 = vmatmul.msk.f32.gmra.mxu0 %vm234_vm0, %v207_v20  ;;  %566 = vmatmul.msk.f32.gmra.mxu3 %vm234_vm0, %v227_v21 }
  0x40   : > { %560 = vmatmul.msk.f32.gmra.mxu2 %vm234_vm0, %v221_v22  ;;  %553 = vmatmul.msk.f32.gmra.mxu1 %vm234_vm0, %v214_v23 }
  0x41   : > { %547 = vmatmul.msk.f32.gmra.mxu0 %vm234_vm0, %v208_v24 }
  0x48   : > { %561 = vmatmul.msk.f32.gmra.mxu2 %vm234_vm0, %v222_v25  ;;  %554 = vmatmul.msk.f32.gmra.mxu1 %vm234_vm0, %v215_v26 }
  0x95   : > { %v345_v28 = vpop.f32.mrf.mxu1 }
  0x96   : > { %v346_v29 = vadd.f32 %v795_v27, %v345_v28  ;;  %v327_v30 = vpop.f32.mrf.mxu0 }
  0x97   : > { %v328_v32 = vadd.f32 %v795_v27, %v327_v30 }
  0x98   : > { %v408_v31 = vmax.f32 %v346_v29, 0.0 }
  0x99   : > { %v402_v33 = vmax.f32 %v328_v32, 0.0 }
  0x9a   : > { %434 = vst.msk [vmem:[%s803_s6 + $0x30] sm:$0xff] %vm427_vm1, %v408_v31 }
  0x9b   : > { %v366_v34 = vpop.f32.mrf.mxu2  ;;  %428 = vst.msk [vmem:[%s803_s6] sm:$0xff] %vm427_vm1, %v402_v33 }
  0x9c   : > { %v367_v35 = vadd.f32 %v795_v27, %v366_v34  ;;  %v387_v37 = vpop.f32.mrf.mxu3 }
  0x9d   : > { %v348_v36 = vpop.f32.mrf.mxu1  ;;  %v388_v40 = vadd.f32 %v795_v27, %v387_v37 }
  0x9e   : > { %v415_v38 = vmax.f32 %v367_v35, 0.0  ;;  %v349_v39 = vadd.f32 %v795_v27, %v348_v36  ;;  %v330_v41 = vpop.f32.mrf.mxu0 }
  0x9f   : > { %v331_v43 = vadd.f32 %v795_v27, %v330_v41  ;;  %v422_v44 = vmax.f32 %v388_v40, 0.0 }
  0xa0   : > { %441 = vst.msk [vmem:[%s803_s6 + $0x68] sm:$0xff] %vm427_vm1, %v415_v38  ;;  %v409_v42 = vmax.f32 %v349_v39, 0.0 }
  0xa1   : > { %v403_v45 = vmax.f32 %v331_v43, 0.0  ;;  %448 = vst.msk [vmem:[%s803_s6 + $0xa0] sm:$0xff] %vm427_vm1, %v422_v44 }
  0xa2   : > { %435 = vst.msk [vmem:[%s803_s6 + $0x38] sm:$0xff] %vm427_vm1, %v409_v42 }
  0xa3   : > { %v369_v46 = vpop.f32.mrf.mxu2  ;;  %429 = vst.msk [vmem:[%s803_s6 + $0x8] sm:$0xff] %vm427_vm1, %v403_v45 }
  0xa4   : > { %v370_v47 = vadd.f32 %v795_v27, %v369_v46  ;;  %v390_v49 = vpop.f32.mrf.mxu3 }
  0xa5   : > { %v351_v48 = vpop.f32.mrf.mxu1  ;;  %v391_v52 = vadd.f32 %v795_v27, %v390_v49 }
  0xa6   : > { %v416_v50 = vmax.f32 %v370_v47, 0.0  ;;  %v352_v51 = vadd.f32 %v795_v27, %v351_v48  ;;  %v333_v53 = vpop.f32.mrf.mxu0 }
  0xa7   : > { %v334_v55 = vadd.f32 %v795_v27, %v333_v53  ;;  %v423_v56 = vmax.f32 %v391_v52, 0.0 }
  0xa8   : > { %442 = vst.msk [vmem:[%s803_s6 + $0x70] sm:$0xff] %vm427_vm1, %v416_v50  ;;  %v410_v54 = vmax.f32 %v352_v51, 0.0 }
  0xa9   : > { %v404_v57 = vmax.f32 %v334_v55, 0.0  ;;  %449 = vst.msk [vmem:[%s803_s6 + $0xa8] sm:$0xff] %vm427_vm1, %v423_v56 }
  0xaa   : > { %436 = vst.msk [vmem:[%s803_s6 + $0x40] sm:$0xff] %vm427_vm1, %v410_v54 }
  0xab   : > { %v372_v58 = vpop.f32.mrf.mxu2  ;;  %430 = vst.msk [vmem:[%s803_s6 + $0x10] sm:$0xff] %vm427_vm1, %v404_v57 }
  0xac   : > { %v373_v59 = vadd.f32 %v795_v27, %v372_v58  ;;  %v393_v61 = vpop.f32.mrf.mxu3 }
  0xad   : > { %v354_v60 = vpop.f32.mrf.mxu1  ;;  %v394_v0 = vadd.f32 %v795_v27, %v393_v61 }
  0xae   : > { %v417_v62 = vmax.f32 %v373_v59, 0.0  ;;  %v355_v63 = vadd.f32 %v795_v27, %v354_v60  ;;  %v336_v1 = vpop.f32.mrf.mxu0 }
  0xaf   : > { %v337_v3 = vadd.f32 %v795_v27, %v336_v1  ;;  %v424_v4 = vmax.f32 %v394_v0, 0.0 }
  0xb0   : > { %443 = vst.msk [vmem:[%s803_s6 + $0x78] sm:$0xff] %vm427_vm1, %v417_v62  ;;  %v411_v2 = vmax.f32 %v355_v63, 0.0 }
  0xb1   : > { %v405_v5 = vmax.f32 %v337_v3, 0.0  ;;  %450 = vst.msk [vmem:[%s803_s6 + $0xb0] sm:$0xff] %vm427_vm1, %v424_v4 }
  0xb2   : > { %437 = vst.msk [vmem:[%s803_s6 + $0x48] sm:$0xff] %vm427_vm1, %v411_v2 }
  0xb3   : > { %v375_v6 = vpop.f32.mrf.mxu2  ;;  %431 = vst.msk [vmem:[%s803_s6 + $0x18] sm:$0xff] %vm427_vm1, %v405_v5 }
  0xb4   : > { %v376_v7 = vadd.f32 %v795_v27, %v375_v6  ;;  %v396_v9 = vpop.f32.mrf.mxu3 }
  0xb5   : > { %v357_v8 = vpop.f32.mrf.mxu1  ;;  %v397_v12 = vadd.f32 %v795_v27, %v396_v9 }
  0xb6   : > { %v418_v10 = vmax.f32 %v376_v7, 0.0  ;;  %v358_v11 = vadd.f32 %v795_v27, %v357_v8  ;;  %v339_v13 = vpop.f32.mrf.mxu0 }
  0xb7   : > { %v340_v15 = vadd.f32 %v795_v27, %v339_v13  ;;  %v425_v16 = vmax.f32 %v397_v12, 0.0 }
  0xb8   : > { %444 = vst.msk [vmem:[%s803_s6 + $0x80] sm:$0xff] %vm427_vm1, %v418_v10  ;;  %v412_v14 = vmax.f32 %v358_v11, 0.0 }
  0xb9   : > { %v406_v17 = vmax.f32 %v340_v15, 0.0  ;;  %451 = vst.msk [vmem:[%s803_s6 + $0xb8] sm:$0xff] %vm427_vm1, %v425_v16 }
  0xba   : > { %438 = vst.msk [vmem:[%s803_s6 + $0x50] sm:$0xff] %vm427_vm1, %v412_v14 }
  0xbb   : > { %v378_v18 = vpop.f32.mrf.mxu2  ;;  %432 = vst.msk [vmem:[%s803_s6 + $0x20] sm:$0xff] %vm427_vm1, %v406_v17 }
  0xbc   : > { %v379_v19 = vadd.f32 %v795_v27, %v378_v18  ;;  %v399_v21 = vpop.f32.mrf.mxu3 }
  0xbd   : > { %v360_v20 = vpop.f32.mrf.mxu1  ;;  %v400_v24 = vadd.f32 %v795_v27, %v399_v21 }
  0xbe   : > { %v419_v22 = vmax.f32 %v379_v19, 0.0  ;;  %v361_v23 = vadd.f32 %v795_v27, %v360_v20  ;;  %v342_v25 = vpop.f32.mrf.mxu0 }
  0xbf   : > { %v343_v28 = vadd.f32 %v795_v27, %v342_v25  ;;  %v426_v29 = vmax.f32 %v400_v24, 0.0 }
  0xc0   : > { %445 = vst.msk [vmem:[%s803_s6 + $0x88] sm:$0xff] %vm427_vm1, %v419_v22  ;;  %v413_v26 = vmax.f32 %v361_v23, 0.0 }
  0xc1   : > { %v407_v30 = vmax.f32 %v343_v28, 0.0  ;;  %453 = vst.msk [vmem:[%s803_s6 + $0xc0] sm:$0xf] %vm452_vm2, %v426_v29 }
  0xc2   : > { %439 = vst.msk [vmem:[%s803_s6 + $0x58] sm:$0xff] %vm427_vm1, %v413_v26 }
  0xc3   : > { %v381_v31 = vpop.f32.mrf.mxu2  ;;  %433 = vst.msk [vmem:[%s803_s6 + $0x28] sm:$0xff] %vm427_vm1, %v407_v30 }
  0xc4   : > { %v382_v32 = vadd.f32 %v795_v27, %v381_v31 }
  0xc5   : > { %v363_v33 = vpop.f32.mrf.mxu1 }
  0xc6   : > { %v420_v34 = vmax.f32 %v382_v32, 0.0  ;;  %v364_v35 = vadd.f32 %v795_v27, %v363_v33 }
  0xc8   : > { %446 = vst.msk [vmem:[%s803_s6 + $0x90] sm:$0xff] %vm427_vm1, %v420_v34  ;;  %v414_v36 = vmax.f32 %v364_v35, 0.0 }
  0xca   : > { %440 = vst.msk [vmem:[%s803_s6 + $0x60] sm:$0xff] %vm427_vm1, %v414_v36 }
  0xcb   : > { %v384_v37 = vpop.f32.mrf.mxu2 }
  0xcc   : > { %v385_v38 = vadd.f32 %v795_v27, %v384_v37 }
  0xce   : > { %v421_v39 = vmax.f32 %v385_v38, 0.0 }
  0xd0   : > { %447 = vst.msk [vmem:[%s803_s6 + $0x98] sm:$0xff] %vm427_vm1, %v421_v39 }
  0xd1 PF: > { %s15_s12 = sadd.s32 1, %s682_s12  }
  0xd2   : > { %p12_p7 = scmp.ge.s32.totalorder %s15_s12, 4  }
  0xd4   :  { %14 = sbr.rel (!%p12_p7) target bundleno = 2 (0x2), region = 71 }
  0xd9   :  { %475 = vsyncpa [#allocation3], 1 }
  0xda   :  { %477 = vsyncpa [#allocation3 + $0x1], 1 }
  0xdb   :  { %478 = vsyncpa [#allocation5], 1 }

// kernel: enclassifier_forward.4
= control target key start
LH: loop header
LB: loop body
LE: loop exit
PB: predicated region body
PF: predicated region fallthrough
CT: control target
= control target key end

     0   :  { %s538_s12 = smov 0   ;;  %s818_s0 = inlined_call_operand.vmem [shape: f32[2,49,512], index: 0, kind: input, shape index: {}]   ;;  %s819_s1 = inlined_call_operand.vmem [shape: f32[512,64], index: 1, kind: input, shape index: {}]   ;;  %s820_s2 = inlined_call_operand.vmem [shape: f32[1,64], index: 2, kind: input, shape index: {}]   ;;  %s821_s3 = inlined_call_operand.vmem [shape: f32[2,49,64], index: 3, kind: output, shape index: {}]  }
   0x1 LB: > { %s490_s13 = sadd.s32 4294967295, %s516_s12   ;;  %p494_p0 = scmp.ge.s32.totalorder %s516_s12, 1  ;;  %s516_s12 = sphi %s538_s12, %s13_s12  }
   0x2   : > { %p137_p1 = scmp.lt.s32.totalorder %s516_s12, 3 }
   0x4   : > { %p138_p2 = pnand %p494_p0, %p137_p1 }
   0x5   : > { %p650_p3 = scmp.lt.s32.totalorder (!%p138_p2), %s490_s13, 1 }
   0x6   : > { %141 = sbr.rel (%p138_p2) target bundleno = 231 (0xe7), region = 32 }
   0xb   : > { %v246_v0 = vld [vmem:[%s819_s1 + $0x178] sm:$0xff]  ;;  %v245_v2 = vld [vmem:[%s819_s1 + $0x170] sm:$0xff]  ;;  %v244_v6 = vld [vmem:[%s819_s1 + $0x168] sm:$0xff]  ;;  %s824_s13 = smov (!%p650_p3, %s490_s13), 1  ;;  %vm426_vm0 = vcmask 523264   ;;  %vm433_vm1 = vcmask 516096  }
   0xc   : > { %v214_v1 = vld [vmem:[%s819_s1 + $0x78] sm:$0xff]  ;;  %343 = vmatpush.msra.mxu2 %v246_v0  ;;  %v213_v4 = vld [vmem:[%s819_s1 + $0x70] sm:$0xff]  ;;  %v212_v8 = vld [vmem:[%s819_s1 + $0x68] sm:$0xff]  ;;  %s499_s15 = smul.u32 224, %s824_s13 }
   0xd   : > { %267 = vmatpush.msra.mxu0 %v214_v1  ;;  %v262_v3 = vld [vmem:[%s819_s1 + $0x1f8] sm:$0xff]  ;;  %v261_v7 = vld [vmem:[%s819_s1 + $0x1f0] sm:$0xff]  ;;  %v260_v10 = vld [vmem:[%s819_s1 + $0x1e8] sm:$0xff]  ;;  %s500_s24 = smul.u32 56, %s824_s13 }
   0xe   : > { %v230_v5 = vld [vmem:[%s819_s1 + $0xf8] sm:$0xff]  ;;  %381 = vmatpush.msra.mxu3 %v262_v3  ;;  %344 = vmatpush.msra.mxu2 %v245_v2  ;;  %v229_v9 = vld [vmem:[%s819_s1 + $0xf0] sm:$0xff]  ;;  %v243_v11 = vld [vmem:[%s819_s1 + $0x160] sm:$0xff]  ;;  %s736_s7 = scalar_lea.vmem %s818_s0, %s499_s15 }
   0xf   : > { %305 = vmatpush.msra.mxu1 %v230_v5  ;;  %268 = vmatpush.msra.mxu0 %v213_v4  ;;  %v211_v12 = vld [vmem:[%s819_s1 + $0x60] sm:$0xff]  ;;  %v228_v13 = vld [vmem:[%s819_s1 + $0xe8] sm:$0xff]  ;;  %v242_v16 = vld [vmem:[%s819_s1 + $0x158] sm:$0xff]  ;;  %s794_s27 = scalar_lea.vmem %s821_s3, %s500_s24 }
  0x10   : > { %382 = vmatpush.msra.mxu3 %v261_v7  ;;  %345 = vmatpush.msra.mxu2 %v244_v6  ;;  %v259_v14 = vld [vmem:[%s819_s1 + $0x1e0] sm:$0xff]  ;;  %v210_v17 = vld [vmem:[%s819_s1 + $0x58] sm:$0xff]  ;;  %v241_v20 = vld [vmem:[%s819_s1 + $0x150] sm:$0xff] }
  0x11   : > { %306 = vmatpush.msra.mxu1 %v229_v9  ;;  %269 = vmatpush.msra.mxu0 %v212_v8  ;;  %v227_v15 = vld [vmem:[%s819_s1 + $0xe0] sm:$0xff]  ;;  %v258_v18 = vld [vmem:[%s819_s1 + $0x1d8] sm:$0xff]  ;;  %v209_v21 = vld [vmem:[%s819_s1 + $0x50] sm:$0xff] }
  0x12   : > { %383 = vmatpush.msra.mxu3 %v260_v10  ;;  %346 = vmatpush.msra.mxu2 %v243_v11  ;;  %v226_v19 = vld [vmem:[%s819_s1 + $0xd8] sm:$0xff]  ;;  %v257_v22 = vld [vmem:[%s819_s1 + $0x1d0] sm:$0xff]  ;;  %v240_v24 = vld [vmem:[%s819_s1 + $0x148] sm:$0xff] }
  0x13   : > { %307 = vmatpush.msra.mxu1 %v228_v13  ;;  %270 = vmatpush.msra.mxu0 %v211_v12  ;;  %v225_v23 = vld [vmem:[%s819_s1 + $0xd0] sm:$0xff]  ;;  %v208_v25 = vld [vmem:[%s819_s1 + $0x48] sm:$0xff]  ;;  %v239_v28 = vld [vmem:[%s819_s1 + $0x140] sm:$0xff] }
  0x14   : > { %384 = vmatpush.msra.mxu3 %v259_v14  ;;  %347 = vmatpush.msra.mxu2 %v242_v16  ;;  %v256_v26 = vld [vmem:[%s819_s1 + $0x1c8] sm:$0xff]  ;;  %v207_v29 = vld [vmem:[%s819_s1 + $0x40] sm:$0xff]  ;;  %v238_v32 = vld [vmem:[%s819_s1 + $0x138] sm:$0xff] }
  0x15   : > { %308 = vmatpush.msra.mxu1 %v227_v15  ;;  %271 = vmatpush.msra.mxu0 %v210_v17  ;;  %v224_v27 = vld [vmem:[%s819_s1 + $0xc8] sm:$0xff]  ;;  %v255_v30 = vld [vmem:[%s819_s1 + $0x1c0] sm:$0xff]  ;;  %v206_v33 = vld [vmem:[%s819_s1 + $0x38] sm:$0xff] }
  0x16   : > { %385 = vmatpush.msra.mxu3 %v258_v18  ;;  %348 = vmatpush.msra.mxu2 %v241_v20  ;;  %v223_v31 = vld [vmem:[%s819_s1 + $0xc0] sm:$0xff]  ;;  %v254_v34 = vld [vmem:[%s819_s1 + $0x1b8] sm:$0xff]  ;;  %v237_v36 = vld [vmem:[%s819_s1 + $0x130] sm:$0xff] }
  0x17   : > { %309 = vmatpush.msra.mxu1 %v226_v19  ;;  %272 = vmatpush.msra.mxu0 %v209_v21  ;;  %v222_v35 = vld [vmem:[%s819_s1 + $0xb8] sm:$0xff]  ;;  %v205_v37 = vld [vmem:[%s819_s1 + $0x30] sm:$0xff]  ;;  %v236_v40 = vld [vmem:[%s819_s1 + $0x128] sm:$0xff] }
  0x18   : > { %386 = vmatpush.msra.mxu3 %v257_v22  ;;  %349 = vmatpush.msra.mxu2 %v240_v24  ;;  %v253_v38 = vld [vmem:[%s819_s1 + $0x1b0] sm:$0xff]  ;;  %v204_v41 = vld [vmem:[%s819_s1 + $0x28] sm:$0xff]  ;;  %v235_v44 = vld [vmem:[%s819_s1 + $0x120] sm:$0xff] }
  0x19   : > { %310 = vmatpush.msra.mxu1 %v225_v23  ;;  %273 = vmatpush.msra.mxu0 %v208_v25  ;;  %v221_v39 = vld [vmem:[%s819_s1 + $0xb0] sm:$0xff]  ;;  %v252_v42 = vld [vmem:[%s819_s1 + $0x1a8] sm:$0xff]  ;;  %v203_v45 = vld [vmem:[%s819_s1 + $0x20] sm:$0xff] }
  0x1a   : > { %387 = vmatpush.msra.mxu3 %v256_v26  ;;  %350 = vmatpush.msra.mxu2 %v239_v28  ;;  %v220_v43 = vld [vmem:[%s819_s1 + $0xa8] sm:$0xff]  ;;  %v251_v46 = vld [vmem:[%s819_s1 + $0x1a0] sm:$0xff]  ;;  %v234_v48 = vld [vmem:[%s819_s1 + $0x118] sm:$0xff] }
  0x1b   : > { %311 = vmatpush.msra.mxu1 %v224_v27  ;;  %274 = vmatpush.msra.mxu0 %v207_v29  ;;  %v219_v47 = vld [vmem:[%s819_s1 + $0xa0] sm:$0xff]  ;;  %v202_v49 = vld [vmem:[%s819_s1 + $0x18] sm:$0xff]  ;;  %v233_v52 = vld [vmem:[%s819_s1 + $0x110] sm:$0xff] }
  0x1c   : > { %388 = vmatpush.msra.mxu3 %v255_v30  ;;  %351 = vmatpush.msra.mxu2 %v238_v32  ;;  %v250_v50 = vld [vmem:[%s819_s1 + $0x198] sm:$0xff]  ;;  %v201_v53 = vld [vmem:[%s819_s1 + $0x10] sm:$0xff]  ;;  %v232_v56 = vld [vmem:[%s819_s1 + $0x108] sm:$0xff] }
  0x1d   : > { %312 = vmatpush.msra.mxu1 %v223_v31  ;;  %275 = vmatpush.msra.mxu0 %v206_v33  ;;  %v218_v51 = vld [vmem:[%s819_s1 + $0x98] sm:$0xff]  ;;  %v249_v54 = vld [vmem:[%s819_s1 + $0x190] sm:$0xff]  ;;  %v200_v57 = vld [vmem:[%s819_s1 + $0x8] sm:$0xff] }
  0x1e   : > { %389 = vmatpush.msra.mxu3 %v254_v34  ;;  %352 = vmatpush.msra.mxu2 %v237_v36  ;;  %v217_v55 = vld [vmem:[%s819_s1 + $0x90] sm:$0xff]  ;;  %v248_v58 = vld [vmem:[%s819_s1 + $0x188] sm:$0xff]  ;;  %v231_v60 = vld [vmem:[%s819_s1 + $0x100] sm:$0xff] }
  0x1f   : > { %313 = vmatpush.msra.mxu1 %v222_v35  ;;  %276 = vmatpush.msra.mxu0 %v205_v37  ;;  %v216_v59 = vld [vmem:[%s819_s1 + $0x88] sm:$0xff]  ;;  %v199_v61 = vld [vmem:[%s819_s1] sm:$0xff]  ;;  %v173_v62 = vld [vmem:[%s736_s7 + $0x10] sm:$0xff] }
  0x20   : > { %390 = vmatpush.msra.mxu3 %v253_v38  ;;  %353 = vmatpush.msra.mxu2 %v236_v40  ;;  %v247_v63 = vld [vmem:[%s819_s1 + $0x180] sm:$0xff]  ;;  %v174_v1 = vld [vmem:[%s736_s7 + $0x18] sm:$0xff]  ;;  %v172_v3 = vld [vmem:[%s736_s7 + $0x8] sm:$0xff] }
  0x21   : > { %314 = vmatpush.msra.mxu1 %v221_v39  ;;  %277 = vmatpush.msra.mxu0 %v204_v41  ;;  %v171_v0 = vld [vmem:[%s736_s7] sm:$0xff]  ;;  %v177_v4 = vld [vmem:[%s736_s7 + $0x30] sm:$0xff]  ;;  %v178_v6 = vld [vmem:[%s736_s7 + $0x38] sm:$0xff] }
  0x22   : > { %391 = vmatpush.msra.mxu3 %v252_v42  ;;  %354 = vmatpush.msra.mxu2 %v235_v44  ;;  %v215_v2 = vld [vmem:[%s819_s1 + $0x80] sm:$0xff]  ;;  %v176_v7 = vld [vmem:[%s736_s7 + $0x28] sm:$0xff]  ;;  %v181_v8 = vld [vmem:[%s736_s7 + $0x50] sm:$0xff] }
  0x23   : > { %315 = vmatpush.msra.mxu1 %v220_v43  ;;  %278 = vmatpush.msra.mxu0 %v203_v45  ;;  %v175_v5 = vld [vmem:[%s736_s7 + $0x20] sm:$0xff]  ;;  %v182_v10 = vld [vmem:[%s736_s7 + $0x58] sm:$0xff]  ;;  %v180_v11 = vld [vmem:[%s736_s7 + $0x48] sm:$0xff] }
  0x24   : > { %392 = vmatpush.msra.mxu3 %v251_v46  ;;  %355 = vmatpush.msra.mxu2 %v234_v48  ;;  %v179_v9 = vld [vmem:[%s736_s7 + $0x40] sm:$0xff]  ;;  %v185_v12 = vld [vmem:[%s736_s7 + $0x70] sm:$0xff]  ;;  %v186_v14 = vld [vmem:[%s736_s7 + $0x78] sm:$0xff] }
  0x25   : > { %316 = vmatpush.msra.mxu1 %v219_v47  ;;  %279 = vmatpush.msra.mxu0 %v202_v49  ;;  %v183_v13 = vld [vmem:[%s736_s7 + $0x60] sm:$0xff]  ;;  %v184_v15 = vld [vmem:[%s736_s7 + $0x68] sm:$0xff]  ;;  %v189_v16 = vld [vmem:[%s736_s7 + $0x90] sm:$0xff] }
  0x26   : > { %393 = vmatpush.msra.mxu3 %v250_v50  ;;  %356 = vmatpush.msra.mxu2 %v233_v52  ;;  %v187_v17 = vld [vmem:[%s736_s7 + $0x80] sm:$0xff]  ;;  %v190_v18 = vld [vmem:[%s736_s7 + $0x98] sm:$0xff]  ;;  %v188_v19 = vld [vmem:[%s736_s7 + $0x88] sm:$0xff] }
  0x27   : > { %317 = vmatpush.msra.mxu1 %v218_v51  ;;  %280 = vmatpush.msra.mxu0 %v201_v53  ;;  %v193_v20 = vld [vmem:[%s736_s7 + $0xb0] sm:$0xff]  ;;  %v191_v21 = vld [vmem:[%s736_s7 + $0xa0] sm:$0xff]  ;;  %v194_v22 = vld [vmem:[%s736_s7 + $0xb8] sm:$0xff] }
  0x28   : > { %394 = vmatpush.msra.mxu3 %v249_v54  ;;  %357 = vmatpush.msra.mxu2 %v232_v56  ;;  %v192_v23 = vld [vmem:[%s736_s7 + $0xa8] sm:$0xff]  ;;  %v197_v24 = vld [vmem:[%s736_s7 + $0xd0] sm:$0x1]  ;;  %v195_v25 = vld [vmem:[%s736_s7 + $0xc0] sm:$0x1] }
  0x29   : > { %318 = vmatpush.msra.mxu1 %v217_v55  ;;  %281 = vmatpush.msra.mxu0 %v200_v57  ;;  %v198_v26 = vld [vmem:[%s736_s7 + $0xd8] sm:$0x1]  ;;  %v196_v27 = vld [vmem:[%s736_s7 + $0xc8] sm:$0x1]  ;;  %v787_v28 = vld [vmem:[%s820_s2] ss:$0 sm:$0xff] }
  0x2a   : > { %395 = vmatpush.msra.mxu3 %v248_v58  ;;  %358 = vmatpush.msra.mxu2 %v231_v60 }
  0x2b   : > { %319 = vmatpush.msra.mxu1 %v216_v59  ;;  %282 = vmatpush.msra.mxu0 %v199_v61 }
  0x2c   : > { %359 = vmatmul.f32.vlgmr.msra.gmra.mxu2 %v173_v62  ;;  %396 = vmatpush.msra.mxu3 %v247_v63 }
  0x2d   : > { %283 = vmatmul.f32.vlgmr.msra.gmra.mxu0 %v171_v0  ;;  %397 = vmatmul.f32.vlgmr.msra.gmra.mxu3 %v174_v1 }
  0x2e   : > { %320 = vmatpush.msra.mxu1 %v215_v2 }
  0x2f   : > { %321 = vmatmul.f32.vlgmr.msra.gmra.mxu1 %v172_v3 }
  0x34   : > { %362 = vmatmul.f32.gmra.mxu2 %v177_v4 }
  0x35   : > { %286 = vmatmul.f32.gmra.mxu0 %v175_v5  ;;  %400 = vmatmul.f32.gmra.mxu3 %v178_v6 }
  0x37   : > { %324 = vmatmul.f32.gmra.mxu1 %v176_v7 }
  0x3c   : > { %365 = vmatmul.f32.gmra.mxu2 %v181_v8 }
  0x3d   : > { %289 = vmatmul.f32.gmra.mxu0 %v179_v9  ;;  %403 = vmatmul.f32.gmra.mxu3 %v182_v10 }
  0x3f   : > { %327 = vmatmul.f32.gmra.mxu1 %v180_v11 }
  0x44   : > { %368 = vmatmul.f32.gmra.mxu2 %v185_v12 }
  0x45   : > { %292 = vmatmul.f32.gmra.mxu0 %v183_v13  ;;  %406 = vmatmul.f32.gmra.mxu3 %v186_v14 }
  0x47   : > { %330 = vmatmul.f32.gmra.mxu1 %v184_v15 }
  0x4c   : > { %371 = vmatmul.f32.gmra.mxu2 %v189_v16 }
  0x4d   : > { %295 = vmatmul.f32.gmra.mxu0 %v187_v17  ;;  %409 = vmatmul.f32.gmra.mxu3 %v190_v18 }
  0x4f   : > { %333 = vmatmul.f32.gmra.mxu1 %v188_v19 }
  0x54   : > { %374 = vmatmul.f32.gmra.mxu2 %v193_v20 }
  0x55   : > { %298 = vmatmul.f32.gmra.mxu0 %v191_v21  ;;  %412 = vmatmul.f32.gmra.mxu3 %v194_v22 }
  0x57   : > { %336 = vmatmul.f32.gmra.mxu1 %v192_v23 }
  0x5c   : > { %377 = vmatmul.f32.gmra.mxu2 %v197_v24 }
  0x5d   : > { %301 = vmatmul.f32.gmra.mxu0 %v195_v25  ;;  %415 = vmatmul.f32.gmra.mxu3 %v198_v26 }
  0x5f   : > { %339 = vmatmul.f32.gmra.mxu1 %v196_v27 }
  0xaa   : > { %v284_v29 = vpop.f32.mrf.mxu0 }
  0xab   : > { %v285_v30 = vadd.f32 %v787_v28, %v284_v29 }
  0xac   : > { %v322_v31 = vpop.f32.mrf.mxu1 }
  0xad   : > { %v323_v32 = vadd.f32 %v322_v31, %v285_v30 }
  0xaf   : > { %v360_v33 = vpop.f32.mrf.mxu2 }
  0xb0   : > { %v361_v34 = vadd.f32 %v360_v33, %v323_v32  ;;  %v398_v35 = vpop.f32.mrf.mxu3 }
  0xb2   : > { %v399_v36 = vadd.f32 %v398_v35, %v361_v34  ;;  %v287_v37 = vpop.f32.mrf.mxu0 }
  0xb3   : > { %v288_v38 = vadd.f32 %v787_v28, %v287_v37 }
  0xb4   : > { %v419_v39 = vmax.f32 %v399_v36, 0.0  ;;  %v325_v40 = vpop.f32.mrf.mxu1 }
  0xb5   : > { %v326_v41 = vadd.f32 %v325_v40, %v288_v38 }
  0xb6   : > { %427 = vst.msk [vmem:[%s794_s27] sm:$0xff] %vm426_vm0, %v419_v39 }
  0xb7   : > { %v363_v42 = vpop.f32.mrf.mxu2 }
  0xb8   : > { %v364_v43 = vadd.f32 %v363_v42, %v326_v41  ;;  %v401_v44 = vpop.f32.mrf.mxu3 }
  0xba   : > { %v402_v45 = vadd.f32 %v401_v44, %v364_v43  ;;  %v290_v46 = vpop.f32.mrf.mxu0 }
  0xbb   : > { %v291_v47 = vadd.f32 %v787_v28, %v290_v46 }
  0xbc   : > { %v420_v48 = vmax.f32 %v402_v45, 0.0  ;;  %v328_v49 = vpop.f32.mrf.mxu1 }
  0xbd   : > { %v329_v50 = vadd.f32 %v328_v49, %v291_v47 }
  0xbe   : > { %428 = vst.msk [vmem:[%s794_s27 + $0x8] sm:$0xff] %vm426_vm0, %v420_v48 }
  0xbf   : > { %v366_v51 = vpop.f32.mrf.mxu2 }
  0xc0   : > { %v367_v52 = vadd.f32 %v366_v51, %v329_v50  ;;  %v404_v53 = vpop.f32.mrf.mxu3 }
  0xc2   : > { %v405_v54 = vadd.f32 %v404_v53, %v367_v52  ;;  %v293_v55 = vpop.f32.mrf.mxu0 }
  0xc3   : > { %v294_v56 = vadd.f32 %v787_v28, %v293_v55 }
  0xc4   : > { %v421_v57 = vmax.f32 %v405_v54, 0.0  ;;  %v331_v58 = vpop.f32.mrf.mxu1 }
  0xc5   : > { %v332_v59 = vadd.f32 %v331_v58, %v294_v56 }
  0xc6   : > { %429 = vst.msk [vmem:[%s794_s27 + $0x10] sm:$0xff] %vm426_vm0, %v421_v57 }
  0xc7   : > { %v369_v60 = vpop.f32.mrf.mxu2 }
  0xc8   : > { %v370_v61 = vadd.f32 %v369_v60, %v332_v59  ;;  %v407_v62 = vpop.f32.mrf.mxu3 }
  0xca   : > { %v408_v63 = vadd.f32 %v407_v62, %v370_v61  ;;  %v296_v0 = vpop.f32.mrf.mxu0 }
  0xcb   : > { %v297_v1 = vadd.f32 %v787_v28, %v296_v0 }
  0xcc   : > { %v422_v2 = vmax.f32 %v408_v63, 0.0  ;;  %v334_v3 = vpop.f32.mrf.mxu1 }
  0xcd   : > { %v335_v4 = vadd.f32 %v334_v3, %v297_v1 }
  0xce   : > { %430 = vst.msk [vmem:[%s794_s27 + $0x18] sm:$0xff] %vm426_vm0, %v422_v2 }
  0xcf   : > { %v372_v5 = vpop.f32.mrf.mxu2 }
  0xd0   : > { %v373_v6 = vadd.f32 %v372_v5, %v335_v4  ;;  %v410_v7 = vpop.f32.mrf.mxu3 }
  0xd2   : > { %v411_v8 = vadd.f32 %v410_v7, %v373_v6  ;;  %v299_v9 = vpop.f32.mrf.mxu0 }
  0xd3   : > { %v300_v10 = vadd.f32 %v787_v28, %v299_v9 }
  0xd4   : > { %v423_v11 = vmax.f32 %v411_v8, 0.0  ;;  %v337_v12 = vpop.f32.mrf.mxu1 }
  0xd5   : > { %v338_v13 = vadd.f32 %v337_v12, %v300_v10 }
  0xd6   : > { %431 = vst.msk [vmem:[%s794_s27 + $0x20] sm:$0xff] %vm426_vm0, %v423_v11 }
  0xd7   : > { %v375_v14 = vpop.f32.mrf.mxu2 }
  0xd8   : > { %v376_v15 = vadd.f32 %v375_v14, %v338_v13  ;;  %v413_v16 = vpop.f32.mrf.mxu3 }
  0xda   : > { %v414_v17 = vadd.f32 %v413_v16, %v376_v15  ;;  %v302_v18 = vpop.f32.mrf.mxu0 }
  0xdb   : > { %v303_v19 = vadd.f32 %v787_v28, %v302_v18 }
  0xdc   : > { %v424_v20 = vmax.f32 %v414_v17, 0.0  ;;  %v340_v21 = vpop.f32.mrf.mxu1 }
  0xdd   : > { %v341_v22 = vadd.f32 %v340_v21, %v303_v19 }
  0xde   : > { %432 = vst.msk [vmem:[%s794_s27 + $0x28] sm:$0xff] %vm426_vm0, %v424_v20 }
  0xdf   : > { %v378_v23 = vpop.f32.mrf.mxu2 }
  0xe0   : > { %v379_v24 = vadd.f32 %v378_v23, %v341_v22  ;;  %v416_v25 = vpop.f32.mrf.mxu3 }
  0xe2   : > { %v417_v26 = vadd.f32 %v416_v25, %v379_v24 }
  0xe4   : > { %v425_v27 = vmax.f32 %v417_v26, 0.0 }
  0xe6   : > { %434 = vst.msk [vmem:[%s794_s27 + $0x30] sm:$0x1] %vm433_vm1, %v425_v27 }
  0xe7 PF: > { %s13_s12 = sadd.s32 1, %s516_s12  }
  0xe8   : > { %p10_p4 = scmp.ge.s32.totalorder %s13_s12, 4  }
  0xea   :  { %12 = sbr.rel (!%p10_p4) target bundleno = 1 (0x1), region = 62 }

// kernel: enclassifier_forward.5
= control target key start
LH: loop header
LB: loop body
LE: loop exit
PB: predicated region body
PF: predicated region fallthrough
CT: control target
= control target key end

     0   :  { %s5468_s0 = inlined_call_operand.vmem [shape: f32[2,1,3136], index: 0, kind: input, shape index: {}]   ;;  %s5469_s1 = inlined_call_operand.vmem [shape: f32[2,1,128], index: 1, kind: input, shape index: {}]   ;;  %s5470_s2 = inlined_call_operand.vmem [shape: f32[3136,256], index: 2, kind: input, shape index: {}]   ;;  %s5471_s3 = inlined_call_operand.vmem [shape: f32[1,256], index: 3, kind: input, shape index: {}]   ;;  %s5472_s4 = inlined_call_operand.vmem [shape: f32[128,128], index: 4, kind: input, shape index: {}]   ;;  %s5473_s5 = inlined_call_operand.vmem [shape: f32[1,128], index: 5, kind: input, shape index: {}]   ;;  %s5474_s6 = inlined_call_operand.vmem [shape: f32[128,128], index: 6, kind: input, shape index: {}]   ;;  %s5475_s7 = inlined_call_operand.vmem [shape: f32[1,128], index: 7, kind: input, shape index: {}]   ;;  %s5476_s8 = inlined_call_operand.hbm [shape: f32[2,1,128], index: 8, kind: output, shape index: {0}]   ;;  %s5477_s9 = inlined_call_operand.hbm [shape: f32[2,1,128], index: 9, kind: output, shape index: {1}]   ;;  %s5478_s10 = inlined_call_operand.hbm [shape: f32[2,1,128], index: 10, kind: output, shape index: {2}]  }
   0x1   :  { %5482 = sst [smem:[#allocation11_spill]] %s5468_s0 }
   0x2   :  { %5483 = sst [smem:[#allocation12_spill]] %s5469_s1 }
   0x3   :  { %5484 = sst [smem:[#allocation13_spill]] %s5470_s2 }
   0x4   :  { %16 = vsyncpa [#allocation3], 0 }
   0x5   :  { %18 = vsyncpa [#allocation3 + $0x1], 0 }
   0x6   :  { %19 = vsyncpa [#allocation5], 0 }
   0x7   :  { %21 = vsyncpa [#allocation5 + $0x1], 0  ;;  %s2724_s13 = smov 0   ;;  %s2726_s14 = smov 0  }
   0x8   :  { %s2728_s15 = smov 0   ;;  %s2730_s16 = smov 0  }
   0x9 LB: > { %5485 = sst [smem:[#allocation9_spill]] %s2663_s15  ;;  %s2745_s17 = sadd.s32 4294967295, %s2667_s16   ;;  %s2667_s16 = sphi %s2730_s16, %s5498_s16   ;;  %s2663_s15 = sphi %s2728_s15, %s5495_s15   ;;  %s2659_s14 = sphi %s2726_s14, %s5497_s14   ;;  %s2655_s13 = sphi %s2724_s13, %s5496_s13  }
   0xa   : > { %s5479_s18 = sadd.s32 4294967294, %s2667_s16   ;;  %s2749_s19 = sadd.s32 1, %s2667_s16  }
   0xb   : > { %s212_s20 = sadd.s32 1, %s2663_s15  ;;  %s209_s21 = ssub.s32 %s2667_s16, %s2749_s19 }
   0xc   : > { %p222_p0 = scmp.ne.s32.totalorder %s2663_s15, %s2659_s14  ;;  %p210_p1 = scmp.eq.s32.totalorder %s209_s21, 0 }
   0xd   : > { %p223_p2 = scmp.eq.s32.totalorder %s2745_s17, 1  ;;  %p228_p3 = scmp.ne.s32.totalorder %s2659_s14, %s2655_s13 }
   0xe   : > { %p229_p4 = scmp.eq.s32.totalorder %s5479_s18, 1  ;;  %p2485_p7 = scmp.ge.s32.totalorder %s2667_s16, 1 }
   0xf   : > { %s2762_s22 = scalar_select %p210_p1, %s2663_s15, %s212_s20  }
  0x10   : > { %p2764_p5 = por %p223_p2, %p222_p0  ;;  %p2768_p6 = por %p229_p4, %p228_p3 }
  0x11   : > { %5486 = sst [smem:[#allocation10_spill]] %s2762_s22  ;;  %p330_p8 = scmp.lt.s32.totalorder %s2667_s16, 3 }
  0x13   : > { %p331_p9 = pnand %p2485_p7, %p330_p8 }
  0x14   : > { %s5489_s2 = sld [smem:[#allocation13_spill]] (!%p331_p9)  ;;  %p377_p10 = scmp.lt.s32.totalorder (!%p331_p9), %s2745_s17, 1 }
  0x15   : > { %334 = sbr.rel (%p331_p9) target bundleno = 868 (0x364), region = 52  ;;  %s5490_s0 = sld [smem:[#allocation11_spill]] (!%p331_p9) }
  0x16   : > { %s4856_s28 = sand.u32 (!%p331_p9), 1, %s2659_s14   ;;  %s5491_s1 = sld [smem:[#allocation12_spill]] (!%p331_p9) }
  0x17   : > { %s5481_s12 = scalar_lea.vmem (!%p331_p9), [#allocation2], %s4856_s28  ;;  %s370_s22 = scalar_lea.vmem (!%p331_p9), [#allocation4], %s4856_s28 }
  0x18   : > { %s2348_s11 = scalar_lea.hbm (!%p331_p9), %s5477_s9, %s2745_s17  ;;  %s2322_s20 = sand.u32 (!%p331_p9), 1, %s2745_s17  }
  0x19   : > { %s2350_s21 = sshll.u32 (!%p331_p9), %s370_s22, 4  ;;  %s2335_s27 = scalar_lea.hbm (!%p331_p9), %s5476_s8, %s2745_s17  ;;  %s2351_s21 = int_to_ptr.vmem [resolvable:$true] %s2350_s21 }
  0x1a   : > { %v418_v0 = vld [vmem:[%s5489_s2 + $0xf0] sm:$0xff]  ;;  %v416_v3 = vld [vmem:[%s5489_s2 + $0xe0] sm:$0xff]  ;;  %s3063_s29 = scalar_select %p377_p10, %s2745_s17, 1  ;;  %vm1231_vm0 = vcmask 523264  }
  0x1b   : > { %v450_v1 = vld [vmem:[%s5489_s2 + $0x1f0] sm:$0xff]  ;;  %1234 = vmatpush.msra.mxu0 %v418_v0  ;;  %v448_v4 = vld [vmem:[%s5489_s2 + $0x1e0] sm:$0xff]  ;;  %s5404_s18 = scalar_lea.sflag [#allocation5], %s2322_s20 }
  0x1c   : > { %v482_v2 = vld [vmem:[%s5489_s2 + $0x2f0] sm:$0xff]  ;;  %1254 = vmatpush.msra.mxu1 %v450_v1  ;;  %v480_v5 = vld [vmem:[%s5489_s2 + $0x2e0] sm:$0xff]  ;;  %s2490_s25 = smul.u32 25, %s3063_s29 }
  0x1d   : > { %1274 = vmatpush.msra.mxu2 %v482_v2  ;;  %v514_v6 = vld [vmem:[%s5489_s2 + $0x3f0] sm:$0xff]  ;;  %1235 = vmatpush.msra.mxu0 %v416_v3  ;;  %v512_v10 = vld [vmem:[%s5489_s2 + $0x3e0] sm:$0xff] }
  0x1e   : > { %v414_v7 = vld [vmem:[%s5489_s2 + $0xd0] sm:$0xff]  ;;  %1255 = vmatpush.msra.mxu1 %v448_v4  ;;  %1294 = vmatpush.msra.mxu3 %v514_v6  ;;  %v412_v11 = vld [vmem:[%s5489_s2 + $0xc0] sm:$0xff]  ;;  %s3117_s15 = scalar_lea.vmem %s5490_s0, %s2490_s25  ;;  %s383_s25 = scalar_lea.vmem %s5491_s1, %s3063_s29 }
  0x1f   : > { %v446_v8 = vld [vmem:[%s5489_s2 + $0x1d0] sm:$0xff]  ;;  %1275 = vmatpush.msra.mxu2 %v480_v5  ;;  %v444_v12 = vld [vmem:[%s5489_s2 + $0x1c0] sm:$0xff]  ;;  %1236 = vmatpush.msra.mxu0 %v414_v7  ;;  %s2352_s29 = sshll.u32 %s2348_s11, 4  ;;  %s2353_s29 = int_to_ptr.hbm [resolvable:$true] %s2352_s29 }
  0x20   : > { %v478_v9 = vld [vmem:[%s5489_s2 + $0x2d0] sm:$0xff]  ;;  %1256 = vmatpush.msra.mxu1 %v446_v8  ;;  %v476_v13 = vld [vmem:[%s5489_s2 + $0x2c0] sm:$0xff]  ;;  %1295 = vmatpush.msra.mxu3 %v512_v10  ;;  %s2559_s30 = sshra.s32 %s2353_s29, 4  ;;  %s2560_s30 = int_to_ptr.hbm [resolvable:$true] %s2559_s30 }
  0x21   : > { %v510_v14 = vld [vmem:[%s5489_s2 + $0x3d0] sm:$0xff]  ;;  %1276 = vmatpush.msra.mxu2 %v478_v9  ;;  %1237 = vmatpush.msra.mxu0 %v412_v11  ;;  %v508_v18 = vld [vmem:[%s5489_s2 + $0x3c0] sm:$0xff]  ;;  %s2561_s0 = scalar_lea.hbm %s2560_s30, 1  ;;  %p2566_p0 = scmp.lt.s32.totalorder %s2560_s30, %s5477_s9 }
  0x22   : > { %v410_v15 = vld [vmem:[%s5489_s2 + $0xb0] sm:$0xff]  ;;  %1257 = vmatpush.msra.mxu1 %v444_v12  ;;  %1296 = vmatpush.msra.mxu3 %v510_v14  ;;  %v408_v19 = vld [vmem:[%s5489_s2 + $0xa0] sm:$0xff]  ;;  %p2562_p11 = scmp.ne.s32.totalorder %s2560_s30, %s2561_s0 }
  0x23   : > { %v442_v16 = vld [vmem:[%s5489_s2 + $0x1b0] sm:$0xff]  ;;  %1277 = vmatpush.msra.mxu2 %v476_v13  ;;  %v440_v20 = vld [vmem:[%s5489_s2 + $0x1a0] sm:$0xff]  ;;  %1238 = vmatpush.msra.mxu0 %v410_v15 }
  0x24   : > { %v474_v17 = vld [vmem:[%s5489_s2 + $0x2b0] sm:$0xff]  ;;  %1258 = vmatpush.msra.mxu1 %v442_v16  ;;  %v472_v21 = vld [vmem:[%s5489_s2 + $0x2a0] sm:$0xff]  ;;  %1297 = vmatpush.msra.mxu3 %v508_v18  ;;  %p2563_p12 = pnand %p2562_p11, %p2764_p5 }
  0x25   : > { %v506_v22 = vld [vmem:[%s5489_s2 + $0x3b0] sm:$0xff]  ;;  %1278 = vmatpush.msra.mxu2 %v474_v17  ;;  %1239 = vmatpush.msra.mxu0 %v408_v19  ;;  %v504_v26 = vld [vmem:[%s5489_s2 + $0x3a0] sm:$0xff] }
  0x26   : > { %v406_v23 = vld [vmem:[%s5489_s2 + $0x90] sm:$0xff]  ;;  %1259 = vmatpush.msra.mxu1 %v440_v20  ;;  %1298 = vmatpush.msra.mxu3 %v506_v22  ;;  %v404_v27 = vld [vmem:[%s5489_s2 + $0x80] sm:$0xff]  ;;  %p2564_p13 = pneg %p2563_p12 }
  0x27   : > { %v438_v24 = vld [vmem:[%s5489_s2 + $0x190] sm:$0xff]  ;;  %1279 = vmatpush.msra.mxu2 %v472_v21  ;;  %v436_v28 = vld [vmem:[%s5489_s2 + $0x180] sm:$0xff]  ;;  %1240 = vmatpush.msra.mxu0 %v406_v23 }
  0x28   : > { %v470_v25 = vld [vmem:[%s5489_s2 + $0x290] sm:$0xff]  ;;  %1260 = vmatpush.msra.mxu1 %v438_v24  ;;  %v468_v29 = vld [vmem:[%s5489_s2 + $0x280] sm:$0xff]  ;;  %1299 = vmatpush.msra.mxu3 %v504_v26 }
  0x29   : > { %v502_v30 = vld [vmem:[%s5489_s2 + $0x390] sm:$0xff]  ;;  %1280 = vmatpush.msra.mxu2 %v470_v25  ;;  %1241 = vmatpush.msra.mxu0 %v404_v27  ;;  %v500_v34 = vld [vmem:[%s5489_s2 + $0x380] sm:$0xff] }
  0x2a   : > { %v402_v31 = vld [vmem:[%s5489_s2 + $0x70] sm:$0xff]  ;;  %1261 = vmatpush.msra.mxu1 %v436_v28  ;;  %1300 = vmatpush.msra.mxu3 %v502_v30  ;;  %v400_v35 = vld [vmem:[%s5489_s2 + $0x60] sm:$0xff] }
  0x2b   : > { %v434_v32 = vld [vmem:[%s5489_s2 + $0x170] sm:$0xff]  ;;  %1281 = vmatpush.msra.mxu2 %v468_v29  ;;  %v432_v36 = vld [vmem:[%s5489_s2 + $0x160] sm:$0xff]  ;;  %1242 = vmatpush.msra.mxu0 %v402_v31 }
  0x2c   : > { %v466_v33 = vld [vmem:[%s5489_s2 + $0x270] sm:$0xff]  ;;  %1262 = vmatpush.msra.mxu1 %v434_v32  ;;  %v464_v37 = vld [vmem:[%s5489_s2 + $0x260] sm:$0xff]  ;;  %1301 = vmatpush.msra.mxu3 %v500_v34 }
  0x2d   : > { %v498_v38 = vld [vmem:[%s5489_s2 + $0x370] sm:$0xff]  ;;  %1282 = vmatpush.msra.mxu2 %v466_v33  ;;  %1243 = vmatpush.msra.mxu0 %v400_v35  ;;  %v496_v42 = vld [vmem:[%s5489_s2 + $0x360] sm:$0xff] }
  0x2e   : > { %v398_v39 = vld [vmem:[%s5489_s2 + $0x50] sm:$0xff]  ;;  %1263 = vmatpush.msra.mxu1 %v432_v36  ;;  %1302 = vmatpush.msra.mxu3 %v498_v38  ;;  %v396_v43 = vld [vmem:[%s5489_s2 + $0x40] sm:$0xff] }
  0x2f   : > { %v430_v40 = vld [vmem:[%s5489_s2 + $0x150] sm:$0xff]  ;;  %1283 = vmatpush.msra.mxu2 %v464_v37  ;;  %v428_v44 = vld [vmem:[%s5489_s2 + $0x140] sm:$0xff]  ;;  %1244 = vmatpush.msra.mxu0 %v398_v39 }
  0x30   : > { %v462_v41 = vld [vmem:[%s5489_s2 + $0x250] sm:$0xff]  ;;  %1264 = vmatpush.msra.mxu1 %v430_v40  ;;  %v460_v45 = vld [vmem:[%s5489_s2 + $0x240] sm:$0xff]  ;;  %1303 = vmatpush.msra.mxu3 %v496_v42 }
  0x31   : > { %v494_v46 = vld [vmem:[%s5489_s2 + $0x350] sm:$0xff]  ;;  %1284 = vmatpush.msra.mxu2 %v462_v41  ;;  %1245 = vmatpush.msra.mxu0 %v396_v43  ;;  %v492_v50 = vld [vmem:[%s5489_s2 + $0x340] sm:$0xff] }
  0x32   : > { %v394_v47 = vld [vmem:[%s5489_s2 + $0x30] sm:$0xff]  ;;  %1265 = vmatpush.msra.mxu1 %v428_v44  ;;  %1304 = vmatpush.msra.mxu3 %v494_v46  ;;  %v392_v51 = vld [vmem:[%s5489_s2 + $0x20] sm:$0xff] }
  0x33   : > { %v426_v48 = vld [vmem:[%s5489_s2 + $0x130] sm:$0xff]  ;;  %1285 = vmatpush.msra.mxu2 %v460_v45  ;;  %v424_v52 = vld [vmem:[%s5489_s2 + $0x120] sm:$0xff]  ;;  %1246 = vmatpush.msra.mxu0 %v394_v47 }
  0x34   : > { %v458_v49 = vld [vmem:[%s5489_s2 + $0x230] sm:$0xff]  ;;  %1266 = vmatpush.msra.mxu1 %v426_v48  ;;  %v456_v53 = vld [vmem:[%s5489_s2 + $0x220] sm:$0xff]  ;;  %1305 = vmatpush.msra.mxu3 %v492_v50 }
  0x35   : > { %v490_v54 = vld [vmem:[%s5489_s2 + $0x330] sm:$0xff]  ;;  %1286 = vmatpush.msra.mxu2 %v458_v49  ;;  %1247 = vmatpush.msra.mxu0 %v392_v51  ;;  %v488_v58 = vld [vmem:[%s5489_s2 + $0x320] sm:$0xff] }
  0x36   : > { %v390_v55 = vld [vmem:[%s5489_s2 + $0x10] sm:$0xff]  ;;  %1267 = vmatpush.msra.mxu1 %v424_v52  ;;  %1306 = vmatpush.msra.mxu3 %v490_v54  ;;  %v388_v59 = vld [vmem:[%s5489_s2] sm:$0xff] }
  0x37   : > { %v422_v56 = vld [vmem:[%s5489_s2 + $0x110] sm:$0xff]  ;;  %1287 = vmatpush.msra.mxu2 %v456_v53  ;;  %v420_v60 = vld [vmem:[%s5489_s2 + $0x100] sm:$0xff]  ;;  %1248 = vmatpush.msra.mxu0 %v390_v55 }
  0x38   : > { %v454_v57 = vld [vmem:[%s5489_s2 + $0x210] sm:$0xff]  ;;  %1268 = vmatpush.msra.mxu1 %v422_v56  ;;  %v452_v61 = vld [vmem:[%s5489_s2 + $0x200] sm:$0xff]  ;;  %1307 = vmatpush.msra.mxu3 %v488_v58 }
  0x39   : > { %v486_v62 = vld [vmem:[%s5489_s2 + $0x310] sm:$0xff]  ;;  %1288 = vmatpush.msra.mxu2 %v454_v57  ;;  %1249 = vmatpush.msra.mxu0 %v388_v59  ;;  %v484_v2 = vld [vmem:[%s5489_s2 + $0x300] sm:$0xff] }
  0x3a   : > { %v546_v63 = vld [vmem:[%s5489_s2 + $0x4f0] sm:$0xff]  ;;  %1269 = vmatpush.msra.mxu1 %v420_v60  ;;  %1308 = vmatpush.msra.mxu3 %v486_v62  ;;  %v544_v3 = vld [vmem:[%s5489_s2 + $0x4e0] sm:$0xff] }
  0x3b   : > { %v578_v0 = vld [vmem:[%s5489_s2 + $0x5f0] sm:$0xff]  ;;  %1289 = vmatpush.msra.mxu2 %v452_v61  ;;  %v576_v4 = vld [vmem:[%s5489_s2 + $0x5e0] sm:$0xff]  ;;  %1314 = vmatpush.msrb.mxu0 %v546_v63 }
  0x3c   : > { %v610_v1 = vld [vmem:[%s5489_s2 + $0x6f0] sm:$0xff]  ;;  %1334 = vmatpush.msrb.mxu1 %v578_v0  ;;  %v608_v5 = vld [vmem:[%s5489_s2 + $0x6e0] sm:$0xff]  ;;  %1309 = vmatpush.msra.mxu3 %v484_v2 }
  0x3d   : > { %v642_v6 = vld [vmem:[%s5489_s2 + $0x7f0] sm:$0xff]  ;;  %1354 = vmatpush.msrb.mxu2 %v610_v1  ;;  %1315 = vmatpush.msrb.mxu0 %v544_v3  ;;  %v640_v10 = vld [vmem:[%s5489_s2 + $0x7e0] sm:$0xff] }
  0x3e   : > { %v542_v7 = vld [vmem:[%s5489_s2 + $0x4d0] sm:$0xff]  ;;  %1335 = vmatpush.msrb.mxu1 %v576_v4  ;;  %1374 = vmatpush.msrb.mxu3 %v642_v6  ;;  %v540_v11 = vld [vmem:[%s5489_s2 + $0x4c0] sm:$0xff] }
  0x3f   : > { %v574_v8 = vld [vmem:[%s5489_s2 + $0x5d0] sm:$0xff]  ;;  %1355 = vmatpush.msrb.mxu2 %v608_v5  ;;  %v572_v12 = vld [vmem:[%s5489_s2 + $0x5c0] sm:$0xff]  ;;  %1316 = vmatpush.msrb.mxu0 %v542_v7 }
  0x40   : > { %v606_v9 = vld [vmem:[%s5489_s2 + $0x6d0] sm:$0xff]  ;;  %1336 = vmatpush.msrb.mxu1 %v574_v8  ;;  %v604_v13 = vld [vmem:[%s5489_s2 + $0x6c0] sm:$0xff]  ;;  %1375 = vmatpush.msrb.mxu3 %v640_v10 }
  0x41   : > { %v638_v14 = vld [vmem:[%s5489_s2 + $0x7d0] sm:$0xff]  ;;  %1356 = vmatpush.msrb.mxu2 %v606_v9  ;;  %1317 = vmatpush.msrb.mxu0 %v540_v11  ;;  %v636_v18 = vld [vmem:[%s5489_s2 + $0x7c0] sm:$0xff] }
  0x42   : > { %v538_v15 = vld [vmem:[%s5489_s2 + $0x4b0] sm:$0xff]  ;;  %1337 = vmatpush.msrb.mxu1 %v572_v12  ;;  %1376 = vmatpush.msrb.mxu3 %v638_v14  ;;  %v536_v19 = vld [vmem:[%s5489_s2 + $0x4a0] sm:$0xff] }
  0x43   : > { %v570_v16 = vld [vmem:[%s5489_s2 + $0x5b0] sm:$0xff]  ;;  %1357 = vmatpush.msrb.mxu2 %v604_v13  ;;  %v568_v20 = vld [vmem:[%s5489_s2 + $0x5a0] sm:$0xff]  ;;  %1318 = vmatpush.msrb.mxu0 %v538_v15 }
  0x44   : > { %v602_v17 = vld [vmem:[%s5489_s2 + $0x6b0] sm:$0xff]  ;;  %1338 = vmatpush.msrb.mxu1 %v570_v16  ;;  %v600_v21 = vld [vmem:[%s5489_s2 + $0x6a0] sm:$0xff]  ;;  %1377 = vmatpush.msrb.mxu3 %v636_v18 }
  0x45   : > { %v634_v22 = vld [vmem:[%s5489_s2 + $0x7b0] sm:$0xff]  ;;  %1358 = vmatpush.msrb.mxu2 %v602_v17  ;;  %1319 = vmatpush.msrb.mxu0 %v536_v19  ;;  %v632_v26 = vld [vmem:[%s5489_s2 + $0x7a0] sm:$0xff] }
  0x46   : > { %v534_v23 = vld [vmem:[%s5489_s2 + $0x490] sm:$0xff]  ;;  %1339 = vmatpush.msrb.mxu1 %v568_v20  ;;  %1378 = vmatpush.msrb.mxu3 %v634_v22  ;;  %v532_v27 = vld [vmem:[%s5489_s2 + $0x480] sm:$0xff] }
  0x47   : > { %v566_v24 = vld [vmem:[%s5489_s2 + $0x590] sm:$0xff]  ;;  %1359 = vmatpush.msrb.mxu2 %v600_v21  ;;  %v564_v28 = vld [vmem:[%s5489_s2 + $0x580] sm:$0xff]  ;;  %1320 = vmatpush.msrb.mxu0 %v534_v23 }
  0x48   : > { %v598_v25 = vld [vmem:[%s5489_s2 + $0x690] sm:$0xff]  ;;  %1340 = vmatpush.msrb.mxu1 %v566_v24  ;;  %v596_v29 = vld [vmem:[%s5489_s2 + $0x680] sm:$0xff]  ;;  %1379 = vmatpush.msrb.mxu3 %v632_v26 }
  0x49   : > { %v630_v30 = vld [vmem:[%s5489_s2 + $0x790] sm:$0xff]  ;;  %1360 = vmatpush.msrb.mxu2 %v598_v25  ;;  %1321 = vmatpush.msrb.mxu0 %v532_v27  ;;  %v628_v34 = vld [vmem:[%s5489_s2 + $0x780] sm:$0xff] }
  0x4a   : > { %v530_v31 = vld [vmem:[%s5489_s2 + $0x470] sm:$0xff]  ;;  %1341 = vmatpush.msrb.mxu1 %v564_v28  ;;  %1380 = vmatpush.msrb.mxu3 %v630_v30  ;;  %v528_v35 = vld [vmem:[%s5489_s2 + $0x460] sm:$0xff] }
  0x4b   : > { %v562_v32 = vld [vmem:[%s5489_s2 + $0x570] sm:$0xff]  ;;  %1361 = vmatpush.msrb.mxu2 %v596_v29  ;;  %v560_v36 = vld [vmem:[%s5489_s2 + $0x560] sm:$0xff]  ;;  %1322 = vmatpush.msrb.mxu0 %v530_v31 }
  0x4c   : > { %v594_v33 = vld [vmem:[%s5489_s2 + $0x670] sm:$0xff]  ;;  %1342 = vmatpush.msrb.mxu1 %v562_v32  ;;  %v592_v37 = vld [vmem:[%s5489_s2 + $0x660] sm:$0xff]  ;;  %1381 = vmatpush.msrb.mxu3 %v628_v34 }
  0x4d   : > { %v626_v38 = vld [vmem:[%s5489_s2 + $0x770] sm:$0xff]  ;;  %1362 = vmatpush.msrb.mxu2 %v594_v33  ;;  %1323 = vmatpush.msrb.mxu0 %v528_v35  ;;  %v624_v42 = vld [vmem:[%s5489_s2 + $0x760] sm:$0xff] }
  0x4e   : > { %v526_v39 = vld [vmem:[%s5489_s2 + $0x450] sm:$0xff]  ;;  %1343 = vmatpush.msrb.mxu1 %v560_v36  ;;  %1382 = vmatpush.msrb.mxu3 %v626_v38  ;;  %v524_v43 = vld [vmem:[%s5489_s2 + $0x440] sm:$0xff] }
  0x4f   : > { %v558_v40 = vld [vmem:[%s5489_s2 + $0x550] sm:$0xff]  ;;  %1363 = vmatpush.msrb.mxu2 %v592_v37  ;;  %v556_v44 = vld [vmem:[%s5489_s2 + $0x540] sm:$0xff]  ;;  %1324 = vmatpush.msrb.mxu0 %v526_v39 }
  0x50   : > { %v590_v41 = vld [vmem:[%s5489_s2 + $0x650] sm:$0xff]  ;;  %1344 = vmatpush.msrb.mxu1 %v558_v40  ;;  %v588_v45 = vld [vmem:[%s5489_s2 + $0x640] sm:$0xff]  ;;  %1383 = vmatpush.msrb.mxu3 %v624_v42 }
  0x51   : > { %v622_v46 = vld [vmem:[%s5489_s2 + $0x750] sm:$0xff]  ;;  %1364 = vmatpush.msrb.mxu2 %v590_v41  ;;  %1325 = vmatpush.msrb.mxu0 %v524_v43  ;;  %v620_v50 = vld [vmem:[%s5489_s2 + $0x740] sm:$0xff] }
  0x52   : > { %v522_v47 = vld [vmem:[%s5489_s2 + $0x430] sm:$0xff]  ;;  %1345 = vmatpush.msrb.mxu1 %v556_v44  ;;  %v520_v51 = vld [vmem:[%s5489_s2 + $0x420] sm:$0xff]  ;;  %1384 = vmatpush.msrb.mxu3 %v622_v46 }
  0x53   : > { %v554_v48 = vld [vmem:[%s5489_s2 + $0x530] sm:$0xff]  ;;  %1365 = vmatpush.msrb.mxu2 %v588_v45  ;;  %v552_v52 = vld [vmem:[%s5489_s2 + $0x520] sm:$0xff]  ;;  %1326 = vmatpush.msrb.mxu0 %v522_v47 }
  0x54   : > { %v586_v49 = vld [vmem:[%s5489_s2 + $0x630] sm:$0xff]  ;;  %v3138_v53 = vld [vmem:[%s3117_s15] sm:$0xff]  ;;  %1346 = vmatpush.msrb.mxu1 %v554_v48  ;;  %1385 = vmatpush.msrb.mxu3 %v620_v50 }
  0x55   : > { %v584_v54 = vld [vmem:[%s5489_s2 + $0x620] sm:$0xff]  ;;  %v618_v55 = vld [vmem:[%s5489_s2 + $0x730] sm:$0xff]  ;;  %1366 = vmatpush.msrb.mxu2 %v586_v49  ;;  %1327 = vmatpush.msrb.mxu0 %v520_v51  ;;  %v1179_v60 = vperm.slane %v3138_v53, 2  ;;  %v1177_v0 = vperm.slane %v3138_v53, 0  ;;  %v1178_v2 = vperm.slane %v3138_v53, 1  ;;  %v1180_v3 = vperm.slane %v3138_v53, 3 }
  0x56   : > { %v518_v56 = vld [vmem:[%s5489_s2 + $0x410] sm:$0xff]  ;;  %1347 = vmatpush.msrb.mxu1 %v552_v52  ;;  %v616_v59 = vld [vmem:[%s5489_s2 + $0x720] sm:$0xff]  ;;  %1386 = vmatpush.msrb.mxu3 %v618_v55  ;;  %v1183_v16 = vperm.slane %v3138_v53, 6  ;;  %v1181_v20 = vperm.slane %v3138_v53, 4  ;;  %v1184_v22 = vperm.slane %v3138_v53, 7  ;;  %v1182_v26 = vperm.slane %v3138_v53, 5 }
  0x57   : > { %v550_v57 = vld [vmem:[%s5489_s2 + $0x510] sm:$0xff]  ;;  %1367 = vmatpush.msrb.mxu2 %v584_v54  ;;  %v516_v61 = vld [vmem:[%s5489_s2 + $0x400] sm:$0xff]  ;;  %1328 = vmatpush.msrb.mxu0 %v518_v56  ;;  %v687_v53 = vld [vmem:[%s5489_s2 + $0x958] sm:$0xff] }
  0x58   : > { %v582_v58 = vld [vmem:[%s5489_s2 + $0x610] sm:$0xff]  ;;  %1348 = vmatpush.msrb.mxu1 %v550_v57  ;;  %v548_v62 = vld [vmem:[%s5489_s2 + $0x500] sm:$0xff]  ;;  %1387 = vmatpush.msrb.mxu3 %v616_v59 }
  0x59   : > { %v580_v63 = vld [vmem:[%s5489_s2 + $0x600] sm:$0xff]  ;;  %1368 = vmatpush.msrb.mxu2 %v582_v58  ;;  %v614_v1 = vld [vmem:[%s5489_s2 + $0x710] sm:$0xff]  ;;  %1329 = vmatpush.msrb.mxu0 %v516_v61 }
  0x5a   : > { %1290 = vmatmul.f32.vlgmr.msra.gmra.mxu2 %v1179_v60  ;;  %1349 = vmatpush.msrb.mxu1 %v548_v62  ;;  %v674_v4 = vld [vmem:[%s5489_s2 + $0x8f0] sm:$0xff]  ;;  %v612_v7 = vld [vmem:[%s5489_s2 + $0x700] sm:$0xff] }
  0x5b   : > { %1369 = vmatpush.msrb.mxu2 %v580_v63  ;;  %v706_v5 = vld [vmem:[%s5489_s2 + $0x9f0] sm:$0xff]  ;;  %1388 = vmatpush.msrb.mxu3 %v614_v1  ;;  %v672_v8 = vld [vmem:[%s5489_s2 + $0x8e0] sm:$0xff] }
  0x5c   : > { %1250 = vmatmul.f32.vlgmr.msra.gmra.mxu0 %v1177_v0  ;;  %v738_v6 = vld [vmem:[%s5489_s2 + $0xaf0] sm:$0xff]  ;;  %1270 = vmatmul.f32.vlgmr.msra.gmra.mxu1 %v1178_v2  ;;  %v704_v9 = vld [vmem:[%s5489_s2 + $0x9e0] sm:$0xff] }
  0x5d   : > { %1310 = vmatmul.f32.vlgmr.msra.gmra.mxu3 %v1180_v3  ;;  %1394 = vmatpush.msra.mxu0 %v674_v4  ;;  %v736_v10 = vld [vmem:[%s5489_s2 + $0xae0] sm:$0xff]  ;;  %v770_v11 = vld [vmem:[%s5489_s2 + $0xbf0] sm:$0xff] }
  0x5e   : > { %1414 = vmatpush.msra.mxu1 %v706_v5  ;;  %1434 = vmatpush.msra.mxu2 %v738_v6  ;;  %v670_v12 = vld [vmem:[%s5489_s2 + $0x8d0] sm:$0xff]  ;;  %v768_v15 = vld [vmem:[%s5489_s2 + $0xbe0] sm:$0xff] }
  0x5f   : > { %1389 = vmatpush.msrb.mxu3 %v612_v7  ;;  %v702_v13 = vld [vmem:[%s5489_s2 + $0x9d0] sm:$0xff]  ;;  %1395 = vmatpush.msra.mxu0 %v672_v8  ;;  %v668_v17 = vld [vmem:[%s5489_s2 + $0x8c0] sm:$0xff]  ;;  %v3369_v7 = vld [vmem:[%s3117_s15 + $0x8] sm:$0xff] }
  0x60   : > { %1415 = vmatpush.msra.mxu1 %v704_v9  ;;  %v734_v14 = vld [vmem:[%s5489_s2 + $0xad0] sm:$0xff]  ;;  %1435 = vmatpush.msra.mxu2 %v736_v10  ;;  %v700_v18 = vld [vmem:[%s5489_s2 + $0x9c0] sm:$0xff] }
  0x61   : > { %1454 = vmatpush.msra.mxu3 %v770_v11  ;;  %1396 = vmatpush.msra.mxu0 %v670_v12  ;;  %v732_v19 = vld [vmem:[%s5489_s2 + $0xac0] sm:$0xff]  ;;  %v766_v21 = vld [vmem:[%s5489_s2 + $0xbd0] sm:$0xff] }
  0x62   : > { %1416 = vmatpush.msra.mxu1 %v702_v13  ;;  %1436 = vmatpush.msra.mxu2 %v734_v14  ;;  %v666_v23 = vld [vmem:[%s5489_s2 + $0x8b0] sm:$0xff]  ;;  %v764_v27 = vld [vmem:[%s5489_s2 + $0xbc0] sm:$0xff]  ;;  %v1185_v14 = vperm.slane %v3369_v7, 0 }
  0x63   : > { %1455 = vmatpush.msra.mxu3 %v768_v15  ;;  %1370 = vmatmul.f32.vlgmr.msrb.gmra.mxu2 %v1183_v16  ;;  %v698_v24 = vld [vmem:[%s5489_s2 + $0x9b0] sm:$0xff]  ;;  %v664_v28 = vld [vmem:[%s5489_s2 + $0x8a0] sm:$0xff]  ;;  %v1187_v15 = vperm.slane %v3369_v7, 2 }
  0x64   : > { %1397 = vmatpush.msra.mxu0 %v668_v17  ;;  %1417 = vmatpush.msra.mxu1 %v700_v18  ;;  %v730_v25 = vld [vmem:[%s5489_s2 + $0xab0] sm:$0xff]  ;;  %v696_v29 = vld [vmem:[%s5489_s2 + $0x9a0] sm:$0xff] }
  0x65   : > { %1437 = vmatpush.msra.mxu2 %v732_v19  ;;  %1456 = vmatpush.msra.mxu3 %v766_v21  ;;  %v728_v30 = vld [vmem:[%s5489_s2 + $0xaa0] sm:$0xff]  ;;  %v762_v31 = vld [vmem:[%s5489_s2 + $0xbb0] sm:$0xff] }
  0x66   : > { %1330 = vmatmul.f32.vlgmr.msrb.gmra.mxu0 %v1181_v20  ;;  %1390 = vmatmul.f32.vlgmr.msrb.gmra.mxu3 %v1184_v22  ;;  %v662_v32 = vld [vmem:[%s5489_s2 + $0x890] sm:$0xff]  ;;  %v760_v35 = vld [vmem:[%s5489_s2 + $0xba0] sm:$0xff] }
  0x67   : > { %1398 = vmatpush.msra.mxu0 %v666_v23  ;;  %1418 = vmatpush.msra.mxu1 %v698_v24  ;;  %v694_v33 = vld [vmem:[%s5489_s2 + $0x990] sm:$0xff]  ;;  %v660_v36 = vld [vmem:[%s5489_s2 + $0x880] sm:$0xff]  ;;  %v1186_v23 = vperm.slane %v3369_v7, 1  ;;  %v1188_v24 = vperm.slane %v3369_v7, 3 }
  0x68   : > { %1438 = vmatpush.msra.mxu2 %v730_v25  ;;  %1457 = vmatpush.msra.mxu3 %v764_v27  ;;  %v726_v34 = vld [vmem:[%s5489_s2 + $0xa90] sm:$0xff]  ;;  %v692_v37 = vld [vmem:[%s5489_s2 + $0x980] sm:$0xff] }
  0x69   : > { %1350 = vmatmul.f32.vlgmr.msrb.gmra.mxu1 %v1182_v26  ;;  %1399 = vmatpush.msra.mxu0 %v664_v28  ;;  %v724_v38 = vld [vmem:[%s5489_s2 + $0xa80] sm:$0xff]  ;;  %v758_v39 = vld [vmem:[%s5489_s2 + $0xb90] sm:$0xff] }
  0x6a   : > { %1419 = vmatpush.msra.mxu1 %v696_v29  ;;  %1439 = vmatpush.msra.mxu2 %v728_v30  ;;  %v658_v40 = vld [vmem:[%s5489_s2 + $0x870] sm:$0xff]  ;;  %v756_v43 = vld [vmem:[%s5489_s2 + $0xb80] sm:$0xff] }
  0x6b   : > { %1458 = vmatpush.msra.mxu3 %v762_v31  ;;  %1400 = vmatpush.msra.mxu0 %v662_v32  ;;  %v690_v41 = vld [vmem:[%s5489_s2 + $0x970] sm:$0xff]  ;;  %v656_v44 = vld [vmem:[%s5489_s2 + $0x860] sm:$0xff] }
  0x6c   : > { %1420 = vmatpush.msra.mxu1 %v694_v33  ;;  %1440 = vmatpush.msra.mxu2 %v726_v34  ;;  %v722_v42 = vld [vmem:[%s5489_s2 + $0xa70] sm:$0xff]  ;;  %v688_v45 = vld [vmem:[%s5489_s2 + $0x960] sm:$0xff] }
  0x6d   : > { %1459 = vmatpush.msra.mxu3 %v760_v35  ;;  %1401 = vmatpush.msra.mxu0 %v660_v36  ;;  %v720_v46 = vld [vmem:[%s5489_s2 + $0xa60] sm:$0xff]  ;;  %v754_v47 = vld [vmem:[%s5489_s2 + $0xb70] sm:$0xff] }
  0x6e   : > { %1421 = vmatpush.msra.mxu1 %v692_v37  ;;  %1441 = vmatpush.msra.mxu2 %v724_v38  ;;  %v654_v48 = vld [vmem:[%s5489_s2 + $0x850] sm:$0xff]  ;;  %v752_v51 = vld [vmem:[%s5489_s2 + $0xb60] sm:$0xff] }
  0x6f   : > { %1460 = vmatpush.msra.mxu3 %v758_v39  ;;  %1402 = vmatpush.msra.mxu0 %v658_v40  ;;  %v686_v49 = vld [vmem:[%s5489_s2 + $0x950] sm:$0xff]  ;;  %v652_v52 = vld [vmem:[%s5489_s2 + $0x840] sm:$0xff] }
  0x70   : > { %1422 = vmatpush.msra.mxu1 %v690_v41  ;;  %1442 = vmatpush.msra.mxu2 %v722_v42  ;;  %v718_v50 = vld [vmem:[%s5489_s2 + $0xa50] sm:$0xff]  ;;  %v684_v54 = vld [vmem:[%s5489_s2 + $0x940] sm:$0xff] }
  0x71   : > { %1461 = vmatpush.msra.mxu3 %v756_v43  ;;  %1403 = vmatpush.msra.mxu0 %v656_v44  ;;  %v716_v55 = vld [vmem:[%s5489_s2 + $0xa40] sm:$0xff]  ;;  %v750_v56 = vld [vmem:[%s5489_s2 + $0xb50] sm:$0xff] }
  0x72   : > { %1423 = vmatpush.msra.mxu1 %v688_v45  ;;  %1443 = vmatpush.msra.mxu2 %v720_v46  ;;  %v650_v57 = vld [vmem:[%s5489_s2 + $0x830] sm:$0xff]  ;;  %v748_v61 = vld [vmem:[%s5489_s2 + $0xb40] sm:$0xff] }
  0x73   : > { %1462 = vmatpush.msra.mxu3 %v754_v47  ;;  %1404 = vmatpush.msra.mxu0 %v654_v48  ;;  %v682_v58 = vld [vmem:[%s5489_s2 + $0x930] sm:$0xff]  ;;  %v648_v62 = vld [vmem:[%s5489_s2 + $0x820] sm:$0xff] }
  0x74   : > { %1424 = vmatpush.msra.mxu1 %v686_v49  ;;  %1444 = vmatpush.msra.mxu2 %v718_v50  ;;  %v714_v59 = vld [vmem:[%s5489_s2 + $0xa30] sm:$0xff]  ;;  %v680_v63 = vld [vmem:[%s5489_s2 + $0x920] sm:$0xff] }
  0x75   : > { %1463 = vmatpush.msra.mxu3 %v752_v51  ;;  %1405 = vmatpush.msra.mxu0 %v652_v52  ;;  %v712_v1 = vld [vmem:[%s5489_s2 + $0xa20] sm:$0xff]  ;;  %v746_v4 = vld [vmem:[%s5489_s2 + $0xb30] sm:$0xff] }
  0x76   : > { %1425 = vmatpush.msra.mxu1 %v684_v54  ;;  %1445 = vmatpush.msra.mxu2 %v716_v55  ;;  %v646_v5 = vld [vmem:[%s5489_s2 + $0x810] sm:$0xff]  ;;  %v744_v9 = vld [vmem:[%s5489_s2 + $0xb20] sm:$0xff] }
  0x77   : > { %1464 = vmatpush.msra.mxu3 %v750_v56  ;;  %1406 = vmatpush.msra.mxu0 %v650_v57  ;;  %v678_v6 = vld [vmem:[%s5489_s2 + $0x910] sm:$0xff]  ;;  %v644_v10 = vld [vmem:[%s5489_s2 + $0x800] sm:$0xff] }
  0x78   : > { %1426 = vmatpush.msra.mxu1 %v682_v58  ;;  %1446 = vmatpush.msra.mxu2 %v714_v59  ;;  %v710_v8 = vld [vmem:[%s5489_s2 + $0xa10] sm:$0xff]  ;;  %v676_v11 = vld [vmem:[%s5489_s2 + $0x900] sm:$0xff] }
  0x79   : > { %1465 = vmatpush.msra.mxu3 %v748_v61  ;;  %1407 = vmatpush.msra.mxu0 %v648_v62  ;;  %v708_v12 = vld [vmem:[%s5489_s2 + $0xa00] sm:$0xff]  ;;  %v742_v13 = vld [vmem:[%s5489_s2 + $0xb10] sm:$0xff] }
  0x7a   : > { %1427 = vmatpush.msra.mxu1 %v680_v63  ;;  %1447 = vmatpush.msra.mxu2 %v712_v1  ;;  %v802_v17 = vld [vmem:[%s5489_s2 + $0xcf0] sm:$0xff]  ;;  %v740_v21 = vld [vmem:[%s5489_s2 + $0xb00] sm:$0xff] }
  0x7b   : > { %1466 = vmatpush.msra.mxu3 %v746_v4  ;;  %1408 = vmatpush.msra.mxu0 %v646_v5  ;;  %v834_v18 = vld [vmem:[%s5489_s2 + $0xdf0] sm:$0xff]  ;;  %v800_v25 = vld [vmem:[%s5489_s2 + $0xce0] sm:$0xff] }
  0x7c   : > { %1428 = vmatpush.msra.mxu1 %v678_v6  ;;  %1448 = vmatpush.msra.mxu2 %v710_v8  ;;  %v866_v19 = vld [vmem:[%s5489_s2 + $0xef0] sm:$0xff]  ;;  %v832_v27 = vld [vmem:[%s5489_s2 + $0xde0] sm:$0xff] }
  0x7d   : > { %1467 = vmatpush.msra.mxu3 %v744_v9  ;;  %1409 = vmatpush.msra.mxu0 %v644_v10  ;;  %v864_v28 = vld [vmem:[%s5489_s2 + $0xee0] sm:$0xff]  ;;  %v898_v29 = vld [vmem:[%s5489_s2 + $0xff0] sm:$0xff] }
  0x7e   : > { %1429 = vmatpush.msra.mxu1 %v676_v11  ;;  %1449 = vmatpush.msra.mxu2 %v708_v12  ;;  %v798_v30 = vld [vmem:[%s5489_s2 + $0xcd0] sm:$0xff]  ;;  %v896_v33 = vld [vmem:[%s5489_s2 + $0xfe0] sm:$0xff] }
  0x7f   : > { %1468 = vmatpush.msra.mxu3 %v742_v13  ;;  %1410 = vmatmul.f32.vlgmr.msra.gmra.mxu0 %v1185_v14  ;;  %v830_v31 = vld [vmem:[%s5489_s2 + $0xdd0] sm:$0xff]  ;;  %v796_v34 = vld [vmem:[%s5489_s2 + $0xcc0] sm:$0xff] }
  0x80   : > { %1450 = vmatmul.f32.vlgmr.msra.gmra.mxu2 %v1187_v15  ;;  %1474 = vmatpush.msrb.mxu0 %v802_v17  ;;  %v862_v32 = vld [vmem:[%s5489_s2 + $0xed0] sm:$0xff]  ;;  %v828_v35 = vld [vmem:[%s5489_s2 + $0xdc0] sm:$0xff] }
  0x81   : > { %1494 = vmatpush.msrb.mxu1 %v834_v18  ;;  %1514 = vmatpush.msrb.mxu2 %v866_v19  ;;  %v860_v36 = vld [vmem:[%s5489_s2 + $0xec0] sm:$0xff]  ;;  %v894_v37 = vld [vmem:[%s5489_s2 + $0xfd0] sm:$0xff] }
  0x82   : > { %1469 = vmatpush.msra.mxu3 %v740_v21  ;;  %1430 = vmatmul.f32.vlgmr.msra.gmra.mxu1 %v1186_v23  ;;  %v794_v38 = vld [vmem:[%s5489_s2 + $0xcb0] sm:$0xff]  ;;  %v892_v41 = vld [vmem:[%s5489_s2 + $0xfc0] sm:$0xff] }
  0x83   : > { %1470 = vmatmul.f32.vlgmr.msra.gmra.mxu3 %v1188_v24  ;;  %1475 = vmatpush.msrb.mxu0 %v800_v25  ;;  %v826_v39 = vld [vmem:[%s5489_s2 + $0xdb0] sm:$0xff]  ;;  %v792_v42 = vld [vmem:[%s5489_s2 + $0xca0] sm:$0xff] }
  0x84   : > { %1495 = vmatpush.msrb.mxu1 %v832_v27  ;;  %1515 = vmatpush.msrb.mxu2 %v864_v28  ;;  %v858_v40 = vld [vmem:[%s5489_s2 + $0xeb0] sm:$0xff]  ;;  %v824_v43 = vld [vmem:[%s5489_s2 + $0xda0] sm:$0xff] }
  0x85   : > { %1534 = vmatpush.msrb.mxu3 %v898_v29  ;;  %1476 = vmatpush.msrb.mxu0 %v798_v30  ;;  %v856_v44 = vld [vmem:[%s5489_s2 + $0xea0] sm:$0xff]  ;;  %v890_v45 = vld [vmem:[%s5489_s2 + $0xfb0] sm:$0xff] }
  0x86   : > { %1496 = vmatpush.msrb.mxu1 %v830_v31  ;;  %1516 = vmatpush.msrb.mxu2 %v862_v32  ;;  %v790_v46 = vld [vmem:[%s5489_s2 + $0xc90] sm:$0xff]  ;;  %v888_v49 = vld [vmem:[%s5489_s2 + $0xfa0] sm:$0xff] }
  0x87   : > { %1535 = vmatpush.msrb.mxu3 %v896_v33  ;;  %1477 = vmatpush.msrb.mxu0 %v796_v34  ;;  %v822_v47 = vld [vmem:[%s5489_s2 + $0xd90] sm:$0xff]  ;;  %v788_v50 = vld [vmem:[%s5489_s2 + $0xc80] sm:$0xff] }
  0x88   : > { %1497 = vmatpush.msrb.mxu1 %v828_v35  ;;  %1517 = vmatpush.msrb.mxu2 %v860_v36  ;;  %v854_v48 = vld [vmem:[%s5489_s2 + $0xe90] sm:$0xff]  ;;  %v820_v51 = vld [vmem:[%s5489_s2 + $0xd80] sm:$0xff]  ;;  %v1189_v36 = vperm.slane %v3369_v7, 4 }
  0x89   : > { %1536 = vmatpush.msrb.mxu3 %v894_v37  ;;  %1478 = vmatpush.msrb.mxu0 %v794_v38  ;;  %v852_v52 = vld [vmem:[%s5489_s2 + $0xe80] sm:$0xff]  ;;  %v886_v54 = vld [vmem:[%s5489_s2 + $0xf90] sm:$0xff]  ;;  %v1191_v37 = vperm.slane %v3369_v7, 6 }
  0x8a   : > { %1498 = vmatpush.msrb.mxu1 %v826_v39  ;;  %1518 = vmatpush.msrb.mxu2 %v858_v40  ;;  %v786_v55 = vld [vmem:[%s5489_s2 + $0xc70] sm:$0xff]  ;;  %v884_v58 = vld [vmem:[%s5489_s2 + $0xf80] sm:$0xff] }
  0x8b   : > { %1537 = vmatpush.msrb.mxu3 %v892_v41  ;;  %1479 = vmatpush.msrb.mxu0 %v792_v42  ;;  %v818_v56 = vld [vmem:[%s5489_s2 + $0xd70] sm:$0xff]  ;;  %v784_v59 = vld [vmem:[%s5489_s2 + $0xc60] sm:$0xff]  ;;  %v1190_v42 = vperm.slane %v3369_v7, 5 }
  0x8c   : > { %1499 = vmatpush.msrb.mxu1 %v824_v43  ;;  %1519 = vmatpush.msrb.mxu2 %v856_v44  ;;  %v850_v57 = vld [vmem:[%s5489_s2 + $0xe70] sm:$0xff]  ;;  %v816_v61 = vld [vmem:[%s5489_s2 + $0xd60] sm:$0xff]  ;;  %v1192_v43 = vperm.slane %v3369_v7, 7  ;;  %v911_v7 = vld [vmem:[%s5489_s2 + $0x1058] sm:$0xff] }
  0x8d   : > { %1538 = vmatpush.msrb.mxu3 %v890_v45  ;;  %1480 = vmatpush.msrb.mxu0 %v790_v46  ;;  %v848_v62 = vld [vmem:[%s5489_s2 + $0xe60] sm:$0xff]  ;;  %v882_v63 = vld [vmem:[%s5489_s2 + $0xf70] sm:$0xff] }
  0x8e   : > { %1500 = vmatpush.msrb.mxu1 %v822_v47  ;;  %1520 = vmatpush.msrb.mxu2 %v854_v48  ;;  %v782_v1 = vld [vmem:[%s5489_s2 + $0xc50] sm:$0xff]  ;;  %v880_v6 = vld [vmem:[%s5489_s2 + $0xf60] sm:$0xff] }
  0x8f   : > { %1539 = vmatpush.msrb.mxu3 %v888_v49  ;;  %1481 = vmatpush.msrb.mxu0 %v788_v50  ;;  %v814_v4 = vld [vmem:[%s5489_s2 + $0xd50] sm:$0xff]  ;;  %v780_v8 = vld [vmem:[%s5489_s2 + $0xc40] sm:$0xff] }
  0x90   : > { %1501 = vmatpush.msrb.mxu1 %v820_v51  ;;  %1521 = vmatpush.msrb.mxu2 %v852_v52  ;;  %v846_v5 = vld [vmem:[%s5489_s2 + $0xe50] sm:$0xff]  ;;  %v812_v9 = vld [vmem:[%s5489_s2 + $0xd40] sm:$0xff] }
  0x91   : > { %1540 = vmatpush.msrb.mxu3 %v886_v54  ;;  %1482 = vmatpush.msrb.mxu0 %v786_v55  ;;  %v844_v10 = vld [vmem:[%s5489_s2 + $0xe40] sm:$0xff]  ;;  %v878_v11 = vld [vmem:[%s5489_s2 + $0xf50] sm:$0xff] }
  0x92   : > { %1502 = vmatpush.msrb.mxu1 %v818_v56  ;;  %1522 = vmatpush.msrb.mxu2 %v850_v57  ;;  %v778_v12 = vld [vmem:[%s5489_s2 + $0xc30] sm:$0xff]  ;;  %v876_v18 = vld [vmem:[%s5489_s2 + $0xf40] sm:$0xff] }
  0x93   : > { %1541 = vmatpush.msrb.mxu3 %v884_v58  ;;  %1483 = vmatpush.msrb.mxu0 %v784_v59  ;;  %v810_v13 = vld [vmem:[%s5489_s2 + $0xd30] sm:$0xff]  ;;  %v776_v19 = vld [vmem:[%s5489_s2 + $0xc20] sm:$0xff] }
  0x94   : > { %1503 = vmatpush.msrb.mxu1 %v816_v61  ;;  %1523 = vmatpush.msrb.mxu2 %v848_v62  ;;  %v842_v17 = vld [vmem:[%s5489_s2 + $0xe30] sm:$0xff]  ;;  %v808_v21 = vld [vmem:[%s5489_s2 + $0xd20] sm:$0xff] }
  0x95   : > { %1542 = vmatpush.msrb.mxu3 %v882_v63  ;;  %1484 = vmatpush.msrb.mxu0 %v782_v1  ;;  %v840_v25 = vld [vmem:[%s5489_s2 + $0xe20] sm:$0xff]  ;;  %v874_v27 = vld [vmem:[%s5489_s2 + $0xf30] sm:$0xff] }
  0x96   : > { %1504 = vmatpush.msrb.mxu1 %v814_v4  ;;  %1524 = vmatpush.msrb.mxu2 %v846_v5  ;;  %v774_v28 = vld [vmem:[%s5489_s2 + $0xc10] sm:$0xff]  ;;  %v872_v31 = vld [vmem:[%s5489_s2 + $0xf20] sm:$0xff] }
  0x97   : > { %1543 = vmatpush.msrb.mxu3 %v880_v6  ;;  %1485 = vmatpush.msrb.mxu0 %v780_v8  ;;  %v806_v29 = vld [vmem:[%s5489_s2 + $0xd10] sm:$0xff]  ;;  %v772_v32 = vld [vmem:[%s5489_s2 + $0xc00] sm:$0xff] }
  0x98   : > { %1505 = vmatpush.msrb.mxu1 %v812_v9  ;;  %1525 = vmatpush.msrb.mxu2 %v844_v10  ;;  %v838_v30 = vld [vmem:[%s5489_s2 + $0xe10] sm:$0xff]  ;;  %v804_v33 = vld [vmem:[%s5489_s2 + $0xd00] sm:$0xff] }
  0x99   : > { %1544 = vmatpush.msrb.mxu3 %v878_v11  ;;  %1486 = vmatpush.msrb.mxu0 %v778_v12  ;;  %v836_v34 = vld [vmem:[%s5489_s2 + $0xe00] sm:$0xff]  ;;  %v870_v35 = vld [vmem:[%s5489_s2 + $0xf10] sm:$0xff] }
  0x9a   : > { %1506 = vmatpush.msrb.mxu1 %v810_v13  ;;  %1526 = vmatpush.msrb.mxu2 %v842_v17  ;;  %v930_v38 = vld [vmem:[%s5489_s2 + $0x10f0] sm:$0xff]  ;;  %v868_v41 = vld [vmem:[%s5489_s2 + $0xf00] sm:$0xff] }
  0x9b   : > { %1545 = vmatpush.msrb.mxu3 %v876_v18  ;;  %1487 = vmatpush.msrb.mxu0 %v776_v19  ;;  %v962_v39 = vld [vmem:[%s5489_s2 + $0x11f0] sm:$0xff]  ;;  %v928_v44 = vld [vmem:[%s5489_s2 + $0x10e0] sm:$0xff] }
  0x9c   : > { %1507 = vmatpush.msrb.mxu1 %v808_v21  ;;  %1527 = vmatpush.msrb.mxu2 %v840_v25  ;;  %v994_v40 = vld [vmem:[%s5489_s2 + $0x12f0] sm:$0xff]  ;;  %v960_v45 = vld [vmem:[%s5489_s2 + $0x11e0] sm:$0xff] }
  0x9d   : > { %1546 = vmatpush.msrb.mxu3 %v874_v27  ;;  %1488 = vmatpush.msrb.mxu0 %v774_v28  ;;  %v992_v46 = vld [vmem:[%s5489_s2 + $0x12e0] sm:$0xff]  ;;  %v1026_v47 = vld [vmem:[%s5489_s2 + $0x13f0] sm:$0xff] }
  0x9e   : > { %1508 = vmatpush.msrb.mxu1 %v806_v29  ;;  %1528 = vmatpush.msrb.mxu2 %v838_v30  ;;  %v926_v48 = vld [vmem:[%s5489_s2 + $0x10d0] sm:$0xff]  ;;  %v1024_v51 = vld [vmem:[%s5489_s2 + $0x13e0] sm:$0xff] }
  0x9f   : > { %1547 = vmatpush.msrb.mxu3 %v872_v31  ;;  %1489 = vmatpush.msrb.mxu0 %v772_v32  ;;  %v958_v49 = vld [vmem:[%s5489_s2 + $0x11d0] sm:$0xff]  ;;  %v924_v52 = vld [vmem:[%s5489_s2 + $0x10c0] sm:$0xff] }
  0xa0   : > { %1509 = vmatpush.msrb.mxu1 %v804_v33  ;;  %1529 = vmatpush.msrb.mxu2 %v836_v34  ;;  %v990_v50 = vld [vmem:[%s5489_s2 + $0x12d0] sm:$0xff]  ;;  %v956_v54 = vld [vmem:[%s5489_s2 + $0x11c0] sm:$0xff] }
  0xa1   : > { %1548 = vmatpush.msrb.mxu3 %v870_v35  ;;  %1490 = vmatmul.f32.vlgmr.msrb.gmra.mxu0 %v1189_v36  ;;  %v988_v55 = vld [vmem:[%s5489_s2 + $0x12c0] sm:$0xff]  ;;  %v1022_v56 = vld [vmem:[%s5489_s2 + $0x13d0] sm:$0xff] }
  0xa2   : > { %1530 = vmatmul.f32.vlgmr.msrb.gmra.mxu2 %v1191_v37  ;;  %1554 = vmatpush.msra.mxu0 %v930_v38  ;;  %v922_v57 = vld [vmem:[%s5489_s2 + $0x10b0] sm:$0xff]  ;;  %v1020_v61 = vld [vmem:[%s5489_s2 + $0x13c0] sm:$0xff] }
  0xa3   : > { %1574 = vmatpush.msra.mxu1 %v962_v39  ;;  %1594 = vmatpush.msra.mxu2 %v994_v40  ;;  %v954_v58 = vld [vmem:[%s5489_s2 + $0x11b0] sm:$0xff]  ;;  %v920_v62 = vld [vmem:[%s5489_s2 + $0x10a0] sm:$0xff] }
  0xa4   : > { %1549 = vmatpush.msrb.mxu3 %v868_v41  ;;  %1510 = vmatmul.f32.vlgmr.msrb.gmra.mxu1 %v1190_v42  ;;  %v986_v59 = vld [vmem:[%s5489_s2 + $0x12b0] sm:$0xff]  ;;  %v952_v63 = vld [vmem:[%s5489_s2 + $0x11a0] sm:$0xff] }
  0xa5   : > { %1550 = vmatmul.f32.vlgmr.msrb.gmra.mxu3 %v1192_v43  ;;  %1555 = vmatpush.msra.mxu0 %v928_v44  ;;  %v984_v1 = vld [vmem:[%s5489_s2 + $0x12a0] sm:$0xff]  ;;  %v1018_v4 = vld [vmem:[%s5489_s2 + $0x13b0] sm:$0xff] }
  0xa6   : > { %1575 = vmatpush.msra.mxu1 %v960_v45  ;;  %1595 = vmatpush.msra.mxu2 %v992_v46  ;;  %v918_v5 = vld [vmem:[%s5489_s2 + $0x1090] sm:$0xff]  ;;  %v1016_v9 = vld [vmem:[%s5489_s2 + $0x13a0] sm:$0xff] }
  0xa7   : > { %1614 = vmatpush.msra.mxu3 %v1026_v47  ;;  %1556 = vmatpush.msra.mxu0 %v926_v48  ;;  %v950_v6 = vld [vmem:[%s5489_s2 + $0x1190] sm:$0xff]  ;;  %v916_v10 = vld [vmem:[%s5489_s2 + $0x1080] sm:$0xff] }
  0xa8   : > { %1576 = vmatpush.msra.mxu1 %v958_v49  ;;  %1596 = vmatpush.msra.mxu2 %v990_v50  ;;  %v982_v8 = vld [vmem:[%s5489_s2 + $0x1290] sm:$0xff]  ;;  %v948_v11 = vld [vmem:[%s5489_s2 + $0x1180] sm:$0xff] }
  0xa9   : > { %1615 = vmatpush.msra.mxu3 %v1024_v51  ;;  %1557 = vmatpush.msra.mxu0 %v924_v52  ;;  %v980_v12 = vld [vmem:[%s5489_s2 + $0x1280] sm:$0xff]  ;;  %v1014_v13 = vld [vmem:[%s5489_s2 + $0x1390] sm:$0xff] }
  0xaa   : > { %1577 = vmatpush.msra.mxu1 %v956_v54  ;;  %1597 = vmatpush.msra.mxu2 %v988_v55  ;;  %v914_v17 = vld [vmem:[%s5489_s2 + $0x1070] sm:$0xff]  ;;  %v1012_v21 = vld [vmem:[%s5489_s2 + $0x1380] sm:$0xff] }
  0xab   : > { %1616 = vmatpush.msra.mxu3 %v1022_v56  ;;  %1558 = vmatpush.msra.mxu0 %v922_v57  ;;  %v946_v18 = vld [vmem:[%s5489_s2 + $0x1170] sm:$0xff]  ;;  %v912_v25 = vld [vmem:[%s5489_s2 + $0x1060] sm:$0xff] }
  0xac   : > { %1578 = vmatpush.msra.mxu1 %v954_v58  ;;  %1598 = vmatpush.msra.mxu2 %v986_v59  ;;  %v978_v19 = vld [vmem:[%s5489_s2 + $0x1270] sm:$0xff]  ;;  %v944_v27 = vld [vmem:[%s5489_s2 + $0x1160] sm:$0xff] }
  0xad   : > { %1617 = vmatpush.msra.mxu3 %v1020_v61  ;;  %1559 = vmatpush.msra.mxu0 %v920_v62  ;;  %v976_v28 = vld [vmem:[%s5489_s2 + $0x1260] sm:$0xff]  ;;  %v1010_v29 = vld [vmem:[%s5489_s2 + $0x1370] sm:$0xff] }
  0xae   : > { %1579 = vmatpush.msra.mxu1 %v952_v63  ;;  %1599 = vmatpush.msra.mxu2 %v984_v1  ;;  %v910_v30 = vld [vmem:[%s5489_s2 + $0x1050] sm:$0xff]  ;;  %v1008_v33 = vld [vmem:[%s5489_s2 + $0x1360] sm:$0xff] }
  0xaf   : > { %1618 = vmatpush.msra.mxu3 %v1018_v4  ;;  %1560 = vmatpush.msra.mxu0 %v918_v5  ;;  %v942_v31 = vld [vmem:[%s5489_s2 + $0x1150] sm:$0xff]  ;;  %v908_v34 = vld [vmem:[%s5489_s2 + $0x1040] sm:$0xff] }
  0xb0   : > { %1580 = vmatpush.msra.mxu1 %v950_v6  ;;  %1600 = vmatpush.msra.mxu2 %v982_v8  ;;  %v974_v32 = vld [vmem:[%s5489_s2 + $0x1250] sm:$0xff]  ;;  %v940_v35 = vld [vmem:[%s5489_s2 + $0x1140] sm:$0xff] }
  0xb1   : > { %1619 = vmatpush.msra.mxu3 %v1016_v9  ;;  %1561 = vmatpush.msra.mxu0 %v916_v10  ;;  %v972_v38 = vld [vmem:[%s5489_s2 + $0x1240] sm:$0xff]  ;;  %v1006_v39 = vld [vmem:[%s5489_s2 + $0x1350] sm:$0xff] }
  0xb2   : > { %1581 = vmatpush.msra.mxu1 %v948_v11  ;;  %1601 = vmatpush.msra.mxu2 %v980_v12  ;;  %v906_v40 = vld [vmem:[%s5489_s2 + $0x1030] sm:$0xff]  ;;  %v1004_v45 = vld [vmem:[%s5489_s2 + $0x1340] sm:$0xff] }
  0xb3   : > { %1620 = vmatpush.msra.mxu3 %v1014_v13  ;;  %1562 = vmatpush.msra.mxu0 %v914_v17  ;;  %v938_v41 = vld [vmem:[%s5489_s2 + $0x1130] sm:$0xff]  ;;  %v904_v46 = vld [vmem:[%s5489_s2 + $0x1020] sm:$0xff] }
  0xb4   : > { %1582 = vmatpush.msra.mxu1 %v946_v18  ;;  %1602 = vmatpush.msra.mxu2 %v978_v19  ;;  %v970_v44 = vld [vmem:[%s5489_s2 + $0x1230] sm:$0xff]  ;;  %v936_v47 = vld [vmem:[%s5489_s2 + $0x1120] sm:$0xff] }
  0xb5   : > { %1621 = vmatpush.msra.mxu3 %v1012_v21  ;;  %1563 = vmatpush.msra.mxu0 %v912_v25  ;;  %v968_v48 = vld [vmem:[%s5489_s2 + $0x1220] sm:$0xff]  ;;  %v1002_v49 = vld [vmem:[%s5489_s2 + $0x1330] sm:$0xff] }
  0xb6   : > { %1583 = vmatpush.msra.mxu1 %v944_v27  ;;  %1603 = vmatpush.msra.mxu2 %v976_v28  ;;  %v902_v50 = vld [vmem:[%s5489_s2 + $0x1010] sm:$0xff]  ;;  %v1000_v55 = vld [vmem:[%s5489_s2 + $0x1320] sm:$0xff] }
  0xb7   : > { %1622 = vmatpush.msra.mxu3 %v1010_v29  ;;  %1564 = vmatpush.msra.mxu0 %v910_v30  ;;  %v934_v51 = vld [vmem:[%s5489_s2 + $0x1110] sm:$0xff]  ;;  %v900_v56 = vld [vmem:[%s5489_s2 + $0x1000] sm:$0xff] }
  0xb8   : > { %1584 = vmatpush.msra.mxu1 %v942_v31  ;;  %1604 = vmatpush.msra.mxu2 %v974_v32  ;;  %v3780_v52 = vld [vmem:[%s3117_s15 + $0x10] sm:$0xff]  ;;  %v932_v57 = vld [vmem:[%s5489_s2 + $0x1100] sm:$0xff] }
  0xb9   : > { %1623 = vmatpush.msra.mxu3 %v1008_v33  ;;  %1565 = vmatpush.msra.mxu0 %v908_v34  ;;  %v966_v54 = vld [vmem:[%s5489_s2 + $0x1210] sm:$0xff]  ;;  %v964_v58 = vld [vmem:[%s5489_s2 + $0x1200] sm:$0xff]  ;;  %v1193_v61 = vperm.slane %v3780_v52, 0  ;;  %v1195_v62 = vperm.slane %v3780_v52, 2  ;;  %v1194_v6 = vperm.slane %v3780_v52, 1  ;;  %v1196_v8 = vperm.slane %v3780_v52, 3 }
  0xba   : > { %1585 = vmatpush.msra.mxu1 %v940_v35  ;;  %1605 = vmatpush.msra.mxu2 %v972_v38  ;;  %v998_v59 = vld [vmem:[%s5489_s2 + $0x1310] sm:$0xff]  ;;  %v996_v5 = vld [vmem:[%s5489_s2 + $0x1300] sm:$0xff] }
  0xbb   : > { %1624 = vmatpush.msra.mxu3 %v1006_v39  ;;  %1566 = vmatpush.msra.mxu0 %v906_v40  ;;  %v1058_v63 = vld [vmem:[%s5489_s2 + $0x14f0] sm:$0xff]  ;;  %v1056_v9 = vld [vmem:[%s5489_s2 + $0x14e0] sm:$0xff] }
  0xbc   : > { %1586 = vmatpush.msra.mxu1 %v938_v41  ;;  %1606 = vmatpush.msra.mxu2 %v970_v44  ;;  %v1090_v1 = vld [vmem:[%s5489_s2 + $0x15f0] sm:$0xff]  ;;  %v1088_v10 = vld [vmem:[%s5489_s2 + $0x15e0] sm:$0xff] }
  0xbd   : > { %1625 = vmatpush.msra.mxu3 %v1004_v45  ;;  %1567 = vmatpush.msra.mxu0 %v904_v46  ;;  %v1122_v4 = vld [vmem:[%s5489_s2 + $0x16f0] sm:$0xff]  ;;  %v1120_v11 = vld [vmem:[%s5489_s2 + $0x16e0] sm:$0xff] }
  0xbe   : > { %1587 = vmatpush.msra.mxu1 %v936_v47  ;;  %1607 = vmatpush.msra.mxu2 %v968_v48  ;;  %v1154_v12 = vld [vmem:[%s5489_s2 + $0x17f0] sm:$0xff]  ;;  %v1152_v19 = vld [vmem:[%s5489_s2 + $0x17e0] sm:$0xff] }
  0xbf   : > { %1626 = vmatpush.msra.mxu3 %v1002_v49  ;;  %1568 = vmatpush.msra.mxu0 %v902_v50  ;;  %v1054_v13 = vld [vmem:[%s5489_s2 + $0x14d0] sm:$0xff]  ;;  %v1052_v21 = vld [vmem:[%s5489_s2 + $0x14c0] sm:$0xff] }
  0xc0   : > { %1588 = vmatpush.msra.mxu1 %v934_v51  ;;  %1608 = vmatpush.msra.mxu2 %v966_v54  ;;  %v1086_v17 = vld [vmem:[%s5489_s2 + $0x15d0] sm:$0xff]  ;;  %v1084_v25 = vld [vmem:[%s5489_s2 + $0x15c0] sm:$0xff] }
  0xc1   : > { %1627 = vmatpush.msra.mxu3 %v1000_v55  ;;  %1569 = vmatpush.msra.mxu0 %v900_v56  ;;  %v1118_v18 = vld [vmem:[%s5489_s2 + $0x16d0] sm:$0xff]  ;;  %v1116_v27 = vld [vmem:[%s5489_s2 + $0x16c0] sm:$0xff] }
  0xc2   : > { %1589 = vmatpush.msra.mxu1 %v932_v57  ;;  %1609 = vmatpush.msra.mxu2 %v964_v58  ;;  %v1150_v28 = vld [vmem:[%s5489_s2 + $0x17d0] sm:$0xff]  ;;  %v1148_v32 = vld [vmem:[%s5489_s2 + $0x17c0] sm:$0xff] }
  0xc3   : > { %1628 = vmatpush.msra.mxu3 %v998_v59  ;;  %1570 = vmatmul.f32.vlgmr.msra.gmra.mxu0 %v1193_v61  ;;  %v1050_v29 = vld [vmem:[%s5489_s2 + $0x14b0] sm:$0xff]  ;;  %v1048_v33 = vld [vmem:[%s5489_s2 + $0x14a0] sm:$0xff] }
  0xc4   : > { %1610 = vmatmul.f32.vlgmr.msra.gmra.mxu2 %v1195_v62  ;;  %1634 = vmatpush.msrb.mxu0 %v1058_v63  ;;  %v1082_v30 = vld [vmem:[%s5489_s2 + $0x15b0] sm:$0xff]  ;;  %v1080_v34 = vld [vmem:[%s5489_s2 + $0x15a0] sm:$0xff] }
  0xc5   : > { %1654 = vmatpush.msrb.mxu1 %v1090_v1  ;;  %1674 = vmatpush.msrb.mxu2 %v1122_v4  ;;  %v1114_v31 = vld [vmem:[%s5489_s2 + $0x16b0] sm:$0xff]  ;;  %v1112_v35 = vld [vmem:[%s5489_s2 + $0x16a0] sm:$0xff] }
  0xc6   : > { %1629 = vmatpush.msra.mxu3 %v996_v5  ;;  %1590 = vmatmul.f32.vlgmr.msra.gmra.mxu1 %v1194_v6  ;;  %v1146_v38 = vld [vmem:[%s5489_s2 + $0x17b0] sm:$0xff]  ;;  %v1144_v44 = vld [vmem:[%s5489_s2 + $0x17a0] sm:$0xff] }
  0xc7   : > { %1630 = vmatmul.f32.vlgmr.msra.gmra.mxu3 %v1196_v8  ;;  %1635 = vmatpush.msrb.mxu0 %v1056_v9  ;;  %v1046_v39 = vld [vmem:[%s5489_s2 + $0x1490] sm:$0xff]  ;;  %v1044_v45 = vld [vmem:[%s5489_s2 + $0x1480] sm:$0xff] }
  0xc8   : > { %1655 = vmatpush.msrb.mxu1 %v1088_v10  ;;  %1675 = vmatpush.msrb.mxu2 %v1120_v11  ;;  %v1078_v40 = vld [vmem:[%s5489_s2 + $0x1590] sm:$0xff]  ;;  %v1076_v46 = vld [vmem:[%s5489_s2 + $0x1580] sm:$0xff] }
  0xc9   : > { %1694 = vmatpush.msrb.mxu3 %v1154_v12  ;;  %1636 = vmatpush.msrb.mxu0 %v1054_v13  ;;  %v1110_v41 = vld [vmem:[%s5489_s2 + $0x1690] sm:$0xff]  ;;  %v1108_v47 = vld [vmem:[%s5489_s2 + $0x1680] sm:$0xff] }
  0xca   : > { %1656 = vmatpush.msrb.mxu1 %v1086_v17  ;;  %1676 = vmatpush.msrb.mxu2 %v1118_v18  ;;  %v1142_v48 = vld [vmem:[%s5489_s2 + $0x1790] sm:$0xff]  ;;  %v1140_v54 = vld [vmem:[%s5489_s2 + $0x1780] sm:$0xff] }
  0xcb   : > { %1695 = vmatpush.msrb.mxu3 %v1152_v19  ;;  %1637 = vmatpush.msrb.mxu0 %v1052_v21  ;;  %v1042_v49 = vld [vmem:[%s5489_s2 + $0x1470] sm:$0xff]  ;;  %v1040_v55 = vld [vmem:[%s5489_s2 + $0x1460] sm:$0xff] }
  0xcc   : > { %1657 = vmatpush.msrb.mxu1 %v1084_v25  ;;  %1677 = vmatpush.msrb.mxu2 %v1116_v27  ;;  %v1074_v50 = vld [vmem:[%s5489_s2 + $0x1570] sm:$0xff]  ;;  %v1072_v56 = vld [vmem:[%s5489_s2 + $0x1560] sm:$0xff] }
  0xcd   : > { %1696 = vmatpush.msrb.mxu3 %v1150_v28  ;;  %1638 = vmatpush.msrb.mxu0 %v1050_v29  ;;  %v1106_v51 = vld [vmem:[%s5489_s2 + $0x1670] sm:$0xff]  ;;  %v1104_v57 = vld [vmem:[%s5489_s2 + $0x1660] sm:$0xff] }
  0xce   : > { %1658 = vmatpush.msrb.mxu1 %v1082_v30  ;;  %1678 = vmatpush.msrb.mxu2 %v1114_v31  ;;  %v1138_v58 = vld [vmem:[%s5489_s2 + $0x1770] sm:$0xff]  ;;  %v1136_v4 = vld [vmem:[%s5489_s2 + $0x1760] sm:$0xff] }
  0xcf   : > { %1697 = vmatpush.msrb.mxu3 %v1148_v32  ;;  %1639 = vmatpush.msrb.mxu0 %v1048_v33  ;;  %v1038_v59 = vld [vmem:[%s5489_s2 + $0x1450] sm:$0xff]  ;;  %v1036_v5 = vld [vmem:[%s5489_s2 + $0x1440] sm:$0xff] }
  0xd0   : > { %1659 = vmatpush.msrb.mxu1 %v1080_v34  ;;  %1679 = vmatpush.msrb.mxu2 %v1112_v35  ;;  %v1070_v63 = vld [vmem:[%s5489_s2 + $0x1550] sm:$0xff]  ;;  %v1068_v9 = vld [vmem:[%s5489_s2 + $0x1540] sm:$0xff] }
  0xd1   : > { %1698 = vmatpush.msrb.mxu3 %v1146_v38  ;;  %1640 = vmatpush.msrb.mxu0 %v1046_v39  ;;  %v1102_v1 = vld [vmem:[%s5489_s2 + $0x1650] sm:$0xff]  ;;  %v1100_v10 = vld [vmem:[%s5489_s2 + $0x1640] sm:$0xff]  ;;  %v1197_v38 = vperm.slane %v3780_v52, 4  ;;  %v1199_v39 = vperm.slane %v3780_v52, 6 }
  0xd2   : > { %1660 = vmatpush.msrb.mxu1 %v1078_v40  ;;  %1680 = vmatpush.msrb.mxu2 %v1110_v41  ;;  %v1134_v11 = vld [vmem:[%s5489_s2 + $0x1750] sm:$0xff]  ;;  %v1132_v18 = vld [vmem:[%s5489_s2 + $0x1740] sm:$0xff]  ;;  %v419_v41 = vld [vmem:[%s5489_s2 + $0xf8] sm:$0xff] }
  0xd3   : > { %1699 = vmatpush.msrb.mxu3 %v1144_v44  ;;  %1641 = vmatpush.msrb.mxu0 %v1044_v45  ;;  %v1034_v12 = vld [vmem:[%s5489_s2 + $0x1430] sm:$0xff]  ;;  %v1032_v19 = vld [vmem:[%s5489_s2 + $0x1420] sm:$0xff]  ;;  %v451_v44 = vld [vmem:[%s5489_s2 + $0x1f8] sm:$0xff] }
  0xd4   : > { %1661 = vmatpush.msrb.mxu1 %v1076_v46  ;;  %1681 = vmatpush.msrb.mxu2 %v1108_v47  ;;  %v1066_v13 = vld [vmem:[%s5489_s2 + $0x1530] sm:$0xff]  ;;  %v1064_v21 = vld [vmem:[%s5489_s2 + $0x1520] sm:$0xff]  ;;  %v1198_v46 = vperm.slane %v3780_v52, 5  ;;  %v1200_v47 = vperm.slane %v3780_v52, 7 }
  0xd5   : > { %1700 = vmatpush.msrb.mxu3 %v1142_v48  ;;  %1642 = vmatpush.msrb.mxu0 %v1042_v49  ;;  %v1098_v17 = vld [vmem:[%s5489_s2 + $0x1630] sm:$0xff]  ;;  %v1096_v25 = vld [vmem:[%s5489_s2 + $0x1620] sm:$0xff]  ;;  %v417_v49 = vld [vmem:[%s5489_s2 + $0xe8] sm:$0xff] }
  0xd6   : > { %1662 = vmatpush.msrb.mxu1 %v1074_v50  ;;  %1682 = vmatpush.msrb.mxu2 %v1106_v51  ;;  %v1130_v27 = vld [vmem:[%s5489_s2 + $0x1730] sm:$0xff]  ;;  %v1128_v31 = vld [vmem:[%s5489_s2 + $0x1720] sm:$0xff]  ;;  %v449_v50 = vld [vmem:[%s5489_s2 + $0x1e8] sm:$0xff] }
  0xd7   : > { %1701 = vmatpush.msrb.mxu3 %v1140_v54  ;;  %1643 = vmatpush.msrb.mxu0 %v1040_v55  ;;  %v1030_v28 = vld [vmem:[%s5489_s2 + $0x1410] sm:$0xff]  ;;  %v1028_v32 = vld [vmem:[%s5489_s2 + $0x1400] sm:$0xff]  ;;  %v483_v51 = vld [vmem:[%s5489_s2 + $0x2f8] sm:$0xff] }
  0xd8   : > { %1663 = vmatpush.msrb.mxu1 %v1072_v56  ;;  %1683 = vmatpush.msrb.mxu2 %v1104_v57  ;;  %v1062_v29 = vld [vmem:[%s5489_s2 + $0x1510] sm:$0xff]  ;;  %v1060_v33 = vld [vmem:[%s5489_s2 + $0x1500] sm:$0xff]  ;;  %v415_v55 = vld [vmem:[%s5489_s2 + $0xd8] sm:$0xff] }
  0xd9   : > { %1702 = vmatpush.msrb.mxu3 %v1138_v58  ;;  %1644 = vmatpush.msrb.mxu0 %v1038_v59  ;;  %v1094_v30 = vld [vmem:[%s5489_s2 + $0x1610] sm:$0xff]  ;;  %v1092_v34 = vld [vmem:[%s5489_s2 + $0x1600] sm:$0xff]  ;;  %v447_v56 = vld [vmem:[%s5489_s2 + $0x1d8] sm:$0xff] }
  0xda   : > { %1664 = vmatpush.msrb.mxu1 %v1070_v63  ;;  %1684 = vmatpush.msrb.mxu2 %v1102_v1  ;;  %v1126_v35 = vld [vmem:[%s5489_s2 + $0x1710] sm:$0xff]  ;;  %v1124_v45 = vld [vmem:[%s5489_s2 + $0x1700] sm:$0xff]  ;;  %v481_v57 = vld [vmem:[%s5489_s2 + $0x2e8] sm:$0xff] }
  0xdb   : > { %1703 = vmatpush.msrb.mxu3 %v1136_v4  ;;  %1645 = vmatpush.msrb.mxu0 %v1036_v5  ;;  %v1170_v40 = vld [vmem:[%s5489_s2 + $0x1870] sm:$0xff]  ;;  %v1168_v48 = vld [vmem:[%s5489_s2 + $0x1860] sm:$0xff]  ;;  %v413_v59 = vld [vmem:[%s5489_s2 + $0xc8] sm:$0xff] }
  0xdc   : > { %1665 = vmatpush.msrb.mxu1 %v1068_v9  ;;  %1685 = vmatpush.msrb.mxu2 %v1100_v10  ;;  %v1166_v54 = vld [vmem:[%s5489_s2 + $0x1850] sm:$0xff]  ;;  %v1164_v58 = vld [vmem:[%s5489_s2 + $0x1840] sm:$0xff]  ;;  %v445_v63 = vld [vmem:[%s5489_s2 + $0x1c8] sm:$0xff] }
  0xdd   : > { %1704 = vmatpush.msrb.mxu3 %v1134_v11  ;;  %1646 = vmatpush.msrb.mxu0 %v1034_v12  ;;  %v479_v1 = vld [vmem:[%s5489_s2 + $0x2d8] sm:$0xff]  ;;  %v1162_v4 = vld [vmem:[%s5489_s2 + $0x1830] sm:$0xff]  ;;  %v477_v10 = vld [vmem:[%s5489_s2 + $0x2c8] sm:$0xff] }
  0xde   : > { %1666 = vmatpush.msrb.mxu1 %v1066_v13  ;;  %1686 = vmatpush.msrb.mxu2 %v1098_v17  ;;  %v411_v5 = vld [vmem:[%s5489_s2 + $0xb8] sm:$0xff]  ;;  %v1160_v11 = vld [vmem:[%s5489_s2 + $0x1820] sm:$0xff]  ;;  %v409_v12 = vld [vmem:[%s5489_s2 + $0xa8] sm:$0xff] }
  0xdf   : > { %1705 = vmatpush.msrb.mxu3 %v1132_v18  ;;  %1647 = vmatpush.msrb.mxu0 %v1032_v19  ;;  %v443_v9 = vld [vmem:[%s5489_s2 + $0x1b8] sm:$0xff]  ;;  %v441_v13 = vld [vmem:[%s5489_s2 + $0x1a8] sm:$0xff]  ;;  %v1158_v18 = vld [vmem:[%s5489_s2 + $0x1810] sm:$0xff] }
  0xe0   : > { %1667 = vmatpush.msrb.mxu1 %v1064_v21  ;;  %1687 = vmatpush.msrb.mxu2 %v1096_v25  ;;  %v475_v17 = vld [vmem:[%s5489_s2 + $0x2b8] sm:$0xff]  ;;  %v473_v25 = vld [vmem:[%s5489_s2 + $0x2a8] sm:$0xff] }
  0xe1   : > { %1706 = vmatpush.msrb.mxu3 %v1130_v27  ;;  %1648 = vmatpush.msrb.mxu0 %v1030_v28  ;;  %v407_v19 = vld [vmem:[%s5489_s2 + $0x98] sm:$0xff]  ;;  %v1156_v27 = vld [vmem:[%s5489_s2 + $0x1800] sm:$0xff]  ;;  %v405_v28 = vld [vmem:[%s5489_s2 + $0x88] sm:$0xff] }
  0xe2   : > { %1668 = vmatpush.msrb.mxu1 %v1062_v29  ;;  %1688 = vmatpush.msrb.mxu2 %v1094_v30  ;;  %v439_v21 = vld [vmem:[%s5489_s2 + $0x198] sm:$0xff]  ;;  %v437_v29 = vld [vmem:[%s5489_s2 + $0x188] sm:$0xff] }
  0xe3   : > { %1707 = vmatpush.msrb.mxu3 %v1128_v31  ;;  %1649 = vmatpush.msrb.mxu0 %v1028_v32  ;;  %v471_v30 = vld [vmem:[%s5489_s2 + $0x298] sm:$0xff] }
  0xe4   : > { %1669 = vmatpush.msrb.mxu1 %v1060_v33  ;;  %1689 = vmatpush.msrb.mxu2 %v1092_v34  ;;  %v2540_v31 = vld [vmem:[%s3117_s15 + $0x18] ss:$0 sm:$0xff] }
  0xe5   : > { %1708 = vmatpush.msrb.mxu3 %v1126_v35  ;;  %1650 = vmatmul.f32.vlgmr.msrb.gmra.mxu0 %v1197_v38  ;;  %v403_v32 = vld [vmem:[%s5489_s2 + $0x78] sm:$0xff]  ;;  %v469_v35 = vld [vmem:[%s5489_s2 + $0x288] sm:$0xff] }
  0xe6   : > { %1690 = vmatmul.f32.vlgmr.msrb.gmra.mxu2 %v1199_v39  ;;  %1722 = vmatpush.msra.mxu0 %v1170_v40  ;;  %v515_v33 = vld [vmem:[%s5489_s2 + $0x3f8] sm:$0xff]  ;;  %v401_v40 = vld [vmem:[%s5489_s2 + $0x68] sm:$0xff] }
  0xe7   : > { %1734 = vmatpush.msra.mxu1 %v419_v41  ;;  %1754 = vmatpush.msra.mxu2 %v451_v44  ;;  %v435_v34 = vld [vmem:[%s5489_s2 + $0x178] sm:$0xff]  ;;  %v513_v41 = vld [vmem:[%s5489_s2 + $0x3e8] sm:$0xff] }
  0xe8   : > { %1709 = vmatpush.msrb.mxu3 %v1124_v45  ;;  %1670 = vmatmul.f32.vlgmr.msrb.gmra.mxu1 %v1198_v46  ;;  %v433_v44 = vld [vmem:[%s5489_s2 + $0x168] sm:$0xff]  ;;  %v467_v45 = vld [vmem:[%s5489_s2 + $0x278] sm:$0xff] }
  0xe9   : > { %1710 = vmatmul.f32.vlgmr.msrb.gmra.mxu3 %v1200_v47  ;;  %1723 = vmatpush.msra.mxu0 %v1168_v48  ;;  %v399_v48 = vld [vmem:[%s5489_s2 + $0x58] sm:$0xff] }
  0xea   : > { %1735 = vmatpush.msra.mxu1 %v417_v49  ;;  %1755 = vmatpush.msra.mxu2 %v449_v50  ;;  %v511_v49 = vld [vmem:[%s5489_s2 + $0x3d8] sm:$0xff] }
  0xeb   : > { %1774 = vmatpush.msra.mxu3 %v483_v51  ;;  %1724 = vmatpush.msra.mxu0 %v1166_v54  ;;  %v431_v50 = vld [vmem:[%s5489_s2 + $0x158] sm:$0xff]  ;;  %v465_v51 = vld [vmem:[%s5489_s2 + $0x268] sm:$0xff] }
  0xec   : > { %1736 = vmatpush.msra.mxu1 %v415_v55  ;;  %1756 = vmatpush.msra.mxu2 %v447_v56  ;;  %v397_v54 = vld [vmem:[%s5489_s2 + $0x48] sm:$0xff] }
  0xed   : > { %1775 = vmatpush.msra.mxu3 %v481_v57  ;;  %1725 = vmatpush.msra.mxu0 %v1164_v58  ;;  %v509_v55 = vld [vmem:[%s5489_s2 + $0x3c8] sm:$0xff]  ;;  %v463_v57 = vld [vmem:[%s5489_s2 + $0x258] sm:$0xff] }
  0xee   : > { %1737 = vmatpush.msra.mxu1 %v413_v59  ;;  %1757 = vmatpush.msra.mxu2 %v445_v63  ;;  %v429_v56 = vld [vmem:[%s5489_s2 + $0x148] sm:$0xff]  ;;  %v395_v58 = vld [vmem:[%s5489_s2 + $0x38] sm:$0xff] }
  0xef   : > { %1776 = vmatpush.msra.mxu3 %v479_v1  ;;  %1726 = vmatpush.msra.mxu0 %v1162_v4  ;;  %v507_v59 = vld [vmem:[%s5489_s2 + $0x3b8] sm:$0xff]  ;;  %v461_v1 = vld [vmem:[%s5489_s2 + $0x248] sm:$0xff] }
  0xf0   : > { %1738 = vmatpush.msra.mxu1 %v411_v5  ;;  %1758 = vmatpush.msra.mxu2 %v443_v9  ;;  %v427_v63 = vld [vmem:[%s5489_s2 + $0x138] sm:$0xff]  ;;  %v393_v4 = vld [vmem:[%s5489_s2 + $0x28] sm:$0xff] }
  0xf1   : > { %1777 = vmatpush.msra.mxu3 %v477_v10  ;;  %1727 = vmatpush.msra.mxu0 %v1160_v11  ;;  %v505_v5 = vld [vmem:[%s5489_s2 + $0x3a8] sm:$0xff]  ;;  %v459_v10 = vld [vmem:[%s5489_s2 + $0x238] sm:$0xff] }
  0xf2   : > { %1739 = vmatpush.msra.mxu1 %v409_v12  ;;  %1759 = vmatpush.msra.mxu2 %v441_v13  ;;  %v425_v9 = vld [vmem:[%s5489_s2 + $0x128] sm:$0xff]  ;;  %v391_v11 = vld [vmem:[%s5489_s2 + $0x18] sm:$0xff] }
  0xf3   : > { %1778 = vmatpush.msra.mxu3 %v475_v17  ;;  %1728 = vmatpush.msra.mxu0 %v1158_v18  ;;  %v503_v12 = vld [vmem:[%s5489_s2 + $0x398] sm:$0xff]  ;;  %v457_v17 = vld [vmem:[%s5489_s2 + $0x228] sm:$0xff] }
  0xf4   : > { %1740 = vmatpush.msra.mxu1 %v407_v19  ;;  %1760 = vmatpush.msra.mxu2 %v439_v21  ;;  %v423_v13 = vld [vmem:[%s5489_s2 + $0x118] sm:$0xff]  ;;  %v389_v18 = vld [vmem:[%s5489_s2 + $0x8] sm:$0xff] }
  0xf5   : > { %1779 = vmatpush.msra.mxu3 %v473_v25  ;;  %1729 = vmatpush.msra.mxu0 %v1156_v27  ;;  %v501_v19 = vld [vmem:[%s5489_s2 + $0x388] sm:$0xff]  ;;  %v455_v25 = vld [vmem:[%s5489_s2 + $0x218] sm:$0xff] }
  0xf6   : > { %1741 = vmatpush.msra.mxu1 %v405_v28  ;;  %1761 = vmatpush.msra.mxu2 %v437_v29  ;;  %v421_v21 = vld [vmem:[%s5489_s2 + $0x108] sm:$0xff]  ;;  %v547_v27 = vld [vmem:[%s5489_s2 + $0x4f8] sm:$0xff] }
  0xf7   : > { %1780 = vmatpush.msra.mxu3 %v471_v30  ;;  %2486 = vmatmul.msk.f32.vlgmr.msra.gmra.mxu0 %vm1231_vm0, %v2540_v31  ;;  %v499_v28 = vld [vmem:[%s5489_s2 + $0x378] sm:$0xff]  ;;  %v453_v30 = vld [vmem:[%s5489_s2 + $0x208] sm:$0xff] }
  0xf8   : > { %1742 = vmatpush.msra.mxu1 %v403_v32  ;;  %1794 = vmatpush.msrb.mxu0 %v515_v33  ;;  %v579_v29 = vld [vmem:[%s5489_s2 + $0x5f8] sm:$0xff]  ;;  %v545_v31 = vld [vmem:[%s5489_s2 + $0x4e8] sm:$0xff] }
  0xf9   : > { %1762 = vmatpush.msra.mxu2 %v435_v34  ;;  %1781 = vmatpush.msra.mxu3 %v469_v35  ;;  %v497_v32 = vld [vmem:[%s5489_s2 + $0x368] sm:$0xff]  ;;  %v611_v34 = vld [vmem:[%s5489_s2 + $0x6f8] sm:$0xff] }
  0xfa   : > { %1743 = vmatpush.msra.mxu1 %v401_v40  ;;  %1795 = vmatpush.msrb.mxu0 %v513_v41  ;;  %v577_v33 = vld [vmem:[%s5489_s2 + $0x5e8] sm:$0xff]  ;;  %v543_v35 = vld [vmem:[%s5489_s2 + $0x4d8] sm:$0xff] }
  0xfb   : > { %1763 = vmatpush.msra.mxu2 %v433_v44  ;;  %1782 = vmatpush.msra.mxu3 %v467_v45  ;;  %v495_v40 = vld [vmem:[%s5489_s2 + $0x358] sm:$0xff]  ;;  %v609_v44 = vld [vmem:[%s5489_s2 + $0x6e8] sm:$0xff] }
  0xfc   : > { %1744 = vmatpush.msra.mxu1 %v399_v48  ;;  %1796 = vmatpush.msrb.mxu0 %v511_v49  ;;  %v575_v41 = vld [vmem:[%s5489_s2 + $0x5d8] sm:$0xff]  ;;  %v541_v45 = vld [vmem:[%s5489_s2 + $0x4c8] sm:$0xff] }
  0xfd   : > { %1764 = vmatpush.msra.mxu2 %v431_v50  ;;  %1783 = vmatpush.msra.mxu3 %v465_v51  ;;  %v493_v48 = vld [vmem:[%s5489_s2 + $0x348] sm:$0xff]  ;;  %v607_v50 = vld [vmem:[%s5489_s2 + $0x6d8] sm:$0xff] }
  0xfe   : > { %1745 = vmatpush.msra.mxu1 %v397_v54  ;;  %1797 = vmatpush.msrb.mxu0 %v509_v55  ;;  %v573_v49 = vld [vmem:[%s5489_s2 + $0x5c8] sm:$0xff]  ;;  %v539_v51 = vld [vmem:[%s5489_s2 + $0x4b8] sm:$0xff] }
  0xff   : > { %1765 = vmatpush.msra.mxu2 %v429_v56  ;;  %1784 = vmatpush.msra.mxu3 %v463_v57  ;;  %v491_v54 = vld [vmem:[%s5489_s2 + $0x338] sm:$0xff]  ;;  %v605_v56 = vld [vmem:[%s5489_s2 + $0x6c8] sm:$0xff] }
 0x100   : > { %1746 = vmatpush.msra.mxu1 %v395_v58  ;;  %1798 = vmatpush.msrb.mxu0 %v507_v59  ;;  %v571_v55 = vld [vmem:[%s5489_s2 + $0x5b8] sm:$0xff]  ;;  %v537_v57 = vld [vmem:[%s5489_s2 + $0x4a8] sm:$0xff] }
 0x101   : > { %1766 = vmatpush.msra.mxu2 %v427_v63  ;;  %1785 = vmatpush.msra.mxu3 %v461_v1  ;;  %v489_v58 = vld [vmem:[%s5489_s2 + $0x328] sm:$0xff]  ;;  %v603_v63 = vld [vmem:[%s5489_s2 + $0x6b8] sm:$0xff] }
 0x102   : > { %1747 = vmatpush.msra.mxu1 %v393_v4  ;;  %1799 = vmatpush.msrb.mxu0 %v505_v5  ;;  %v569_v59 = vld [vmem:[%s5489_s2 + $0x5a8] sm:$0xff]  ;;  %v535_v1 = vld [vmem:[%s5489_s2 + $0x498] sm:$0xff] }
 0x103   : > { %1767 = vmatpush.msra.mxu2 %v425_v9  ;;  %1786 = vmatpush.msra.mxu3 %v459_v10  ;;  %v487_v4 = vld [vmem:[%s5489_s2 + $0x318] sm:$0xff]  ;;  %v601_v9 = vld [vmem:[%s5489_s2 + $0x6a8] sm:$0xff] }
 0x104   : > { %1748 = vmatpush.msra.mxu1 %v391_v11  ;;  %1800 = vmatpush.msrb.mxu0 %v503_v12  ;;  %v567_v5 = vld [vmem:[%s5489_s2 + $0x598] sm:$0xff]  ;;  %v533_v10 = vld [vmem:[%s5489_s2 + $0x488] sm:$0xff] }
 0x105   : > { %1768 = vmatpush.msra.mxu2 %v423_v13  ;;  %1787 = vmatpush.msra.mxu3 %v457_v17  ;;  %v485_v11 = vld [vmem:[%s5489_s2 + $0x308] sm:$0xff]  ;;  %v599_v13 = vld [vmem:[%s5489_s2 + $0x698] sm:$0xff] }
 0x106   : > { %1749 = vmatpush.msra.mxu1 %v389_v18  ;;  %1801 = vmatpush.msrb.mxu0 %v501_v19  ;;  %v565_v12 = vld [vmem:[%s5489_s2 + $0x588] sm:$0xff]  ;;  %v643_v17 = vld [vmem:[%s5489_s2 + $0x7f8] sm:$0xff] }
 0x107   : > { %1769 = vmatpush.msra.mxu2 %v421_v21  ;;  %1788 = vmatpush.msra.mxu3 %v455_v25  ;;  %v531_v18 = vld [vmem:[%s5489_s2 + $0x478] sm:$0xff]  ;;  %v597_v21 = vld [vmem:[%s5489_s2 + $0x688] sm:$0xff] }
 0x108   : > { %1814 = vmatpush.msrb.mxu1 %v547_v27  ;;  %1802 = vmatpush.msrb.mxu0 %v499_v28  ;;  %v563_v19 = vld [vmem:[%s5489_s2 + $0x578] sm:$0xff]  ;;  %v641_v25 = vld [vmem:[%s5489_s2 + $0x7e8] sm:$0xff] }
 0x109   : > { %1834 = vmatpush.msrb.mxu2 %v579_v29  ;;  %1789 = vmatpush.msra.mxu3 %v453_v30  ;;  %v529_v27 = vld [vmem:[%s5489_s2 + $0x468] sm:$0xff]  ;;  %v595_v29 = vld [vmem:[%s5489_s2 + $0x678] sm:$0xff] }
 0x10a   : > { %1815 = vmatpush.msrb.mxu1 %v545_v31  ;;  %1803 = vmatpush.msrb.mxu0 %v497_v32  ;;  %v561_v28 = vld [vmem:[%s5489_s2 + $0x568] sm:$0xff]  ;;  %v639_v30 = vld [vmem:[%s5489_s2 + $0x7d8] sm:$0xff] }
 0x10b   : > { %1835 = vmatpush.msrb.mxu2 %v577_v33  ;;  %1854 = vmatpush.msrb.mxu3 %v611_v34  ;;  %v527_v31 = vld [vmem:[%s5489_s2 + $0x458] sm:$0xff]  ;;  %v593_v33 = vld [vmem:[%s5489_s2 + $0x668] sm:$0xff] }
 0x10c   : > { %1816 = vmatpush.msrb.mxu1 %v543_v35  ;;  %1804 = vmatpush.msrb.mxu0 %v495_v40  ;;  %v559_v32 = vld [vmem:[%s5489_s2 + $0x558] sm:$0xff]  ;;  %v637_v34 = vld [vmem:[%s5489_s2 + $0x7c8] sm:$0xff] }
 0x10d   : > { %1836 = vmatpush.msrb.mxu2 %v575_v41  ;;  %1855 = vmatpush.msrb.mxu3 %v609_v44  ;;  %v525_v35 = vld [vmem:[%s5489_s2 + $0x448] sm:$0xff]  ;;  %v591_v41 = vld [vmem:[%s5489_s2 + $0x658] sm:$0xff] }
 0x10e   : > { %1817 = vmatpush.msrb.mxu1 %v541_v45  ;;  %1805 = vmatpush.msrb.mxu0 %v493_v48  ;;  %v557_v40 = vld [vmem:[%s5489_s2 + $0x548] sm:$0xff]  ;;  %v635_v44 = vld [vmem:[%s5489_s2 + $0x7b8] sm:$0xff] }
 0x10f   : > { %1837 = vmatpush.msrb.mxu2 %v573_v49  ;;  %1856 = vmatpush.msrb.mxu3 %v607_v50  ;;  %v523_v45 = vld [vmem:[%s5489_s2 + $0x438] sm:$0xff]  ;;  %v589_v49 = vld [vmem:[%s5489_s2 + $0x648] sm:$0xff] }
 0x110   : > { %1818 = vmatpush.msrb.mxu1 %v539_v51  ;;  %1806 = vmatpush.msrb.mxu0 %v491_v54  ;;  %v555_v48 = vld [vmem:[%s5489_s2 + $0x538] sm:$0xff]  ;;  %v633_v50 = vld [vmem:[%s5489_s2 + $0x7a8] sm:$0xff] }
 0x111   : > { %1838 = vmatpush.msrb.mxu2 %v571_v55  ;;  %1857 = vmatpush.msrb.mxu3 %v605_v56  ;;  %v521_v51 = vld [vmem:[%s5489_s2 + $0x428] sm:$0xff]  ;;  %v1172_v55 = vld [vmem:[%s5471_s3] sm:$0x3]  ;;  %v587_v56 = vld [vmem:[%s5489_s2 + $0x638] sm:$0xff] }
 0x112   : > { %1819 = vmatpush.msrb.mxu1 %v537_v57  ;;  %1807 = vmatpush.msrb.mxu0 %v489_v58  ;;  %v553_v54 = vld [vmem:[%s5489_s2 + $0x528] sm:$0xff]  ;;  %v631_v57 = vld [vmem:[%s5489_s2 + $0x798] sm:$0xff] }
 0x113   : > { %1839 = vmatpush.msrb.mxu2 %v569_v59  ;;  %1858 = vmatpush.msrb.mxu3 %v603_v63  ;;  %v519_v58 = vld [vmem:[%s5489_s2 + $0x418] sm:$0xff]  ;;  %v585_v63 = vld [vmem:[%s5489_s2 + $0x628] sm:$0xff] }
 0x114   : > { %1820 = vmatpush.msrb.mxu1 %v535_v1  ;;  %1808 = vmatpush.msrb.mxu0 %v487_v4  ;;  %v551_v59 = vld [vmem:[%s5489_s2 + $0x518] sm:$0xff]  ;;  %v1227_v1 = vperm.slane %v1172_v55, 0  ;;  %v629_v4 = vld [vmem:[%s5489_s2 + $0x788] sm:$0xff] }
 0x115   : > { %1840 = vmatpush.msrb.mxu2 %v567_v5  ;;  %1859 = vmatpush.msrb.mxu3 %v601_v9  ;;  %v517_v5 = vld [vmem:[%s5489_s2 + $0x408] sm:$0xff]  ;;  %v1251_v9 = vpop.f32.mrf.mxu0 }
 0x116   : > { %1821 = vmatpush.msrb.mxu1 %v533_v10  ;;  %1809 = vmatpush.msrb.mxu0 %v485_v11  ;;  %v549_v10 = vld [vmem:[%s5489_s2 + $0x508] sm:$0xff]  ;;  %v583_v11 = vld [vmem:[%s5489_s2 + $0x618] sm:$0xff] }
 0x117   : > { %1841 = vmatpush.msrb.mxu2 %v565_v12  ;;  %1860 = vmatpush.msrb.mxu3 %v599_v13  ;;  %v627_v12 = vld [vmem:[%s5489_s2 + $0x778] sm:$0xff] }
 0x118   : > { %1874 = vmatpush.msra.mxu0 %v643_v17  ;;  %1822 = vmatpush.msrb.mxu1 %v531_v18  ;;  %v675_v13 = vld [vmem:[%s5489_s2 + $0x8f8] sm:$0xff]  ;;  %v1252_v17 = vadd.f32 %v1251_v9, %v1227_v1 }
 0x119   : > { %1842 = vmatpush.msrb.mxu2 %v563_v19  ;;  %1861 = vmatpush.msrb.mxu3 %v597_v21  ;;  %v707_v18 = vld [vmem:[%s5489_s2 + $0x9f8] sm:$0xff]  ;;  %v1271_v19 = vpop.f32.mrf.mxu1  ;;  %v625_v21 = vld [vmem:[%s5489_s2 + $0x768] sm:$0xff] }
 0x11a   : > { %1875 = vmatpush.msra.mxu0 %v641_v25  ;;  %1823 = vmatpush.msrb.mxu1 %v529_v27  ;;  %v673_v25 = vld [vmem:[%s5489_s2 + $0x8e8] sm:$0xff] }
 0x11b   : > { %1843 = vmatpush.msrb.mxu2 %v561_v28  ;;  %1862 = vmatpush.msrb.mxu3 %v595_v29  ;;  %v705_v27 = vld [vmem:[%s5489_s2 + $0x9e8] sm:$0xff]  ;;  %v671_v28 = vld [vmem:[%s5489_s2 + $0x8d8] sm:$0xff]  ;;  %v1272_v29 = vadd.f32 %v1271_v19, %v1252_v17 }
 0x11c   : > { %1876 = vmatpush.msra.mxu0 %v639_v30  ;;  %1824 = vmatpush.msrb.mxu1 %v527_v31  ;;  %v703_v30 = vld [vmem:[%s5489_s2 + $0x9d8] sm:$0xff]  ;;  %v737_v31 = vld [vmem:[%s5489_s2 + $0xae8] sm:$0xff] }
 0x11d   : > { %1844 = vmatpush.msrb.mxu2 %v559_v32  ;;  %1863 = vmatpush.msrb.mxu3 %v593_v33  ;;  %v1291_v32 = vpop.f32.mrf.mxu2  ;;  %v621_v33 = vld [vmem:[%s5489_s2 + $0x748] sm:$0xff]  ;;  %v1331_v55 = vpop.f32.mrf.mxu0 }
 0x11e   : > { %1877 = vmatpush.msra.mxu0 %v637_v34  ;;  %1825 = vmatpush.msrb.mxu1 %v525_v35  ;;  %v669_v34 = vld [vmem:[%s5489_s2 + $0x8c8] sm:$0xff] }
 0x11f   : > { %1845 = vmatpush.msrb.mxu2 %v557_v40  ;;  %1864 = vmatpush.msrb.mxu3 %v591_v41  ;;  %v701_v35 = vld [vmem:[%s5489_s2 + $0x9c8] sm:$0xff]  ;;  %v735_v40 = vld [vmem:[%s5489_s2 + $0xad8] sm:$0xff]  ;;  %v1292_v41 = vadd.f32 %v1291_v32, %v1272_v29 }
 0x120   : > { %1878 = vmatpush.msra.mxu0 %v635_v44  ;;  %1826 = vmatpush.msrb.mxu1 %v523_v45  ;;  %v619_v44 = vld [vmem:[%s5489_s2 + $0x738] sm:$0xff]  ;;  %v1311_v45 = vpop.f32.mrf.mxu3  ;;  %v769_v17 = vld [vmem:[%s5489_s2 + $0xbe8] sm:$0xff] }
 0x121   : > { %1846 = vmatpush.msrb.mxu2 %v555_v48  ;;  %1865 = vmatpush.msrb.mxu3 %v589_v49  ;;  %v667_v48 = vld [vmem:[%s5489_s2 + $0x8b8] sm:$0xff]  ;;  %v1351_v9 = vpop.f32.mrf.mxu1  ;;  %v689_v19 = vld [vmem:[%s5489_s2 + $0x968] sm:$0xff] }
 0x122   : > { %1879 = vmatpush.msra.mxu0 %v633_v50  ;;  %1827 = vmatpush.msrb.mxu1 %v521_v51  ;;  %v699_v49 = vld [vmem:[%s5489_s2 + $0x9b8] sm:$0xff]  ;;  %v617_v50 = vld [vmem:[%s5489_s2 + $0x728] sm:$0xff] }
 0x123   : > { %1847 = vmatpush.msrb.mxu2 %v553_v54  ;;  %1866 = vmatpush.msrb.mxu3 %v587_v56  ;;  %v665_v51 = vld [vmem:[%s5489_s2 + $0x8a8] sm:$0xff]  ;;  %v1312_v54 = vadd.f32 %v1311_v45, %v1292_v41  ;;  %v615_v56 = vld [vmem:[%s5489_s2 + $0x718] sm:$0xff] }
 0x124   : > { %1880 = vmatpush.msra.mxu0 %v631_v57  ;;  %1828 = vmatpush.msrb.mxu1 %v519_v58  ;;  %v663_v57 = vld [vmem:[%s5489_s2 + $0x898] sm:$0xff]  ;;  %v653_v29 = vld [vmem:[%s5489_s2 + $0x848] sm:$0xff] }
 0x125   : > { %1848 = vmatpush.msrb.mxu2 %v551_v59  ;;  %1867 = vmatpush.msrb.mxu3 %v585_v63  ;;  %v695_v58 = vld [vmem:[%s5489_s2 + $0x998] sm:$0xff]  ;;  %v729_v59 = vld [vmem:[%s5489_s2 + $0xaa8] sm:$0xff]  ;;  %v1332_v1 = vadd.f32 %v1331_v55, %v1312_v54 }
 0x126   : > { %1770 = vmatmul.f32.vlgmr.msra.gmra.mxu2 %v1178_v2  ;;  %1881 = vmatpush.msra.mxu0 %v629_v4  ;;  %v581_v2 = vld [vmem:[%s5489_s2 + $0x608] sm:$0xff]  ;;  %v719_v32 = vld [vmem:[%s5489_s2 + $0xa58] sm:$0xff] }
 0x127   : > { %1829 = vmatpush.msrb.mxu1 %v517_v5  ;;  %1849 = vmatpush.msrb.mxu2 %v549_v10  ;;  %v661_v63 = vld [vmem:[%s5489_s2 + $0x888] sm:$0xff]  ;;  %v727_v5 = vld [vmem:[%s5489_s2 + $0xa98] sm:$0xff] }
 0x128   : > { %1868 = vmatpush.msrb.mxu3 %v583_v11  ;;  %1750 = vmatmul.f32.vlgmr.msra.gmra.mxu1 %v1177_v0  ;;  %v739_v0 = vld [vmem:[%s5489_s2 + $0xaf8] sm:$0xff]  ;;  %v693_v4 = vld [vmem:[%s5489_s2 + $0x988] sm:$0xff] }
 0x129   : > { %1790 = vmatmul.f32.vlgmr.msra.gmra.mxu3 %v1179_v60  ;;  %1882 = vmatpush.msra.mxu0 %v627_v12  ;;  %v623_v60 = vld [vmem:[%s5489_s2 + $0x758] sm:$0xff]  ;;  %v717_v41 = vld [vmem:[%s5489_s2 + $0xa48] sm:$0xff] }
 0x12a   : > { %1894 = vmatpush.msra.mxu1 %v675_v13  ;;  %1914 = vmatpush.msra.mxu2 %v707_v18  ;;  %v771_v10 = vld [vmem:[%s5489_s2 + $0xbf8] sm:$0xff]  ;;  %v725_v13 = vld [vmem:[%s5489_s2 + $0xa88] sm:$0xff]  ;;  %v1352_v18 = vadd.f32 %v1351_v9, %v1332_v1 }
 0x12b   : > { %1869 = vmatpush.msrb.mxu3 %v581_v2  ;;  %1883 = vmatpush.msra.mxu0 %v625_v21  ;;  %v659_v11 = vld [vmem:[%s5489_s2 + $0x878] sm:$0xff]  ;;  %v657_v2 = vld [vmem:[%s5489_s2 + $0x868] sm:$0xff]  ;;  %v1371_v21 = vpop.f32.mrf.mxu2 }
 0x12c   : > { %1895 = vmatpush.msra.mxu1 %v673_v25  ;;  %1915 = vmatpush.msra.mxu2 %v705_v27  ;;  %v691_v12 = vld [vmem:[%s5489_s2 + $0x978] sm:$0xff]  ;;  %v713_v55 = vld [vmem:[%s5489_s2 + $0xa28] sm:$0xff] }
 0x12d   : > { %1934 = vmatpush.msra.mxu3 %v739_v0  ;;  %1884 = vmatpush.msra.mxu0 %v623_v60  ;;  %v723_v25 = vld [vmem:[%s5489_s2 + $0xa78] sm:$0xff]  ;;  %v765_v60 = vld [vmem:[%s5489_s2 + $0xbc8] sm:$0xff] }
 0x12e   : > { %1896 = vmatpush.msra.mxu1 %v671_v28  ;;  %1916 = vmatpush.msra.mxu2 %v703_v30  ;;  %v767_v27 = vld [vmem:[%s5489_s2 + $0xbd8] sm:$0xff]  ;;  %v1372_v28 = vadd.f32 %v1371_v21, %v1352_v18  ;;  %v685_v30 = vld [vmem:[%s5489_s2 + $0x948] sm:$0xff] }
 0x12f   : > { %1935 = vmatpush.msra.mxu3 %v737_v31  ;;  %1850 = vmatmul.f32.vlgmr.msrb.gmra.mxu2 %v1182_v26  ;;  %v733_v26 = vld [vmem:[%s5489_s2 + $0xac8] sm:$0xff]  ;;  %v655_v0 = vld [vmem:[%s5489_s2 + $0x858] sm:$0xff]  ;;  %v1391_v31 = vpop.f32.mrf.mxu3 }
 0x130   : > { %1885 = vmatpush.msra.mxu0 %v621_v33  ;;  %1897 = vmatpush.msra.mxu1 %v669_v34  ;;  %v763_v33 = vld [vmem:[%s5489_s2 + $0xbb8] sm:$0xff]  ;;  %v1392_v45 = vadd.f32 %v1391_v31, %v1372_v28  ;;  %v861_v31 = vld [vmem:[%s5489_s2 + $0xec8] sm:$0xff] }
 0x131   : > { %1917 = vmatpush.msra.mxu2 %v701_v35  ;;  %1936 = vmatpush.msra.mxu3 %v735_v40  ;;  %v651_v34 = vld [vmem:[%s5489_s2 + $0x838] sm:$0xff]  ;;  %v1411_v40 = vpop.f32.mrf.mxu0 }
 0x132   : > { %1810 = vmatmul.f32.vlgmr.msrb.gmra.mxu0 %v1180_v3  ;;  %1870 = vmatmul.f32.vlgmr.msrb.gmra.mxu3 %v1183_v16  ;;  %v697_v3 = vld [vmem:[%s5489_s2 + $0x9a8] sm:$0xff]  ;;  %v731_v16 = vld [vmem:[%s5489_s2 + $0xab8] sm:$0xff] }
 0x133   : > { %1886 = vmatpush.msra.mxu0 %v619_v44  ;;  %1898 = vmatpush.msra.mxu1 %v667_v48  ;;  %v683_v35 = vld [vmem:[%s5489_s2 + $0x938] sm:$0xff]  ;;  %v761_v44 = vld [vmem:[%s5489_s2 + $0xba8] sm:$0xff] }
 0x134   : > { %1918 = vmatpush.msra.mxu2 %v699_v49  ;;  %1937 = vmatpush.msra.mxu3 %v733_v26  ;;  %v649_v48 = vld [vmem:[%s5489_s2 + $0x828] sm:$0xff]  ;;  %v715_v26 = vld [vmem:[%s5489_s2 + $0xa38] sm:$0xff] }
 0x135   : > { %1830 = vmatmul.f32.vlgmr.msrb.gmra.mxu1 %v1181_v20  ;;  %1887 = vmatpush.msra.mxu0 %v617_v50  ;;  %v613_v20 = vld [vmem:[%s5489_s2 + $0x708] sm:$0xff]  ;;  %v759_v50 = vld [vmem:[%s5489_s2 + $0xb98] sm:$0xff] }
 0x136   : > { %1899 = vmatpush.msra.mxu1 %v665_v51  ;;  %1919 = vmatpush.msra.mxu2 %v697_v3  ;;  %v681_v49 = vld [vmem:[%s5489_s2 + $0x928] sm:$0xff]  ;;  %v1412_v51 = vadd.f32 %v1411_v40, %v1392_v45  ;;  %v647_v54 = vld [vmem:[%s5489_s2 + $0x818] sm:$0xff] }
 0x137   : > { %1938 = vmatpush.msra.mxu3 %v731_v16  ;;  %1888 = vmatpush.msra.mxu0 %v615_v56  ;;  %v679_v3 = vld [vmem:[%s5489_s2 + $0x918] sm:$0xff]  ;;  %v1431_v16 = vpop.f32.mrf.mxu1  ;;  %v757_v56 = vld [vmem:[%s5489_s2 + $0xb88] sm:$0xff] }
 0x138   : > { %1900 = vmatpush.msra.mxu1 %v663_v57  ;;  %1920 = vmatpush.msra.mxu2 %v695_v58  ;;  %v645_v57 = vld [vmem:[%s5489_s2 + $0x808] sm:$0xff]  ;;  %v755_v1 = vld [vmem:[%s5489_s2 + $0xb78] sm:$0xff] }
 0x139   : > { %1939 = vmatpush.msra.mxu3 %v729_v59  ;;  %1889 = vmatpush.msra.mxu0 %v613_v20  ;;  %v677_v58 = vld [vmem:[%s5489_s2 + $0x908] sm:$0xff]  ;;  %v1451_v59 = vpop.f32.mrf.mxu2  ;;  %v711_v20 = vld [vmem:[%s5489_s2 + $0xa18] sm:$0xff]  ;;  %v1491_v18 = vpop.f32.mrf.mxu0 }
 0x13a   : > { %1901 = vmatpush.msra.mxu1 %v661_v63  ;;  %1921 = vmatpush.msra.mxu2 %v693_v4  ;;  %v1432_v63 = vadd.f32 %v1431_v16, %v1412_v51  ;;  %v803_v4 = vld [vmem:[%s5489_s2 + $0xcf8] sm:$0xff]  ;;  %v825_v40 = vld [vmem:[%s5489_s2 + $0xda8] sm:$0xff] }
 0x13b   : > { %1940 = vmatpush.msra.mxu3 %v727_v5  ;;  %1954 = vmatpush.msrb.mxu0 %v771_v10  ;;  %v835_v5 = vld [vmem:[%s5489_s2 + $0xdf8] sm:$0xff]  ;;  %v709_v10 = vld [vmem:[%s5489_s2 + $0xa08] sm:$0xff] }
 0x13c   : > { %1902 = vmatpush.msra.mxu1 %v659_v11  ;;  %1890 = vmatmul.f32.vlgmr.msra.gmra.mxu0 %v1184_v22  ;;  %v721_v22 = vld [vmem:[%s5489_s2 + $0xa68] sm:$0xff]  ;;  %v1452_v9 = vadd.f32 %v1451_v59, %v1432_v63  ;;  %v831_v21 = vld [vmem:[%s5489_s2 + $0xdd8] sm:$0xff] }
 0x13d   : > { %1922 = vmatpush.msra.mxu2 %v691_v12  ;;  %1941 = vmatpush.msra.mxu3 %v725_v13  ;;  %v753_v11 = vld [vmem:[%s5489_s2 + $0xb68] sm:$0xff]  ;;  %v1471_v12 = vpop.f32.mrf.mxu3  ;;  %v747_v28 = vld [vmem:[%s5489_s2 + $0xb38] sm:$0xff] }
 0x13e   : > { %1955 = vmatpush.msrb.mxu0 %v769_v17  ;;  %1903 = vmatpush.msra.mxu1 %v657_v2  ;;  %v801_v13 = vld [vmem:[%s5489_s2 + $0xce8] sm:$0xff]  ;;  %v867_v17 = vld [vmem:[%s5489_s2 + $0xef8] sm:$0xff] }
 0x13f   : > { %1923 = vmatpush.msra.mxu2 %v689_v19  ;;  %1942 = vmatpush.msra.mxu3 %v723_v25  ;;  %v799_v2 = vld [vmem:[%s5489_s2 + $0xcd8] sm:$0xff]  ;;  %v1472_v19 = vadd.f32 %v1471_v12, %v1452_v9  ;;  %v865_v25 = vld [vmem:[%s5489_s2 + $0xee8] sm:$0xff] }
 0x140   : > { %1956 = vmatpush.msrb.mxu0 %v767_v27  ;;  %1904 = vmatpush.msra.mxu1 %v655_v0  ;;  %v749_v27 = vld [vmem:[%s5489_s2 + $0xb48] sm:$0xff]  ;;  %v791_v45 = vld [vmem:[%s5489_s2 + $0xc98] sm:$0xff] }
 0x141   : > { %1924 = vmatpush.msra.mxu2 %v687_v53  ;;  %1943 = vmatpush.msra.mxu3 %v721_v22  ;;  %v797_v0 = vld [vmem:[%s5489_s2 + $0xcc8] sm:$0xff]  ;;  %v863_v22 = vld [vmem:[%s5489_s2 + $0xed8] sm:$0xff] }
 0x142   : > { %1957 = vmatpush.msrb.mxu0 %v765_v60  ;;  %1905 = vmatpush.msra.mxu1 %v653_v29  ;;  %v829_v53 = vld [vmem:[%s5489_s2 + $0xdc8] sm:$0xff]  ;;  %v1511_v60 = vpop.f32.mrf.mxu1  ;;  %v795_v29 = vld [vmem:[%s5489_s2 + $0xcb8] sm:$0xff] }
 0x143   : > { %1925 = vmatpush.msra.mxu2 %v685_v30  ;;  %1944 = vmatpush.msra.mxu3 %v719_v32  ;;  %v827_v30 = vld [vmem:[%s5489_s2 + $0xdb8] sm:$0xff]  ;;  %v1531_v32 = vpop.f32.mrf.mxu2  ;;  %v741_v51 = vld [vmem:[%s5489_s2 + $0xb08] sm:$0xff] }
 0x144   : > { %1958 = vmatpush.msrb.mxu0 %v763_v33  ;;  %1906 = vmatpush.msra.mxu1 %v651_v34  ;;  %v745_v33 = vld [vmem:[%s5489_s2 + $0xb28] sm:$0xff]  ;;  %v855_v16 = vld [vmem:[%s5489_s2 + $0xe98] sm:$0xff] }
 0x145   : > { %1926 = vmatpush.msra.mxu2 %v683_v35  ;;  %1945 = vmatpush.msra.mxu3 %v717_v41  ;;  %v793_v34 = vld [vmem:[%s5489_s2 + $0xca8] sm:$0xff]  ;;  %v859_v41 = vld [vmem:[%s5489_s2 + $0xeb8] sm:$0xff] }
 0x146   : > { %1959 = vmatpush.msrb.mxu0 %v761_v44  ;;  %1907 = vmatpush.msra.mxu1 %v649_v48  ;;  %v743_v44 = vld [vmem:[%s5489_s2 + $0xb18] sm:$0xff]  ;;  %v785_v63 = vld [vmem:[%s5489_s2 + $0xc68] sm:$0xff] }
 0x147   : > { %1927 = vmatpush.msra.mxu2 %v681_v49  ;;  %1946 = vmatpush.msra.mxu3 %v715_v26  ;;  %v823_v49 = vld [vmem:[%s5489_s2 + $0xd98] sm:$0xff]  ;;  %v857_v26 = vld [vmem:[%s5489_s2 + $0xea8] sm:$0xff] }
 0x148   : > { %1960 = vmatpush.msrb.mxu0 %v759_v50  ;;  %1908 = vmatpush.msra.mxu1 %v647_v54  ;;  %v1551_v50 = vpop.f32.mrf.mxu3  ;;  %v789_v54 = vld [vmem:[%s5489_s2 + $0xc88] sm:$0xff]  ;;  %v819_v59 = vld [vmem:[%s5489_s2 + $0xd78] sm:$0xff] }
 0x149   : > { %1928 = vmatpush.msra.mxu2 %v679_v3  ;;  %1947 = vmatpush.msra.mxu3 %v713_v55  ;;  %v821_v3 = vld [vmem:[%s5489_s2 + $0xd88] sm:$0xff]  ;;  %v1571_v55 = vpop.f32.mrf.mxu0  ;;  %v815_v12 = vld [vmem:[%s5489_s2 + $0xd58] sm:$0xff] }
 0x14a   : > { %1961 = vmatpush.msrb.mxu0 %v757_v56  ;;  %1909 = vmatpush.msra.mxu1 %v645_v57  ;;  %v787_v56 = vld [vmem:[%s5489_s2 + $0xc78] sm:$0xff]  ;;  %v1591_v9 = vpop.f32.mrf.mxu1 }
 0x14b   : > { %1929 = vmatpush.msra.mxu2 %v677_v58  ;;  %1948 = vmatpush.msra.mxu3 %v711_v20  ;;  %v899_v58 = vld [vmem:[%s5489_s2 + $0xff8] sm:$0xff]  ;;  %v853_v20 = vld [vmem:[%s5489_s2 + $0xe88] sm:$0xff] }
 0x14c   : > { %1910 = vmatmul.f32.vlgmr.msra.gmra.mxu1 %v1185_v14  ;;  %1930 = vmatmul.f32.vlgmr.msra.gmra.mxu2 %v1186_v23  ;;  %v833_v14 = vld [vmem:[%s5489_s2 + $0xde8] sm:$0xff]  ;;  %v751_v23 = vld [vmem:[%s5489_s2 + $0xb58] sm:$0xff] }
 0x14d   : > { %1962 = vmatpush.msrb.mxu0 %v755_v1  ;;  %1974 = vmatpush.msrb.mxu1 %v803_v4  ;;  %v897_v4 = vld [vmem:[%s5489_s2 + $0xfe8] sm:$0xff] }
 0x14e   : > { %1994 = vmatpush.msrb.mxu2 %v835_v5  ;;  %1949 = vmatpush.msra.mxu3 %v709_v10  ;;  %v817_v5 = vld [vmem:[%s5489_s2 + $0xd68] sm:$0xff]  ;;  %v851_v10 = vld [vmem:[%s5489_s2 + $0xe78] sm:$0xff] }
 0x14f   : > { %1963 = vmatpush.msrb.mxu0 %v753_v11  ;;  %1950 = vmatmul.f32.vlgmr.msra.gmra.mxu3 %v1187_v15  ;;  %v1492_v15 = vadd.f32 %v1491_v18, %v1472_v19  ;;  %v895_v11 = vld [vmem:[%s5489_s2 + $0xfd8] sm:$0xff] }
 0x150   : > { %1975 = vmatpush.msrb.mxu1 %v801_v13  ;;  %1995 = vmatpush.msrb.mxu2 %v833_v14  ;;  %v1611_v13 = vpop.f32.mrf.mxu2  ;;  %v849_v14 = vld [vmem:[%s5489_s2 + $0xe68] sm:$0xff]  ;;  %v847_v19 = vld [vmem:[%s5489_s2 + $0xe58] sm:$0xff] }
 0x151   : > { %2014 = vmatpush.msrb.mxu3 %v867_v17  ;;  %1964 = vmatpush.msrb.mxu0 %v751_v23  ;;  %v1512_v35 = vadd.f32 %v1511_v60, %v1492_v15  ;;  %v781_v17 = vld [vmem:[%s5489_s2 + $0xc48] sm:$0xff]  ;;  %v1631_v15 = vpop.f32.mrf.mxu3 }
 0x152   : > { %1976 = vmatpush.msrb.mxu1 %v799_v2  ;;  %1996 = vmatpush.msrb.mxu2 %v831_v21  ;;  %v893_v23 = vld [vmem:[%s5489_s2 + $0xfc8] sm:$0xff]  ;;  %v779_v21 = vld [vmem:[%s5489_s2 + $0xc38] sm:$0xff] }
 0x153   : > { %2015 = vmatpush.msrb.mxu3 %v865_v25  ;;  %1965 = vmatpush.msrb.mxu0 %v749_v27  ;;  %v1532_v48 = vadd.f32 %v1531_v32, %v1512_v35  ;;  %v813_v2 = vld [vmem:[%s5489_s2 + $0xd48] sm:$0xff]  ;;  %v891_v27 = vld [vmem:[%s5489_s2 + $0xfb8] sm:$0xff] }
 0x154   : > { %1977 = vmatpush.msrb.mxu1 %v797_v0  ;;  %1997 = vmatpush.msrb.mxu2 %v829_v53  ;;  %v811_v0 = vld [vmem:[%s5489_s2 + $0xd38] sm:$0xff]  ;;  %v845_v53 = vld [vmem:[%s5489_s2 + $0xe48] sm:$0xff] }
 0x155   : > { %2016 = vmatpush.msrb.mxu3 %v863_v22  ;;  %1966 = vmatpush.msrb.mxu0 %v747_v28  ;;  %v1552_v57 = vadd.f32 %v1551_v50, %v1532_v48  ;;  %v777_v22 = vld [vmem:[%s5489_s2 + $0xc28] sm:$0xff]  ;;  %v839_v48 = vld [vmem:[%s5489_s2 + $0xe18] sm:$0xff] }
 0x156   : > { %1978 = vmatpush.msrb.mxu1 %v795_v29  ;;  %1998 = vmatpush.msrb.mxu2 %v827_v30  ;;  %v889_v60 = vld [vmem:[%s5489_s2 + $0xfa8] sm:$0xff]  ;;  %v843_v29 = vld [vmem:[%s5489_s2 + $0xe38] sm:$0xff] }
 0x157   : > { %2017 = vmatpush.msrb.mxu3 %v861_v31  ;;  %1967 = vmatpush.msrb.mxu0 %v745_v33  ;;  %v1572_v1 = vadd.f32 %v1571_v55, %v1552_v57  ;;  %v809_v28 = vld [vmem:[%s5489_s2 + $0xd28] sm:$0xff]  ;;  %v775_v30 = vld [vmem:[%s5489_s2 + $0xc18] sm:$0xff] }
 0x158   : > { %1979 = vmatpush.msrb.mxu1 %v793_v34  ;;  %1999 = vmatpush.msrb.mxu2 %v825_v40  ;;  %v887_v33 = vld [vmem:[%s5489_s2 + $0xf98] sm:$0xff]  ;;  %v841_v35 = vld [vmem:[%s5489_s2 + $0xe28] sm:$0xff] }
 0x159   : > { %2018 = vmatpush.msrb.mxu3 %v859_v41  ;;  %1968 = vmatpush.msrb.mxu0 %v743_v44  ;;  %v1592_v18 = vadd.f32 %v1591_v9, %v1572_v1  ;;  %v807_v34 = vld [vmem:[%s5489_s2 + $0xd18] sm:$0xff]  ;;  %v773_v40 = vld [vmem:[%s5489_s2 + $0xc08] sm:$0xff] }
 0x15a   : > { %1980 = vmatpush.msrb.mxu1 %v791_v45  ;;  %2000 = vmatpush.msrb.mxu2 %v823_v49  ;;  %v885_v41 = vld [vmem:[%s5489_s2 + $0xf88] sm:$0xff]  ;;  %v931_v50 = vld [vmem:[%s5489_s2 + $0x10f8] sm:$0xff] }
 0x15b   : > { %2019 = vmatpush.msrb.mxu3 %v857_v26  ;;  %1969 = vmatpush.msrb.mxu0 %v741_v51  ;;  %v1612_v25 = vadd.f32 %v1611_v13, %v1592_v18  ;;  %v805_v44 = vld [vmem:[%s5489_s2 + $0xd08] sm:$0xff]  ;;  %v883_v26 = vld [vmem:[%s5489_s2 + $0xf78] sm:$0xff] }
 0x15c   : > { %1981 = vmatpush.msrb.mxu1 %v789_v54  ;;  %2001 = vmatpush.msrb.mxu2 %v821_v3  ;;  %v963_v51 = vld [vmem:[%s5489_s2 + $0x11f8] sm:$0xff]  ;;  %v837_v3 = vld [vmem:[%s5489_s2 + $0xe08] sm:$0xff] }
 0x15d   : > { %2020 = vmatpush.msrb.mxu3 %v855_v16  ;;  %1970 = vmatmul.f32.vlgmr.msrb.gmra.mxu0 %v1188_v24  ;;  %v783_v24 = vld [vmem:[%s5489_s2 + $0xc58] sm:$0xff]  ;;  %v1632_v32 = vadd.f32 %v1631_v15, %v1612_v25  ;;  %v881_v16 = vld [vmem:[%s5489_s2 + $0xf68] sm:$0xff] }
 0x15e   : > { %1982 = vmatpush.msrb.mxu1 %v787_v56  ;;  %2034 = vmatpush.msra.mxu0 %v899_v58  ;;  %v929_v56 = vld [vmem:[%s5489_s2 + $0x10e8] sm:$0xff]  ;;  %v995_v57 = vld [vmem:[%s5489_s2 + $0x12f8] sm:$0xff] }
 0x15f   : > { %2002 = vmatpush.msrb.mxu2 %v819_v59  ;;  %2021 = vmatpush.msrb.mxu3 %v853_v20  ;;  %v927_v59 = vld [vmem:[%s5489_s2 + $0x10d8] sm:$0xff]  ;;  %v993_v1 = vld [vmem:[%s5489_s2 + $0x12e8] sm:$0xff] }
 0x160   : > { %1983 = vmatpush.msrb.mxu1 %v785_v63  ;;  %2035 = vmatpush.msra.mxu0 %v897_v4  ;;  %v959_v63 = vld [vmem:[%s5489_s2 + $0x11d8] sm:$0xff]  ;;  %v877_v4 = vld [vmem:[%s5489_s2 + $0xf48] sm:$0xff] }
 0x161   : > { %2003 = vmatpush.msrb.mxu2 %v817_v5  ;;  %2022 = vmatpush.msrb.mxu3 %v851_v10  ;;  %v957_v5 = vld [vmem:[%s5489_s2 + $0x11c8] sm:$0xff]  ;;  %v991_v9 = vld [vmem:[%s5489_s2 + $0x12d8] sm:$0xff] }
 0x162   : > { %1984 = vmatpush.msrb.mxu1 %v783_v24  ;;  %2036 = vmatpush.msra.mxu0 %v895_v11  ;;  %v1651_v31 = vpop.f32.mrf.mxu0  ;;  %v875_v24 = vld [vmem:[%s5489_s2 + $0xf38] sm:$0xff]  ;;  %v873_v18 = vld [vmem:[%s5489_s2 + $0xf28] sm:$0xff] }
 0x163   : > { %2004 = vmatpush.msrb.mxu2 %v815_v12  ;;  %2023 = vmatpush.msrb.mxu3 %v849_v14  ;;  %v1652_v45 = vadd.f32 %v1651_v31, %v1632_v32  ;;  %v923_v11 = vld [vmem:[%s5489_s2 + $0x10b8] sm:$0xff]  ;;  %v989_v14 = vld [vmem:[%s5489_s2 + $0x12c8] sm:$0xff] }
 0x164   : > { %1985 = vmatpush.msrb.mxu1 %v781_v17  ;;  %2037 = vmatpush.msra.mxu0 %v893_v23  ;;  %v955_v13 = vld [vmem:[%s5489_s2 + $0x11b8] sm:$0xff]  ;;  %v921_v23 = vld [vmem:[%s5489_s2 + $0x10a8] sm:$0xff] }
 0x165   : > { %2005 = vmatpush.msrb.mxu2 %v813_v2  ;;  %2024 = vmatpush.msrb.mxu3 %v847_v19  ;;  %v1671_v49 = vpop.f32.mrf.mxu1  ;;  %v953_v2 = vld [vmem:[%s5489_s2 + $0x11a8] sm:$0xff]  ;;  %v987_v19 = vld [vmem:[%s5489_s2 + $0x12b8] sm:$0xff] }
 0x166   : > { %1986 = vmatpush.msrb.mxu1 %v779_v21  ;;  %2038 = vmatpush.msra.mxu0 %v891_v27  ;;  %v1672_v55 = vadd.f32 %v1671_v49, %v1652_v45  ;;  %v871_v21 = vld [vmem:[%s5489_s2 + $0xf18] sm:$0xff]  ;;  %v869_v15 = vld [vmem:[%s5489_s2 + $0xf08] sm:$0xff] }
 0x167   : > { %2006 = vmatpush.msrb.mxu2 %v811_v0  ;;  %2025 = vmatpush.msrb.mxu3 %v845_v53  ;;  %v919_v25 = vld [vmem:[%s5489_s2 + $0x1098] sm:$0xff]  ;;  %v985_v0 = vld [vmem:[%s5489_s2 + $0x12a8] sm:$0xff] }
 0x168   : > { %1987 = vmatpush.msrb.mxu1 %v777_v22  ;;  %2039 = vmatpush.msra.mxu0 %v889_v60  ;;  %v951_v27 = vld [vmem:[%s5489_s2 + $0x1198] sm:$0xff]  ;;  %v917_v53 = vld [vmem:[%s5489_s2 + $0x1088] sm:$0xff] }
 0x169   : > { %2007 = vmatpush.msrb.mxu2 %v809_v28  ;;  %2026 = vmatpush.msrb.mxu3 %v843_v29  ;;  %v1691_v54 = vpop.f32.mrf.mxu2  ;;  %v949_v22 = vld [vmem:[%s5489_s2 + $0x1188] sm:$0xff]  ;;  %v983_v60 = vld [vmem:[%s5489_s2 + $0x1298] sm:$0xff] }
 0x16a   : > { %1988 = vmatpush.msrb.mxu1 %v775_v30  ;;  %2040 = vmatpush.msra.mxu0 %v887_v33  ;;  %v1692_v58 = vadd.f32 %v1691_v54, %v1672_v55  ;;  %v915_v28 = vld [vmem:[%s5489_s2 + $0x1078] sm:$0xff]  ;;  %v981_v31 = vld [vmem:[%s5489_s2 + $0x1288] sm:$0xff] }
 0x16b   : > { %2008 = vmatpush.msrb.mxu2 %v807_v34  ;;  %2027 = vmatpush.msrb.mxu3 %v841_v35  ;;  %v1027_v29 = vld [vmem:[%s5489_s2 + $0x13f8] sm:$0xff]  ;;  %v913_v32 = vld [vmem:[%s5489_s2 + $0x1068] sm:$0xff] }
 0x16c   : > { %1989 = vmatpush.msrb.mxu1 %v773_v40  ;;  %2041 = vmatpush.msra.mxu0 %v885_v41  ;;  %v1711_v20 = vpop.f32.mrf.mxu3  ;;  %v947_v30 = vld [vmem:[%s5489_s2 + $0x1178] sm:$0xff]  ;;  %v1025_v33 = vld [vmem:[%s5489_s2 + $0x13e8] sm:$0xff] }
 0x16d   : > { %2009 = vmatpush.msrb.mxu2 %v805_v44  ;;  %2028 = vmatpush.msrb.mxu3 %v839_v48  ;;  %v1712_v10 = vadd.f32 %v1711_v20, %v1692_v58  ;;  %v945_v34 = vld [vmem:[%s5489_s2 + $0x1168] sm:$0xff]  ;;  %v979_v35 = vld [vmem:[%s5489_s2 + $0x1278] sm:$0xff] }
 0x16e   : > { %1990 = vmatmul.f32.vlgmr.msrb.gmra.mxu1 %v1189_v36  ;;  %2010 = vmatmul.f32.vlgmr.msrb.gmra.mxu2 %v1190_v42  ;;  %v961_v36 = vld [vmem:[%s5489_s2 + $0x11e8] sm:$0xff]  ;;  %v879_v42 = vld [vmem:[%s5489_s2 + $0xf58] sm:$0xff] }
 0x16f   : > { %2042 = vmatpush.msra.mxu0 %v883_v26  ;;  %2054 = vmatpush.msra.mxu1 %v931_v50  ;;  %v943_v40 = vld [vmem:[%s5489_s2 + $0x1158] sm:$0xff]  ;;  %v977_v41 = vld [vmem:[%s5489_s2 + $0x1268] sm:$0xff] }
 0x170   : > { %2074 = vmatpush.msra.mxu2 %v963_v51  ;;  %2029 = vmatpush.msrb.mxu3 %v837_v3  ;;  %v909_v44 = vld [vmem:[%s5489_s2 + $0x1048] sm:$0xff]  ;;  %v975_v49 = vld [vmem:[%s5489_s2 + $0x1258] sm:$0xff] }
 0x171   : > { %2043 = vmatpush.msra.mxu0 %v881_v16  ;;  %2030 = vmatmul.f32.vlgmr.msrb.gmra.mxu3 %v1191_v37  ;;  %v925_v37 = vld [vmem:[%s5489_s2 + $0x10c8] sm:$0xff]  ;;  %v907_v26 = vld [vmem:[%s5489_s2 + $0x1038] sm:$0xff] }
 0x172   : > { %2055 = vmatpush.msra.mxu1 %v929_v56  ;;  %2075 = vmatpush.msra.mxu2 %v961_v36  ;;  %v1021_v45 = vld [vmem:[%s5489_s2 + $0x13c8] sm:$0xff]  ;;  %v1019_v50 = vld [vmem:[%s5489_s2 + $0x13b8] sm:$0xff] }
 0x173   : > { %2094 = vmatpush.msra.mxu3 %v995_v57  ;;  %2044 = vmatpush.msra.mxu0 %v879_v42  ;;  %v941_v48 = vld [vmem:[%s5489_s2 + $0x1148] sm:$0xff]  ;;  %v939_v51 = vld [vmem:[%s5489_s2 + $0x1138] sm:$0xff] }
 0x174   : > { %2056 = vmatpush.msra.mxu1 %v927_v59  ;;  %2076 = vmatpush.msra.mxu2 %v959_v63  ;;  %v1731_v12 = vpop.f32.mrf.mxu0  ;;  %v973_v54 = vld [vmem:[%s5489_s2 + $0x1248] sm:$0xff]  ;;  %v971_v56 = vld [vmem:[%s5489_s2 + $0x1238] sm:$0xff] }
 0x175   : > { %2095 = vmatpush.msra.mxu3 %v993_v1  ;;  %2045 = vmatpush.msra.mxu0 %v877_v4  ;;  %v4882_v17 = vadd.f32 %v1731_v12, %v1712_v10  ;;  %v905_v3 = vld [vmem:[%s5489_s2 + $0x1028] sm:$0xff]  ;;  %v903_v36 = vld [vmem:[%s5489_s2 + $0x1018] sm:$0xff] }
 0x176   : > { %2057 = vmatpush.msra.mxu1 %v925_v37  ;;  %2077 = vmatpush.msra.mxu2 %v957_v5  ;;  %v1017_v16 = vld [vmem:[%s5489_s2 + $0x13a8] sm:$0xff]  ;;  %v1015_v57 = vld [vmem:[%s5489_s2 + $0x1398] sm:$0xff] }
 0x177   : > { %2096 = vmatpush.msra.mxu3 %v991_v9  ;;  %2046 = vmatpush.msra.mxu0 %v875_v24  ;;  %2315 = vst [vmem:[%s5481_s12] sm:$0x1] %v4882_v17  ;;  %v937_v55 = vld [vmem:[%s5489_s2 + $0x1128] sm:$0xff]  ;;  %v935_v58 = vld [vmem:[%s5489_s2 + $0x1118] sm:$0xff] }
 0x178   : > { %2058 = vmatpush.msra.mxu1 %v923_v11  ;;  %2078 = vmatpush.msra.mxu2 %v955_v13  ;;  %v969_v42 = vld [vmem:[%s5489_s2 + $0x1228] sm:$0xff]  ;;  %v967_v1 = vld [vmem:[%s5489_s2 + $0x1218] sm:$0xff] }
 0x179   : > { %2097 = vmatpush.msra.mxu3 %v989_v14  ;;  %2047 = vmatpush.msra.mxu0 %v873_v18  ;;  %v901_v59 = vld [vmem:[%s5489_s2 + $0x1008] sm:$0xff]  ;;  %v1011_v4 = vld [vmem:[%s5489_s2 + $0x1378] sm:$0xff] }
 0x17a   : > { %2059 = vmatpush.msra.mxu1 %v921_v23  ;;  %2079 = vmatpush.msra.mxu2 %v953_v2  ;;  %v1013_v20 = vld [vmem:[%s5489_s2 + $0x1388] sm:$0xff]  ;;  %v1059_v37 = vld [vmem:[%s5489_s2 + $0x14f8] sm:$0xff] }
 0x17b   : > { %2098 = vmatpush.msra.mxu3 %v987_v19  ;;  %2048 = vmatpush.msra.mxu0 %v871_v21  ;;  %v933_v63 = vld [vmem:[%s5489_s2 + $0x1108] sm:$0xff]  ;;  %v1091_v5 = vld [vmem:[%s5489_s2 + $0x15f8] sm:$0xff] }
 0x17c   : > { %2060 = vmatpush.msra.mxu1 %v919_v25  ;;  %2080 = vmatpush.msra.mxu2 %v951_v27  ;;  %v965_v9 = vld [vmem:[%s5489_s2 + $0x1208] sm:$0xff]  ;;  %v1123_v11 = vld [vmem:[%s5489_s2 + $0x16f8] sm:$0xff] }
 0x17d   : > { %2099 = vmatpush.msra.mxu3 %v985_v0  ;;  %2049 = vmatpush.msra.mxu0 %v869_v15  ;;  %v1009_v10 = vld [vmem:[%s5489_s2 + $0x1368] sm:$0xff]  ;;  %v1055_v12 = vld [vmem:[%s5489_s2 + $0x14d8] sm:$0xff] }
 0x17e   : > { %2061 = vmatpush.msra.mxu1 %v917_v53  ;;  %2081 = vmatpush.msra.mxu2 %v949_v22  ;;  %v1057_v24 = vld [vmem:[%s5489_s2 + $0x14e8] sm:$0xff]  ;;  %v1087_v13 = vld [vmem:[%s5489_s2 + $0x15d8] sm:$0xff] }
 0x17f   : > { %2100 = vmatpush.msra.mxu3 %v983_v60  ;;  %2050 = vmatmul.f32.vlgmr.msra.gmra.mxu0 %v1192_v43  ;;  %v1023_v43 = vld [vmem:[%s5489_s2 + $0x13d8] sm:$0xff]  ;;  %v1121_v14 = vld [vmem:[%s5489_s2 + $0x16e8] sm:$0xff] }
 0x180   : > { %2062 = vmatpush.msra.mxu1 %v915_v28  ;;  %2114 = vmatpush.msrb.mxu0 %v1027_v29  ;;  %v1005_v18 = vld [vmem:[%s5489_s2 + $0x1348] sm:$0xff]  ;;  %v1119_v2 = vld [vmem:[%s5489_s2 + $0x16d8] sm:$0xff] }
 0x181   : > { %2082 = vmatpush.msra.mxu2 %v947_v30  ;;  %2101 = vmatpush.msra.mxu3 %v981_v31  ;;  %v1053_v23 = vld [vmem:[%s5489_s2 + $0x14c8] sm:$0xff]  ;;  %v1003_v19 = vld [vmem:[%s5489_s2 + $0x1338] sm:$0xff] }
 0x182   : > { %2063 = vmatpush.msra.mxu1 %v913_v32  ;;  %2115 = vmatpush.msrb.mxu0 %v1025_v33  ;;  %v1051_v21 = vld [vmem:[%s5489_s2 + $0x14b8] sm:$0xff]  ;;  %v1117_v27 = vld [vmem:[%s5489_s2 + $0x16c8] sm:$0xff] }
 0x183   : > { %2083 = vmatpush.msra.mxu2 %v945_v34  ;;  %2102 = vmatpush.msra.mxu3 %v979_v35  ;;  %v1083_v25 = vld [vmem:[%s5489_s2 + $0x15b8] sm:$0xff]  ;;  %v1001_v0 = vld [vmem:[%s5489_s2 + $0x1328] sm:$0xff] }
 0x184   : > { %2064 = vmatpush.msra.mxu1 %v911_v7  ;;  %2116 = vmatpush.msrb.mxu0 %v1023_v43  ;;  %v1049_v15 = vld [vmem:[%s5489_s2 + $0x14a8] sm:$0xff]  ;;  %v1115_v22 = vld [vmem:[%s5489_s2 + $0x16b8] sm:$0xff] }
 0x185   : > { %2084 = vmatpush.msra.mxu2 %v943_v40  ;;  %2103 = vmatpush.msra.mxu3 %v977_v41  ;;  %v1081_v53 = vld [vmem:[%s5489_s2 + $0x15a8] sm:$0xff]  ;;  %v999_v60 = vld [vmem:[%s5489_s2 + $0x1318] sm:$0xff] }
 0x186   : > { %2065 = vmatpush.msra.mxu1 %v909_v44  ;;  %2117 = vmatpush.msrb.mxu0 %v1021_v45  ;;  %v1047_v28 = vld [vmem:[%s5489_s2 + $0x1498] sm:$0xff]  ;;  %v1113_v30 = vld [vmem:[%s5489_s2 + $0x16a8] sm:$0xff] }
 0x187   : > { %2085 = vmatpush.msra.mxu2 %v941_v48  ;;  %2104 = vmatpush.msra.mxu3 %v975_v49  ;;  %v1079_v29 = vld [vmem:[%s5489_s2 + $0x1598] sm:$0xff]  ;;  %v997_v31 = vld [vmem:[%s5489_s2 + $0x1308] sm:$0xff] }
 0x188   : > { %2066 = vmatpush.msra.mxu1 %v907_v26  ;;  %2118 = vmatpush.msrb.mxu0 %v1019_v50  ;;  %v1045_v32 = vld [vmem:[%s5489_s2 + $0x1488] sm:$0xff]  ;;  %v1111_v34 = vld [vmem:[%s5489_s2 + $0x1698] sm:$0xff] }
 0x189   : > { %2086 = vmatpush.msra.mxu2 %v939_v51  ;;  %2105 = vmatpush.msra.mxu3 %v973_v54  ;;  %v1077_v33 = vld [vmem:[%s5489_s2 + $0x1588] sm:$0xff]  ;;  %v1043_v35 = vld [vmem:[%s5489_s2 + $0x1478] sm:$0xff] }
 0x18a   : > { %2067 = vmatpush.msra.mxu1 %v905_v3  ;;  %2119 = vmatpush.msrb.mxu0 %v1017_v16  ;;  %v1155_v7 = vld [vmem:[%s5489_s2 + $0x17f8] sm:$0xff]  ;;  %v1109_v40 = vld [vmem:[%s5489_s2 + $0x1688] sm:$0xff] }
 0x18b   : > { %2087 = vmatpush.msra.mxu2 %v937_v55  ;;  %2106 = vmatpush.msra.mxu3 %v971_v56  ;;  %v1075_v43 = vld [vmem:[%s5489_s2 + $0x1578] sm:$0xff]  ;;  %v1041_v41 = vld [vmem:[%s5489_s2 + $0x1468] sm:$0xff] }
 0x18c   : > { %2068 = vmatpush.msra.mxu1 %v903_v36  ;;  %2120 = vmatpush.msrb.mxu0 %v1015_v57  ;;  %v1153_v44 = vld [vmem:[%s5489_s2 + $0x17e8] sm:$0xff]  ;;  %v1107_v48 = vld [vmem:[%s5489_s2 + $0x1678] sm:$0xff] }
 0x18d   : > { %2088 = vmatpush.msra.mxu2 %v935_v58  ;;  %2107 = vmatpush.msra.mxu3 %v969_v42  ;;  %v1073_v45 = vld [vmem:[%s5489_s2 + $0x1568] sm:$0xff]  ;;  %v1039_v49 = vld [vmem:[%s5489_s2 + $0x1458] sm:$0xff] }
 0x18e   : > { %2069 = vmatpush.msra.mxu1 %v901_v59  ;;  %2121 = vmatpush.msrb.mxu0 %v1013_v20  ;;  %v1071_v26 = vld [vmem:[%s5489_s2 + $0x1558] sm:$0xff]  ;;  %v1105_v50 = vld [vmem:[%s5489_s2 + $0x1668] sm:$0xff] }
 0x18f   : > { %2089 = vmatpush.msra.mxu2 %v933_v63  ;;  %2108 = vmatpush.msra.mxu3 %v967_v1  ;;  %v1037_v51 = vld [vmem:[%s5489_s2 + $0x1448] sm:$0xff]  ;;  %v1103_v16 = vld [vmem:[%s5489_s2 + $0x1658] sm:$0xff] }
 0x190   : > { %2070 = vmatmul.f32.vlgmr.msra.gmra.mxu1 %v1193_v61  ;;  %2090 = vmatmul.f32.vlgmr.msra.gmra.mxu2 %v1194_v6  ;;  %v1089_v61 = vld [vmem:[%s5489_s2 + $0x15e8] sm:$0xff]  ;;  %v1007_v6 = vld [vmem:[%s5489_s2 + $0x1358] sm:$0xff] }
 0x191   : > { %2122 = vmatpush.msrb.mxu0 %v1011_v4  ;;  %2134 = vmatpush.msrb.mxu1 %v1059_v37  ;;  %v1149_v54 = vld [vmem:[%s5489_s2 + $0x17c8] sm:$0xff]  ;;  %v1035_v55 = vld [vmem:[%s5489_s2 + $0x1438] sm:$0xff] }
 0x192   : > { %2154 = vmatpush.msrb.mxu2 %v1091_v5  ;;  %2109 = vmatpush.msra.mxu3 %v965_v9  ;;  %v1069_v3 = vld [vmem:[%s5489_s2 + $0x1548] sm:$0xff]  ;;  %v1147_v56 = vld [vmem:[%s5489_s2 + $0x17b8] sm:$0xff] }
 0x193   : > { %2123 = vmatpush.msrb.mxu0 %v1009_v10  ;;  %2110 = vmatmul.f32.vlgmr.msra.gmra.mxu3 %v1195_v62  ;;  %v1085_v62 = vld [vmem:[%s5489_s2 + $0x15c8] sm:$0xff]  ;;  %v1067_v36 = vld [vmem:[%s5489_s2 + $0x1538] sm:$0xff] }
 0x194   : > { %2135 = vmatpush.msrb.mxu1 %v1057_v24  ;;  %2155 = vmatpush.msrb.mxu2 %v1089_v61  ;;  %v1101_v57 = vld [vmem:[%s5489_s2 + $0x1648] sm:$0xff]  ;;  %v1099_v20 = vld [vmem:[%s5489_s2 + $0x1638] sm:$0xff] }
 0x195   : > { %2174 = vmatpush.msrb.mxu3 %v1123_v11  ;;  %2124 = vmatpush.msrb.mxu0 %v1007_v6  ;;  %v1033_v58 = vld [vmem:[%s5489_s2 + $0x1428] sm:$0xff]  ;;  %v1031_v63 = vld [vmem:[%s5489_s2 + $0x1418] sm:$0xff] }
 0x196   : > { %2136 = vmatpush.msrb.mxu1 %v1055_v12  ;;  %2156 = vmatpush.msrb.mxu2 %v1087_v13  ;;  %v1145_v42 = vld [vmem:[%s5489_s2 + $0x17a8] sm:$0xff]  ;;  %v1143_v1 = vld [vmem:[%s5489_s2 + $0x1798] sm:$0xff] }
 0x197   : > { %2175 = vmatpush.msrb.mxu3 %v1121_v14  ;;  %2125 = vmatpush.msrb.mxu0 %v1005_v18  ;;  %v1065_v59 = vld [vmem:[%s5489_s2 + $0x1528] sm:$0xff]  ;;  %v1063_v4 = vld [vmem:[%s5489_s2 + $0x1518] sm:$0xff] }
 0x198   : > { %2137 = vmatpush.msrb.mxu1 %v1053_v23  ;;  %2157 = vmatpush.msrb.mxu2 %v1085_v62  ;;  %v1097_v37 = vld [vmem:[%s5489_s2 + $0x1628] sm:$0xff]  ;;  %v1095_v24 = vld [vmem:[%s5489_s2 + $0x1618] sm:$0xff] }
 0x199   : > { %2176 = vmatpush.msrb.mxu3 %v1119_v2  ;;  %2126 = vmatpush.msrb.mxu0 %v1003_v19  ;;  %v1029_v5 = vld [vmem:[%s5489_s2 + $0x1408] sm:$0xff]  ;;  %v1139_v61 = vld [vmem:[%s5489_s2 + $0x1778] sm:$0xff] }
 0x19a   : > { %2138 = vmatpush.msrb.mxu1 %v1051_v21  ;;  %2158 = vmatpush.msrb.mxu2 %v1083_v25  ;;  %v1141_v9 = vld [vmem:[%s5489_s2 + $0x1788] sm:$0xff]  ;;  %v1171_v6 = vld [vmem:[%s5489_s2 + $0x1878] sm:$0xff] }
 0x19b   : > { %2177 = vmatpush.msrb.mxu3 %v1117_v27  ;;  %2127 = vmatpush.msrb.mxu0 %v1001_v0  ;;  %v1061_v10 = vld [vmem:[%s5489_s2 + $0x1508] sm:$0xff]  ;;  %v1135_v14 = vld [vmem:[%s5489_s2 + $0x1758] sm:$0xff] }
 0x19c   : > { %2139 = vmatpush.msrb.mxu1 %v1049_v15  ;;  %2159 = vmatpush.msrb.mxu2 %v1081_v53  ;;  %v1093_v11 = vld [vmem:[%s5489_s2 + $0x1608] sm:$0xff]  ;;  %v1163_v23 = vld [vmem:[%s5489_s2 + $0x1838] sm:$0xff]  ;;  %v2544_v15 = vld [vmem:[%s5471_s3] sm:$0x3] }
 0x19d   : > { %2178 = vmatpush.msrb.mxu3 %v1115_v22  ;;  %2128 = vmatpush.msrb.mxu0 %v999_v60  ;;  %v1137_v12 = vld [vmem:[%s5489_s2 + $0x1768] sm:$0xff]  ;;  %v1127_v19 = vld [vmem:[%s5489_s2 + $0x1718] sm:$0xff]  ;;  %v1228_v53 = vperm.slane %v2544_v15, 1  ;;  %v2290_v15 = vld [vmem:[%s5474_s6 + $0x60] sm:$0xff] }
 0x19e   : > { %2140 = vmatpush.msrb.mxu1 %v1047_v28  ;;  %2160 = vmatpush.msrb.mxu2 %v1079_v29  ;;  %v1169_v13 = vld [vmem:[%s5489_s2 + $0x1868] sm:$0xff]  ;;  %v1159_v21 = vld [vmem:[%s5489_s2 + $0x1818] sm:$0xff] }
 0x19f   : > { %2179 = vmatpush.msrb.mxu3 %v1113_v30  ;;  %2129 = vmatpush.msrb.mxu0 %v997_v31  ;;  %v1165_v18 = vld [vmem:[%s5489_s2 + $0x1848] sm:$0xff]  ;;  %v2543_v0 = vld [vmem:[%s3117_s15 + $0x18] ss:$0 sm:$0xff] }
 0x1a0   : > { %2141 = vmatpush.msrb.mxu1 %v1045_v32  ;;  %2161 = vmatpush.msrb.mxu2 %v1077_v33  ;;  %v1129_v62 = vld [vmem:[%s5489_s2 + $0x1728] sm:$0xff] }
 0x1a1   : > { %2180 = vmatpush.msrb.mxu3 %v1111_v34  ;;  %2130 = vmatmul.f32.vlgmr.msrb.gmra.mxu0 %v1196_v8  ;;  %v1151_v8 = vld [vmem:[%s5489_s2 + $0x17d8] sm:$0xff]  ;;  %v1161_v2 = vld [vmem:[%s5489_s2 + $0x1828] sm:$0xff] }
 0x1a2   : > { %2142 = vmatpush.msrb.mxu1 %v1043_v35  ;;  %2194 = vmatpush.msra.mxu0 %v1155_v7  ;;  %v1125_v25 = vld [vmem:[%s5489_s2 + $0x1708] sm:$0xff]  ;;  %v2255_v7 = vld [vmem:[%s5472_s4 + $0x78] sm:$0xff] }
 0x1a3   : > { %2162 = vmatpush.msrb.mxu2 %v1075_v43  ;;  %2181 = vmatpush.msrb.mxu3 %v1109_v40  ;;  %v1157_v27 = vld [vmem:[%s5489_s2 + $0x1808] sm:$0xff] }
 0x1a4   : > { %2143 = vmatpush.msrb.mxu1 %v1041_v41  ;;  %2195 = vmatpush.msra.mxu0 %v1153_v44  ;;  %v2254_v44 = vld [vmem:[%s5472_s4 + $0x70] sm:$0xff] }
 0x1a5   : > { %2163 = vmatpush.msrb.mxu2 %v1073_v45  ;;  %2182 = vmatpush.msrb.mxu3 %v1107_v48  ;;  %v1751_v22 = vpop.f32.mrf.mxu1  ;;  %v2253_v48 = vld [vmem:[%s5472_s4 + $0x68] sm:$0xff] }
 0x1a6   : > { %2144 = vmatpush.msrb.mxu1 %v1039_v49  ;;  %2196 = vmatpush.msra.mxu0 %v1151_v8  ;;  %v1752_v60 = vadd.f32 %v1751_v22, %v1228_v53  ;;  %v2289_v22 = vld [vmem:[%s5474_s6 + $0x58] sm:$0xff] }
 0x1a7   : > { %2164 = vmatpush.msrb.mxu2 %v1071_v26  ;;  %2183 = vmatpush.msrb.mxu3 %v1105_v50  ;;  %v2252_v26 = vld [vmem:[%s5472_s4 + $0x60] sm:$0xff]  ;;  %v2251_v50 = vld [vmem:[%s5472_s4 + $0x58] sm:$0xff] }
 0x1a8   : > { %2145 = vmatpush.msrb.mxu1 %v1037_v51  ;;  %2197 = vmatpush.msra.mxu0 %v1149_v54  ;;  %v2250_v54 = vld [vmem:[%s5472_s4 + $0x50] sm:$0xff] }
 0x1a9   : > { %2165 = vmatpush.msrb.mxu2 %v1069_v3  ;;  %2184 = vmatpush.msrb.mxu3 %v1103_v16  ;;  %v1771_v28 = vpop.f32.mrf.mxu2 }
 0x1aa   : > { %2146 = vmatpush.msrb.mxu1 %v1035_v55  ;;  %2198 = vmatpush.msra.mxu0 %v1147_v56  ;;  %v1772_v29 = vadd.f32 %v1771_v28, %v1752_v60  ;;  %v2249_v56 = vld [vmem:[%s5472_s4 + $0x48] sm:$0xff] }
 0x1ab   : > { %2166 = vmatpush.msrb.mxu2 %v1067_v36  ;;  %2185 = vmatpush.msrb.mxu3 %v1101_v57 }
 0x1ac   : > { %2147 = vmatpush.msrb.mxu1 %v1033_v58  ;;  %2199 = vmatpush.msra.mxu0 %v1145_v42  ;;  %v1791_v30 = vpop.f32.mrf.mxu3  ;;  %v2248_v58 = vld [vmem:[%s5472_s4 + $0x40] sm:$0xff] }
 0x1ad   : > { %2167 = vmatpush.msrb.mxu2 %v1065_v59  ;;  %2186 = vmatpush.msrb.mxu3 %v1099_v20  ;;  %v1792_v31 = vadd.f32 %v1791_v30, %v1772_v29  ;;  %v2247_v20 = vld [vmem:[%s5472_s4 + $0x38] sm:$0xff]  ;;  %v2288_v29 = vld [vmem:[%s5474_s6 + $0x50] sm:$0xff]  ;;  %v2287_v30 = vld [vmem:[%s5474_s6 + $0x48] sm:$0xff] }
 0x1ae   : > { %2148 = vmatpush.msrb.mxu1 %v1031_v63  ;;  %2200 = vmatpush.msra.mxu0 %v1143_v1  ;;  %v2246_v1 = vld [vmem:[%s5472_s4 + $0x30] sm:$0xff] }
 0x1af   : > { %2168 = vmatpush.msrb.mxu2 %v1063_v4  ;;  %2187 = vmatpush.msrb.mxu3 %v1097_v37  ;;  %v1811_v32 = vpop.f32.mrf.mxu0 }
 0x1b0   : > { %2149 = vmatpush.msrb.mxu1 %v1029_v5  ;;  %2201 = vmatpush.msra.mxu0 %v1141_v9  ;;  %v1812_v33 = vadd.f32 %v1811_v32, %v1792_v31  ;;  %v2245_v5 = vld [vmem:[%s5472_s4 + $0x28] sm:$0xff]  ;;  %v2244_v9 = vld [vmem:[%s5472_s4 + $0x20] sm:$0xff] }
 0x1b1   : > { %2169 = vmatpush.msrb.mxu2 %v1061_v10  ;;  %2188 = vmatpush.msrb.mxu3 %v1095_v24  ;;  %v2243_v24 = vld [vmem:[%s5472_s4 + $0x18] sm:$0xff] }
 0x1b2   : > { %2150 = vmatmul.f32.vlgmr.msrb.gmra.mxu1 %v1197_v38  ;;  %2170 = vmatmul.f32.vlgmr.msrb.gmra.mxu2 %v1198_v46  ;;  %v1167_v38 = vld [vmem:[%s5489_s2 + $0x1858] sm:$0xff]  ;;  %v1133_v46 = vld [vmem:[%s5489_s2 + $0x1748] sm:$0xff]  ;;  %v1831_v34 = vpop.f32.mrf.mxu1 }
 0x1b3   : > { %2202 = vmatpush.msra.mxu0 %v1139_v61  ;;  %2189 = vmatpush.msrb.mxu3 %v1093_v11  ;;  %v1832_v52 = vadd.f32 %v1831_v34, %v1812_v33  ;;  %v2286_v33 = vld [vmem:[%s5474_s6 + $0x40] sm:$0xff] }
 0x1b4   : > { %2222 = vmatpush.msra.mxu1 %v1171_v6  ;;  %2190 = vmatmul.f32.vlgmr.msrb.gmra.mxu3 %v1199_v39  ;;  %v1131_v39 = vld [vmem:[%s5489_s2 + $0x1738] sm:$0xff]  ;;  %v2242_v6 = vld [vmem:[%s5472_s4 + $0x10] sm:$0xff] }
 0x1b5   : > { %2203 = vmatpush.msra.mxu0 %v1137_v12  ;;  %v1871_v43 = vpop.f32.mrf.mxu3  ;;  %2257 = vmatpush.msra.mxu2 %v2255_v7  ;;  %v2284_v7 = vld [vmem:[%s5474_s6 + $0x30] sm:$0xff] }
 0x1b6   : > { %2223 = vmatpush.msra.mxu1 %v1169_v13 }
 0x1b7   : > { %2204 = vmatpush.msra.mxu0 %v1135_v14  ;;  %2258 = vmatpush.msra.mxu2 %v2254_v44  ;;  %v2241_v14 = vld [vmem:[%s5472_s4 + $0x8] sm:$0xff]  ;;  %v2282_v44 = vld [vmem:[%s5474_s6 + $0x20] sm:$0xff] }
 0x1b8   : > { %2224 = vmatpush.msra.mxu1 %v1167_v38 }
 0x1b9   : > { %2205 = vmatpush.msra.mxu0 %v1133_v46  ;;  %v1891_v41 = vpop.f32.mrf.mxu0  ;;  %2259 = vmatpush.msra.mxu2 %v2253_v48  ;;  %v2240_v46 = vld [vmem:[%s5472_s4] sm:$0xff] }
 0x1ba   : > { %2225 = vmatpush.msra.mxu1 %v1165_v18  ;;  %v2234_v48 = vld [vmem:[%s383_s25] sm:$0x1] }
 0x1bb   : > { %2206 = vmatpush.msra.mxu0 %v1131_v39  ;;  %2260 = vmatpush.msra.mxu2 %v2252_v26 }
 0x1bc   : > { %2226 = vmatpush.msra.mxu1 %v1163_v23 }
 0x1bd   : > { %2207 = vmatpush.msra.mxu0 %v1129_v62  ;;  %2261 = vmatpush.msra.mxu2 %v2251_v50  ;;  %v2293_v62 = vld [vmem:[%s5474_s6 + $0x78] sm:$0xff]  ;;  %v2280_v50 = vld [vmem:[%s5474_s6 + $0x10] sm:$0xff] }
 0x1be   : > { %2227 = vmatpush.msra.mxu1 %v1161_v2  ;;  %v2292_v2 = vld [vmem:[%s5474_s6 + $0x70] sm:$0xff]  ;;  %2295 = vmatpush.msra.mxu3 %v2293_v62 }
 0x1bf   : > { %2208 = vmatpush.msra.mxu0 %v1127_v19  ;;  %2262 = vmatpush.msra.mxu2 %v2250_v54  ;;  %v2278_v54 = vld [vmem:[%s5474_s6] sm:$0xff] }
 0x1c0   : > { %2228 = vmatpush.msra.mxu1 %v1159_v21  ;;  %2296 = vmatpush.msra.mxu3 %v2292_v2 }
 0x1c1   : > { %2209 = vmatpush.msra.mxu0 %v1125_v25  ;;  %2263 = vmatpush.msra.mxu2 %v2249_v56  ;;  %v2291_v25 = vld [vmem:[%s5474_s6 + $0x68] sm:$0xff] }
 0x1c2   : > { %2210 = vmatmul.f32.vlgmr.msra.gmra.mxu0 %v1200_v47  ;;  %2229 = vmatpush.msra.mxu1 %v1157_v27  ;;  %v1851_v47 = vpop.f32.mrf.mxu2 }
 0x1c3   : > { %2487 = vmatmul.msk.f32.vlgmr.msra.gmra.mxu1 %vm1231_vm0, %v2543_v0  ;;  %v1852_v35 = vadd.f32 %v1851_v47, %v1832_v52  ;;  %2264 = vmatpush.msra.mxu2 %v2248_v58  ;;  %v2285_v47 = vld [vmem:[%s5474_s6 + $0x38] sm:$0xff] }
 0x1c4   : > { %2297 = vmatpush.msra.mxu3 %v2291_v25 }
 0x1c5   : > { %v1872_v40 = vadd.f32 %v1871_v43, %v1852_v35  ;;  %2265 = vmatpush.msra.mxu2 %v2247_v20 }
 0x1c6   : > { %2298 = vmatpush.msra.mxu3 %v2290_v15 }
 0x1c7   : > { %v1892_v49 = vadd.f32 %v1891_v41, %v1872_v40  ;;  %2266 = vmatpush.msra.mxu2 %v2246_v1  ;;  %v2283_v40 = vld [vmem:[%s5474_s6 + $0x28] sm:$0xff] }
 0x1c8   : > { %2299 = vmatpush.msra.mxu3 %v2289_v22 }
 0x1c9   : > { %v1911_v45 = vpop.f32.mrf.mxu1  ;;  %2267 = vmatpush.msra.mxu2 %v2245_v5 }
 0x1ca   : > { %v1912_v51 = vadd.f32 %v1911_v45, %v1892_v49  ;;  %2300 = vmatpush.msra.mxu3 %v2288_v29  ;;  %v2281_v45 = vld [vmem:[%s5474_s6 + $0x18] sm:$0xff] }
 0x1cb   : > { %2268 = vmatpush.msra.mxu2 %v2244_v9 }
 0x1cc   : > { %2301 = vmatpush.msra.mxu3 %v2287_v30 }
 0x1cd   : > { %2269 = vmatpush.msra.mxu2 %v2243_v24 }
 0x1ce   : > { %2302 = vmatpush.msra.mxu3 %v2286_v33 }
 0x1cf   : > { %v1931_v8 = vpop.f32.mrf.mxu2  ;;  %2270 = vmatpush.msra.mxu2 %v2242_v6 }
 0x1d0   : > { %v1932_v3 = vadd.f32 %v1931_v8, %v1912_v51  ;;  %2303 = vmatpush.msra.mxu3 %v2285_v47  ;;  %v2279_v51 = vld [vmem:[%s5474_s6 + $0x8] sm:$0xff] }
 0x1d1   : > { %2271 = vmatpush.msra.mxu2 %v2241_v14 }
 0x1d2   : > { %v1951_v16 = vpop.f32.mrf.mxu3  ;;  %2304 = vmatpush.msra.mxu3 %v2284_v7 }
 0x1d3   : > { %v1952_v36 = vadd.f32 %v1951_v16, %v1932_v3  ;;  %2272 = vmatpush.msra.mxu2 %v2240_v46 }
 0x1d4   : > { %2305 = vmatpush.msra.mxu3 %v2283_v40 }
 0x1d6   : > { %2306 = vmatpush.msra.mxu3 %v2282_v44 }
 0x1d8   : > { %2307 = vmatpush.msra.mxu3 %v2281_v45 }
 0x1da   : > { %v1971_v55 = vpop.f32.mrf.mxu0  ;;  %2308 = vmatpush.msra.mxu3 %v2280_v50 }
 0x1db   : > { %v1972_v42 = vadd.f32 %v1971_v55, %v1952_v36 }
 0x1dc   : > { %2309 = vmatpush.msra.mxu3 %v2279_v51 }
 0x1de   : > { %2310 = vmatpush.msra.mxu3 %v2278_v54 }
 0x1eb   : > { %v1991_v57 = vpop.f32.mrf.mxu1 }
 0x1ec   : > { %v1992_v63 = vadd.f32 %v1991_v57, %v1972_v42 }
 0x1f1   : > { %v2011_v59 = vpop.f32.mrf.mxu2 }
 0x1f2   : > { %v2012_v4 = vadd.f32 %v2011_v59, %v1992_v63 }
 0x1f4   : > { %v2031_v37 = vpop.f32.mrf.mxu3 }
 0x1f5   : > { %v2032_v61 = vadd.f32 %v2031_v37, %v2012_v4 }
 0x1fc   : > { %v2051_v10 = vpop.f32.mrf.mxu0 }
 0x1fd   : > { %v2052_v12 = vadd.f32 %v2051_v10, %v2032_v61 }
 0x20d   : > { %v2071_v11 = vpop.f32.mrf.mxu1 }
 0x20e   : > { %v2072_v38 = vadd.f32 %v2071_v11, %v2052_v12 }
 0x213   : > { %v2091_v13 = vpop.f32.mrf.mxu2 }
 0x214   : > { %v2092_v18 = vadd.f32 %v2091_v13, %v2072_v38 }
 0x216   : > { %v2111_v39 = vpop.f32.mrf.mxu3 }
 0x217   : > { %v2112_v19 = vadd.f32 %v2111_v39, %v2092_v18 }
 0x21e   : > { %v2131_v23 = vpop.f32.mrf.mxu0 }
 0x21f   : > { %v2132_v27 = vadd.f32 %v2131_v23, %v2112_v19 }
 0x22f   : > { %v2151_v21 = vpop.f32.mrf.mxu1 }
 0x230   : > { %v2152_v53 = vadd.f32 %v2151_v21, %v2132_v27 }
 0x235   : > { %v2171_v0 = vpop.f32.mrf.mxu2 }
 0x236   : > { %v2172_v60 = vadd.f32 %v2171_v0, %v2152_v53 }
 0x237   : > { %v2191_v28 = vpop.f32.mrf.mxu3 }
 0x238   : > { %v2192_v31 = vadd.f32 %v2191_v28, %v2172_v60 }
 0x23f   : > { %v2211_v32 = vpop.f32.mrf.mxu0 }
 0x240   : > { %v2212_v34 = vadd.f32 %v2211_v32, %v2192_v31  ;;  %v2231_v52 = vpop.f32.mrf.mxu1 }
 0x242   : > { %v2232_v35 = vadd.f32 %v2231_v52, %v2212_v34 }
 0x244   : > { %v2235_v43 = vmul.f32 0.5, %v2232_v35  ;;  %2316 = vst [vmem:[%s370_s22] sm:$0x1] %v2232_v35  ;;  %s2565_s22 = scalar_lea.hbm %s5477_s9, 2 }
 0x245   : > { %p2567_p1 = scmp.lt.s32.totalorder %s2565_s22, %s2561_s0 }
 0x246   : > { %v2236_v41 = vmul.f32 1.442695, %v2235_v43 }
 0x247   : > { %p2568_p2 = por %p2567_p1, %p2566_p0 }
 0x248   : > { %2541 = vpow2.f32 %v2236_v41 }
 0x249   : > { %p2569_p3 = pnand %p2568_p2, %p2564_p13 }
 0x24e   : > { %v2542_v49 = vpop.eup %2541 }
 0x24f   : > { %v2238_v8 = vmul.f32 %v2542_v49, %v2234_v48 }
 0x251   : > { %v2239_v26 = vadd.f32 %v2238_v8, %v4882_v17  ;;  %v2256_v17 = vld [vmem:[%s5473_s5] sm:$0x1] }
 0x253   : > { %2273 = vmatmul.f32.vlgmr.msra.gmra.mxu2 %v2239_v26 }
 0x2d6   : > { %v2274_v3 = vpop.f32.mrf.mxu2 }
 0x2d7   : > { %v2275_v16 = vadd.f32 %v2274_v3, %v2256_v17 }
 0x2d9   : > { %v2277_v55 = vmax.f32 %v2275_v16, 0.0 }
 0x2db   : > { %2311 = vmatmul.f32.vlgmr.msra.gmra.mxu3 %v2277_v55 }
 0x2dc   : > { %2572 = shalt.err (!%p2569_p3)
}
 0x2dd   : > { %2492 = dma.vmem_to_hbm [thread:$0]  (%p2764_p5), %s2351_s21, 16, %s2353_s29, %s5404_s18  }
 0x2de   : > { %s5492_s20 = scalar_lea.vmem [#allocation2], %s4856_s28  ;;  %s2339_s15 = sshll.u32 %s2335_s27, 4  ;;  %s2340_s15 = int_to_ptr.hbm [resolvable:$true] %s2339_s15 }
 0x2df   : > { %s2337_s26 = sshll.u32 %s5492_s20, 4  ;;  %s2319_s25 = scalar_lea.sflag [#allocation3], %s4856_s28  ;;  %s2338_s26 = int_to_ptr.vmem [resolvable:$true] %s2337_s26 }
 0x2e0   : > { %s2587_s12 = sshra.s32 %s2340_s15, 4  ;;  %s2593_s22 = scalar_lea.hbm %s5476_s8, 2  ;;  %s2588_s12 = int_to_ptr.hbm [resolvable:$true] %s2587_s12 }
 0x2e1   : > { %s2589_s1 = scalar_lea.hbm %s2588_s12, 1  ;;  %p2594_p9 = scmp.lt.s32.totalorder %s2588_s12, %s5476_s8 }
 0x2e2   : > { %p2590_p4 = scmp.ne.s32.totalorder %s2588_s12, %s2589_s1  ;;  %p2595_p10 = scmp.lt.s32.totalorder %s2593_s22, %s2589_s1 }
 0x2e4   : > { %p2591_p7 = pnand %p2590_p4, %p2764_p5  ;;  %p2596_p11 = por %p2595_p10, %p2594_p9 }
 0x2e6   : > { %p2592_p8 = pneg %p2591_p7 }
 0x2e8   : > { %p2597_p12 = pnand %p2596_p11, %p2592_p8 }
 0x2ea   : > { %2600 = shalt.err (!%p2597_p12)
}
 0x2eb   : > { %2491 = dma.vmem_to_hbm [thread:$0]  (%p2764_p5), %s2338_s26, 16, %s2340_s15, %s2319_s25   ;;  %v2294_v56 = vld [vmem:[%s5475_s7] sm:$0x1] }
 0x2ec   : > { %s2361_s27 = scalar_lea.hbm %s5478_s10, %s2745_s17  ;;  %s376_s2 = scalar_lea.vmem [#allocation6], %s4856_s28 }
 0x2ed   : > { %s2363_s12 = sshll.u32 %s376_s2, 4  ;;  %s2365_s1 = sshll.u32 %s2361_s27, 4  ;;  %s2364_s12 = int_to_ptr.vmem [resolvable:$true] %s2363_s12  ;;  %s2366_s1 = int_to_ptr.hbm [resolvable:$true] %s2365_s1 }
 0x2ee   : > { %s2615_s30 = sshra.s32 %s2366_s1, 4  ;;  %s2621_s15 = scalar_lea.hbm %s5478_s10, 2  ;;  %s2616_s30 = int_to_ptr.hbm [resolvable:$true] %s2615_s30 }
 0x2ef   : > { %s2617_s22 = scalar_lea.hbm %s2616_s30, 1  ;;  %p2622_p2 = scmp.lt.s32.totalorder %s2616_s30, %s5478_s10 }
 0x2f0   : > { %p2618_p13 = scmp.ne.s32.totalorder %s2616_s30, %s2617_s22  ;;  %p2623_p3 = scmp.lt.s32.totalorder %s2621_s15, %s2617_s22 }
 0x2f2   : > { %p2619_p0 = pnand %p2618_p13, %p2764_p5  ;;  %p2624_p4 = por %p2623_p3, %p2622_p2 }
 0x2f4   : > { %p2620_p1 = pneg %p2619_p0 }
 0x2f6   : > { %p2625_p7 = pnand %p2624_p4, %p2620_p1 }
 0x35e   : > { %v2312_v36 = vpop.f32.mrf.mxu3 }
 0x35f   : > { %v2313_v57 = vadd.f32 %v2312_v36, %v2294_v56 }
 0x361   : > { %2317 = vst [vmem:[%s376_s2] sm:$0x1] %v2313_v57 }
 0x362   : > { %2628 = shalt.err (!%p2625_p7)
}
 0x363   : > { %2493 = dma.vmem_to_hbm [thread:$0]  (%p2764_p5), %s2364_s12, 16, %s2366_s1, %s5404_s18  }
 0x364 PF: > { %p2507_p8 = scmp.ge.s32.totalorder %s2667_s16, 2  ;;  %s2377_s11 = sand.u32 1, %s2655_s13  }
 0x365   : > { %s2378_s21 = scalar_lea.sflag [#allocation3], %s2377_s11 }
 0x366   : > { %p2498_p9 = pnand %p2507_p8, %p2768_p6 }
 0x368   : > { %p2499_p10 = pneg %p2498_p9 }
 0x36a   : > { %2646 = dma.done.wait (%p2499_p10), %s2378_s21, 16  }
 0x36b   : > { %2648 = vsyncadd (%p2499_p10), %s2378_s21, 4294967280  ;;  %s5493_s29 = sadd.s32 4294967294, %s2667_s16  }
 0x36c   : > { %s2386_s27 = sand.u32 1, %s5493_s29  }
 0x36d   : > { %s2387_s20 = scalar_lea.sflag [#allocation5], %s2386_s27 }
 0x36e   : > { %2650 = dma.done.wait (%p2499_p10), %s2387_s20, 32  }
 0x36f   : > { %2652 = vsyncadd (%p2499_p10), %s2387_s20, 4294967264  ;;  %s5494_s23 = sld [smem:[#allocation9_spill]]  ;;  %p24_p5 = scmp.ge.s32.totalorder %s2749_s19, 4  }
 0x370   : > { %s5495_s15 = sld [smem:[#allocation10_spill]]  ;;  %s5496_s13 = smov %s2659_s14 }
 0x371   : > { %s5498_s16 = smov %s2749_s19  ;;  %26 = sbr.rel (!%p24_p5) target bundleno = 9 (0x9), region = 122 }
 0x375   : > { %s5497_s14 = smov %s5494_s23 }
 0x376   :  { %2401 = vsyncpa [#allocation3], 1 }
 0x377   :  { %2403 = vsyncpa [#allocation3 + $0x1], 1 }
 0x378   :  { %2404 = vsyncpa [#allocation5], 1 }
 0x379   :  { %2406 = vsyncpa [#allocation5 + $0x1], 1 }

</bundles_post_ra>
